<compile_context>
chip_gen: v7x
topology: tpu7x:2x2x1
jax: 0.10.0
libtpu: 0.0.40
codegen_flags: <defaults>
</compile_context>

<pallas_src>
import functools

import numpy as np

import jax
import jax.numpy as jnp
from jax.experimental import pallas as pl
from jax.experimental.pallas import tpu as pltpu


# ---------------------------------------------------------------------------
# Kernel
# ---------------------------------------------------------------------------
def _iaff_kernel(
    x_ref, r_ref, m_ref,
    ga1_ref, ga2_ref, gm1_ref, gm2_ref,
    w1_ref, b1_ref, w2_ref, b2_ref,
    o_ref,
    *, w_img, hw_true, mid, mm_dtype,
):
    C = x_ref.shape[1]
    HWp = x_ref.shape[2]

    x = x_ref[0].astype(jnp.float32)          # (C, HWp)
    r = r_ref[0].astype(jnp.float32)          # (C, HWp)
    d = x - r                                  # reused by both fusion steps

    # Per-tap boundary masks + valid-pixel mask, each (1, HWp); read once.
    tap_masks = [m_ref[k:k + 1, :] for k in range(9)]
    valid_b = m_ref[9:10, :] > 0.5
    neg_fill = jnp.float32(jnp.finfo(jnp.float32).min)

    ga1 = ga1_ref[...]                         # (C, mid) avg-pool branch, layer 1 (pre-T)
    ga2 = ga2_ref[...]                         # (C, mid) avg-pool branch, layer 2
    gm1 = gm1_ref[...]                         # (C, mid) max-pool branch, layer 1 (pre-T)
    gm2 = gm2_ref[...]                         # (C, mid) max-pool branch, layer 2
    w1 = w1_ref[...]                           # (2*mid, 9*C) fused local layer 1
    b1 = b1_ref[...]                           # (2*mid, 1)
    w2 = w2_ref[...]                           # (C, 10*mid) fused local layer 2
    b2 = b2_ref[...]                           # (C, 1)

    inv_hw = jnp.float32(1.0 / hw_true)
    shifts = tuple(dy * w_img + dx for dy in (-1, 0, 1) for dx in (-1, 0, 1))

    def tap_parts(a):
        """9 shifted + boundary-masked copies of a (cin, HWp) map (XLU rolls)."""
        parts = []
        for k, s in enumerate(shifts):
            t = a if s == 0 else pltpu.roll(a, shift=(-s) % HWp, axis=1)
            parts.append(t * tap_masks[k])
        return parts

    def attention(att):
        """MS-CAM attention weights for one fusion round: (C, HWp) -> (C, HWp)."""
        # -- global (pooled squeeze-excite, bias-free) branches on VPU/XLU --
        avg = jnp.sum(att, axis=1, keepdims=True) * inv_hw                    # (C, 1)
        mx = jnp.max(jnp.where(valid_b, att, neg_fill), axis=1, keepdims=True)
        h_a = jnp.maximum(jnp.sum(ga1 * avg, axis=0, keepdims=True), 0.0)     # (1, mid)
        g_a = jnp.sum(ga2 * h_a, axis=1, keepdims=True)                       # (C, 1)
        h_m = jnp.maximum(jnp.sum(gm1 * mx, axis=0, keepdims=True), 0.0)      # (1, mid)
        g_m = jnp.sum(gm2 * h_m, axis=1, keepdims=True)                       # (C, 1)
        g = g_a + g_m                                                         # (C, 1)

        # -- fused local layer 1: one MXU matmul, K = 9*C --
        #    rows [0:mid]     -> 3x3 conv hidden (h3)
        #    rows [mid:2*mid] -> 1x1 conv hidden (h1), weight sits in the
        #                        centre-tap column block of w1.
        stack1 = jnp.concatenate(tap_parts(att), axis=0)                      # (9*C, HWp)
        h = jnp.maximum(
            jnp.dot(w1, stack1.astype(mm_dtype),
                    preferred_element_type=jnp.float32) + b1, 0.0)            # (2*mid, HWp)
        h3 = h[:mid]
        h1 = h[mid:]

        # -- fused local layer 2: one MXU matmul, K = 10*mid --
        #    columns [0:9*mid] multiply the 9 shifted taps of h3 (3x3 conv),
        #    columns [9*mid:]  multiply h1 (1x1 conv); l1+l3 summed in the MXU.
        stack2 = jnp.concatenate(tap_parts(h3) + [h1], axis=0)                # (10*mid, HWp)
        l = jnp.dot(w2, stack2.astype(mm_dtype),
                    preferred_element_type=jnp.float32) + b2                  # (C, HWp)

        return jax.nn.sigmoid(l + g)

    wei = attention(x + r)
    xi = r + d * wei
    wei2 = attention(xi)
    o_ref[0] = (r + d * wei2).astype(o_ref.dtype)


# ---------------------------------------------------------------------------
# Wrapper
# ---------------------------------------------------------------------------
def _fold_bn(w, b, gamma, beta, mean, var, eps=1e-5):
    """Fold eval-mode BatchNorm into the preceding conv's weight/bias."""
    s = gamma / jnp.sqrt(var + eps)
    w_f = w * s.reshape((-1,) + (1,) * (w.ndim - 1))
    b_f = (b - mean) * s + beta
    return w_f, b_f


def iaffmod_forward(x, residual, p, *, matmul_dtype=jnp.bfloat16):
    """iAFFmod forward (eval-mode BN) with a single fused Pallas TPU kernel.

    matmul_dtype: MXU operand dtype (bf16 default = fast path on v6e/v7x).
    Accumulation, biases and all element-wise math stay float32.
    """
    B, C, H, W = x.shape
    HW = H * W
    HWp = ((HW + 127) // 128) * 128      # lane-dense spatial axis
    mid = p["w_l1a"].shape[0]

    # ---- fold eval-mode BatchNorm into the local-branch convolutions ----
    w11, b11 = _fold_bn(p["w_l1a"], p["b_l1a"],
                        p["bn_l1a_g"], p["bn_l1a_b"], p["bn_l1a_m"], p["bn_l1a_v"])
    w12, b12 = _fold_bn(p["w_l1b"], p["b_l1b"],
                        p["bn_l1b_g"], p["bn_l1b_b"], p["bn_l1b_m"], p["bn_l1b_v"])
    w31, b31 = _fold_bn(p["w_l3a"], p["b_l3a"],
                        p["bn_l3a_g"], p["bn_l3a_b"], p["bn_l3a_m"], p["bn_l3a_v"])
    w32, b32 = _fold_bn(p["w_l3b"], p["b_l3b"],
                        p["bn_l3b_g"], p["bn_l3b_b"], p["bn_l3b_m"], p["bn_l3b_v"])

    # ---- fused layer-1 weight (2*mid, 9*C): taps stacked along K, the 1x1
    #      weight placed in the centre-tap column block ----
    w31_flat = jnp.transpose(w31, (0, 2, 3, 1)).reshape(mid, 9 * C)   # [m, k*C + c]
    w11_blk = jnp.zeros((mid, 9 * C), jnp.float32).at[:, 4 * C:5 * C].set(w11)
    w1 = jnp.concatenate([w31_flat, w11_blk], axis=0).astype(matmul_dtype)
    b1 = jnp.concatenate([b31, b11], axis=0).reshape(2 * mid, 1)

    # ---- fused layer-2 weight (C, 10*mid): [3x3 taps of h3 | 1x1 of h1] ----
    w32_flat = jnp.transpose(w32, (0, 2, 3, 1)).reshape(C, 9 * mid)   # [c, k*mid + m]
    w2 = jnp.concatenate([w32_flat, w12], axis=1).astype(matmul_dtype)
    b2 = (b32 + b12).reshape(C, 1)

    ga1_t = p["w_ga1"].T.astype(jnp.float32)   # avg-pool branch ('global_attmax')
    ga2 = p["w_ga2"].astype(jnp.float32)
    gm1_t = p["w_gm1"].T.astype(jnp.float32)   # max-pool branch ('global_attavg')
    gm2 = p["w_gm2"].astype(jnp.float32)

    # ---- flatten + lane-pad the feature maps ----
    x_flat = x.reshape(B, C, HW)
    r_flat = residual.reshape(B, C, HW)
    if HWp != HW:
        pad = ((0, 0), (0, 0), (0, HWp - HW))
        x_flat = jnp.pad(x_flat, pad)
        r_flat = jnp.pad(r_flat, pad)

    # ---- per-tap boundary masks + valid mask as a 2-D (10, HWp) slab ----
    pidx = jnp.arange(HWp)
    col = pidx % W
    row = pidx // W
    true_pix = pidx < HW
    rows = []
    for dy in (-1, 0, 1):
        for dx in (-1, 0, 1):
            rows.append(true_pix
                        & (col + dx >= 0) & (col + dx <= W - 1)
                        & (row + dy >= 0) & (row + dy <= H - 1))
    rows.append(true_pix)
    masks = jnp.stack(rows).astype(jnp.float32)          # (10, HWp)

    kernel = functools.partial(_iaff_kernel, w_img=W, hw_true=HW, mid=mid,
                               mm_dtype=matmul_dtype)

    mm_bytes = np.dtype(matmul_dtype).itemsize
    io_bytes = x.dtype.itemsize
    cost = pl.CostEstimate(
        flops=int(2 * B * HWp * (2 * (2 * mid) * (9 * C) + 2 * C * (10 * mid))),
        transcendentals=int(2 * B * C * HWp),
        bytes_accessed=int(3 * B * C * HWp * io_bytes
                           + (2 * mid * 9 * C + C * 10 * mid) * mm_bytes
                           + (4 * C * mid + 10 * HWp + 3 * mid + 2 * C) * 4),
    )

    # keep the request well under v7x's 64 MiB physical VMEM per TensorCore
    vmem_limit = int(min(48 * 1024 * 1024,
                         max(16 * 1024 * 1024, 64 * C * HWp * 4)))

    out_flat = pl.pallas_call(
        kernel,
        out_shape=jax.ShapeDtypeStruct((B, C, HWp), x.dtype),
        grid_spec=pltpu.PrefetchScalarGridSpec(
            num_scalar_prefetch=0,
            grid=(B,),
            in_specs=[
                pl.BlockSpec((1, C, HWp), lambda b: (b, 0, 0)),      # x
                pl.BlockSpec((1, C, HWp), lambda b: (b, 0, 0)),      # residual
                pl.BlockSpec((10, HWp), lambda b: (0, 0)),           # boundary/valid masks
                pl.BlockSpec((C, mid), lambda b: (0, 0)),            # ga1 (transposed)
                pl.BlockSpec((C, mid), lambda b: (0, 0)),            # ga2
                pl.BlockSpec((C, mid), lambda b: (0, 0)),            # gm1 (transposed)
                pl.BlockSpec((C, mid), lambda b: (0, 0)),            # gm2
                pl.BlockSpec((2 * mid, 9 * C), lambda b: (0, 0)),    # fused layer-1 weight
                pl.BlockSpec((2 * mid, 1), lambda b: (0, 0)),        # fused layer-1 bias
                pl.BlockSpec((C, 10 * mid), lambda b: (0, 0)),       # fused layer-2 weight
                pl.BlockSpec((C, 1), lambda b: (0, 0)),              # fused layer-2 bias
            ],
            out_specs=pl.BlockSpec((1, C, HWp), lambda b: (b, 0, 0)),
        ),
        compiler_params=pltpu.CompilerParams(
            dimension_semantics=("parallel",),
            vmem_limit_bytes=vmem_limit,
        ),
        cost_estimate=cost,
    )(x_flat, r_flat, masks,
      ga1_t, ga2, gm1_t, gm2,
      w1, b1, w2, b2)

    return out_flat[:, :, :HW].reshape(B, C, H, W)


# ---------------------------------------------------------------------------
# Pure-JAX reference (unfolded BN, XLA convs) for correctness checking
# ---------------------------------------------------------------------------
def iaffmod_reference(x, residual, p):
    eps = 1e-5
    hp = jax.lax.Precision.HIGHEST

    def bn(z, g, b, m, v):
        return ((z - m[None, :, None, None])
                / jnp.sqrt(v[None, :, None, None] + eps)
                * g[None, :, None, None] + b[None, :, None, None])

    def conv1x1(z, w, b=None):
        out = jnp.einsum("bchw,oc->bohw", z, w, precision=hp)
        if b is not None:
            out = out + b[None, :, None, None]
        return out

    def conv3x3(z, w, b):
        out = jax.lax.conv_general_dilated(
            z, w, window_strides=(1, 1), padding="SAME",
            dimension_numbers=("NCHW", "OIHW", "NCHW"), precision=hp)
        return out + b[None, :, None, None]

    def local_att1(z):
        h = jax.nn.relu(bn(conv1x1(z, p["w_l1a"], p["b_l1a"]),
                           p["bn_l1a_g"], p["bn_l1a_b"], p["bn_l1a_m"], p["bn_l1a_v"]))
        return bn(conv1x1(h, p["w_l1b"], p["b_l1b"]),
                  p["bn_l1b_g"], p["bn_l1b_b"], p["bn_l1b_m"], p["bn_l1b_v"])

    def local_att3(z):
        h = jax.nn.relu(bn(conv3x3(z, p["w_l3a"], p["b_l3a"]),
                           p["bn_l3a_g"], p["bn_l3a_b"], p["bn_l3a_m"], p["bn_l3a_v"]))
        return bn(conv3x3(h, p["w_l3b"], p["b_l3b"]),
                  p["bn_l3b_g"], p["bn_l3b_b"], p["bn_l3b_m"], p["bn_l3b_v"])

    def global_att_avgpool(z):       # module 'global_attmax' (AdaptiveAvgPool2d)
        y = jnp.mean(z, axis=(2, 3), keepdims=True)
        return conv1x1(jax.nn.relu(conv1x1(y, p["w_ga1"])), p["w_ga2"])

    def global_att_maxpool(z):       # module 'global_attavg' (AdaptiveMaxPool2d)
        y = jnp.max(z, axis=(2, 3), keepdims=True)
        return conv1x1(jax.nn.relu(conv1x1(y, p["w_gm1"])), p["w_gm2"])

    def fuse_weights(z):
        return jax.nn.sigmoid(local_att1(z) + local_att3(z)
                              + global_att_avgpool(z) + global_att_maxpool(z))

    xa = x + residual
    wei = fuse_weights(xa)
    xi = x * wei + residual * (1.0 - wei)
    wei2 = fuse_weights(xi)
    return x * wei2 + residual * (1.0 - wei2)


def _init_params(key, C, r):
    mid = C // r
    keys = iter(jax.random.split(key, 32))
    nrm = lambda shape, s=0.1: jax.random.normal(next(keys), shape, jnp.float32) * s
    uni = lambda shape: jax.random.uniform(next(keys), shape, jnp.float32, 0.5, 1.5)

    def bn_params(n):
        return 1.0 + nrm((n,)), nrm((n,)), nrm((n,)), uni((n,))   # gamma, beta, mean, var

    p = {}
    p["w_ga1"], p["w_ga2"] = nrm((mid, C)), nrm((C, mid))          # avg-pool branch (no bias)
    p["w_gm1"], p["w_gm2"] = nrm((mid, C)), nrm((C, mid))          # max-pool branch (no bias)
    p["w_l1a"], p["b_l1a"] = nrm((mid, C)), nrm((mid,))
    p["bn_l1a_g"], p["bn_l1a_b"], p["bn_l1a_m"], p["bn_l1a_v"] = bn_params(mid)
    p["w_l1b"], p["b_l1b"] = nrm((C, mid)), nrm((C,))
    p["bn_l1b_g"], p["bn_l1b_b"], p["bn_l1b_m"], p["bn_l1b_v"] = bn_params(C)
    p["w_l3a"], p["b_l3a"] = nrm((mid, C, 3, 3)), nrm((mid,))
    p["bn_l3a_g"], p["bn_l3a_b"], p["bn_l3a_m"], p["bn_l3a_v"] = bn_params(mid)
    p["w_l3b"], p["b_l3b"] = nrm((C, mid, 3, 3)), nrm((C,))
    p["bn_l3b_g"], p["bn_l3b_b"], p["bn_l3b_m"], p["bn_l3b_v"] = bn_params(C)
    return p


if __name__ == "__main__":
    B, C, H, W = 2, 64, 16, 16        # module defaults: channels=64, r=4
    r = 4

    key = jax.random.PRNGKey(0)
    kx, kr, kp = jax.random.split(key, 3)
    x = jax.random.normal(kx, (B, C, H, W), dtype=jnp.float32)
    residual = jax.random.normal(kr, (B, C, H, W), dtype=jnp.float32)
    params = _init_params(kp, C, r)

    ref = jax.block_until_ready(iaffmod_reference(x, residual, params))

    # Strict correctness check: f32 MXU operands.
    out_f32 = jax.block_until_ready(
        iaffmod_forward(x, residual, params, matmul_dtype=jnp.float32))
    assert out_f32.shape == (B, C, H, W)
    err_f32 = float(jnp.max(jnp.abs(out_f32 - ref)))
    assert err_f32 < 2e-2, f"f32 path mismatch vs reference: max abs err = {err_f32}"

    # Fast path (default): bf16 MXU operands, f32 accumulation / element-wise.
    out_bf16 = jax.block_until_ready(iaffmod_forward(x, residual, params))
    err_bf16_max = float(jnp.max(jnp.abs(out_bf16 - ref)))
    err_bf16_mean = float(jnp.mean(jnp.abs(out_bf16 - ref)))
    assert err_bf16_max < 2.5e-1, f"bf16 path max abs err = {err_bf16_max}"
    assert err_bf16_mean < 3e-2, f"bf16 path mean abs err = {err_bf16_mean}"

    # Odd spatial size: exercises lane padding + image-boundary tap masks.
    x2 = jax.random.normal(jax.random.PRNGKey(1), (1, C, 11, 13), jnp.float32)
    res2 = jax.random.normal(jax.random.PRNGKey(2), (1, C, 11, 13), jnp.float32)
    out2 = jax.block_until_ready(
        iaffmod_forward(x2, res2, params, matmul_dtype=jnp.float32))
    ref2 = jax.block_until_ready(iaffmod_reference(x2, res2, params))
    err2 = float(jnp.max(jnp.abs(out2 - ref2)))
    assert err2 < 2e-2, f"padded-shape mismatch vs reference: max abs err = {err2}"

    print("KERNEL_OK")
</pallas_src>

<mosaic_0001>
module attributes {stable_mosaic.version = 11 : i64} {
  func.func @_iaff_kernel(%arg0: i32, %arg1: memref<1x64x256xf32, #tpu.memory_space<vmem>>, %arg2: memref<1x64x256xf32, #tpu.memory_space<vmem>>, %arg3: memref<10x256xf32, #tpu.memory_space<vmem>>, %arg4: memref<64x16xf32, #tpu.memory_space<vmem>>, %arg5: memref<64x16xf32, #tpu.memory_space<vmem>>, %arg6: memref<64x16xf32, #tpu.memory_space<vmem>>, %arg7: memref<64x16xf32, #tpu.memory_space<vmem>>, %arg8: memref<32x576xf32, #tpu.memory_space<vmem>>, %arg9: memref<32x1xf32, #tpu.memory_space<vmem>>, %arg10: memref<64x160xf32, #tpu.memory_space<vmem>>, %arg11: memref<64x1xf32, #tpu.memory_space<vmem>>, %arg12: memref<1x64x256xf32, #tpu.memory_space<vmem>>) attributes {dimension_semantics = [#tpu.dimension_semantics<parallel>], iteration_bounds = array<i64: 2>, scalar_prefetch = 0 : i64, scratch_operands = 0 : i64, tpu.core_type = #tpu.core_type<tc>, window_params = [{transform_indices = @transform_0, window_bounds = array<i64: 1, 64, 256>}, {transform_indices = @transform_1, window_bounds = array<i64: 1, 64, 256>}, {pipeline_mode = #tpu.pipeline_mode<synchronous>, transform_indices = @transform_2, window_bounds = array<i64: 10, 256>}, {pipeline_mode = #tpu.pipeline_mode<synchronous>, transform_indices = @transform_3, window_bounds = array<i64: 64, 16>}, {pipeline_mode = #tpu.pipeline_mode<synchronous>, transform_indices = @transform_4, window_bounds = array<i64: 64, 16>}, {pipeline_mode = #tpu.pipeline_mode<synchronous>, transform_indices = @transform_5, window_bounds = array<i64: 64, 16>}, {pipeline_mode = #tpu.pipeline_mode<synchronous>, transform_indices = @transform_6, window_bounds = array<i64: 64, 16>}, {pipeline_mode = #tpu.pipeline_mode<synchronous>, transform_indices = @transform_7, window_bounds = array<i64: 32, 576>}, {pipeline_mode = #tpu.pipeline_mode<synchronous>, transform_indices = @transform_8, window_bounds = array<i64: 32, 1>}, {pipeline_mode = #tpu.pipeline_mode<synchronous>, transform_indices = @transform_9, window_bounds = array<i64: 64, 160>}, {pipeline_mode = #tpu.pipeline_mode<synchronous>, transform_indices = @transform_10, window_bounds = array<i64: 64, 1>}, {transform_indices = @transform_11, window_bounds = array<i64: 1, 64, 256>}]} {
    %c0 = arith.constant 0 : index
    %c0_0 = arith.constant 0 : index
    %c0_1 = arith.constant 0 : index
    %0 = vector.load %arg1[%c0, %c0_0, %c0_1] : memref<1x64x256xf32, #tpu.memory_space<vmem>>, vector<1x64x256xf32>
    %1 = vector.shape_cast %0 : vector<1x64x256xf32> to vector<64x256xf32>
    %c0_2 = arith.constant 0 : index
    %c0_3 = arith.constant 0 : index
    %c0_4 = arith.constant 0 : index
    %2 = vector.load %arg2[%c0_2, %c0_3, %c0_4] : memref<1x64x256xf32, #tpu.memory_space<vmem>>, vector<1x64x256xf32>
    %3 = vector.shape_cast %2 : vector<1x64x256xf32> to vector<64x256xf32>
    %4 = arith.subf %1, %3 : vector<64x256xf32>
    %c0_5 = arith.constant 0 : index
    %c0_6 = arith.constant 0 : index
    %5 = vector.load %arg3[%c0_5, %c0_6] : memref<10x256xf32, #tpu.memory_space<vmem>>, vector<1x256xf32>
    %c1 = arith.constant 1 : index
    %c0_7 = arith.constant 0 : index
    %6 = vector.load %arg3[%c1, %c0_7] : memref<10x256xf32, #tpu.memory_space<vmem>>, vector<1x256xf32>
    %c2 = arith.constant 2 : index
    %c0_8 = arith.constant 0 : index
    %7 = vector.load %arg3[%c2, %c0_8] : memref<10x256xf32, #tpu.memory_space<vmem>>, vector<1x256xf32>
    %c3 = arith.constant 3 : index
    %c0_9 = arith.constant 0 : index
    %8 = vector.load %arg3[%c3, %c0_9] : memref<10x256xf32, #tpu.memory_space<vmem>>, vector<1x256xf32>
    %c4 = arith.constant 4 : index
    %c0_10 = arith.constant 0 : index
    %9 = vector.load %arg3[%c4, %c0_10] : memref<10x256xf32, #tpu.memory_space<vmem>>, vector<1x256xf32>
    %c5 = arith.constant 5 : index
    %c0_11 = arith.constant 0 : index
    %10 = vector.load %arg3[%c5, %c0_11] : memref<10x256xf32, #tpu.memory_space<vmem>>, vector<1x256xf32>
    %c6 = arith.constant 6 : index
    %c0_12 = arith.constant 0 : index
    %11 = vector.load %arg3[%c6, %c0_12] : memref<10x256xf32, #tpu.memory_space<vmem>>, vector<1x256xf32>
    %c7 = arith.constant 7 : index
    %c0_13 = arith.constant 0 : index
    %12 = vector.load %arg3[%c7, %c0_13] : memref<10x256xf32, #tpu.memory_space<vmem>>, vector<1x256xf32>
    %c8 = arith.constant 8 : index
    %c0_14 = arith.constant 0 : index
    %13 = vector.load %arg3[%c8, %c0_14] : memref<10x256xf32, #tpu.memory_space<vmem>>, vector<1x256xf32>
    %c9 = arith.constant 9 : index
    %c0_15 = arith.constant 0 : index
    %14 = vector.load %arg3[%c9, %c0_15] : memref<10x256xf32, #tpu.memory_space<vmem>>, vector<1x256xf32>
    %cst = arith.constant 5.000000e-01 : f32
    %15 = vector.broadcast %cst : f32 to vector<1x256xf32>
    %16 = arith.cmpf ogt, %14, %15 : vector<1x256xf32>
    %c0_16 = arith.constant 0 : index
    %c0_17 = arith.constant 0 : index
    %17 = vector.load %arg4[%c0_16, %c0_17] : memref<64x16xf32, #tpu.memory_space<vmem>>, vector<64x16xf32>
    %c0_18 = arith.constant 0 : index
    %c0_19 = arith.constant 0 : index
    %18 = vector.load %arg5[%c0_18, %c0_19] : memref<64x16xf32, #tpu.memory_space<vmem>>, vector<64x16xf32>
    %c0_20 = arith.constant 0 : index
    %c0_21 = arith.constant 0 : index
    %19 = vector.load %arg6[%c0_20, %c0_21] : memref<64x16xf32, #tpu.memory_space<vmem>>, vector<64x16xf32>
    %c0_22 = arith.constant 0 : index
    %c0_23 = arith.constant 0 : index
    %20 = vector.load %arg7[%c0_22, %c0_23] : memref<64x16xf32, #tpu.memory_space<vmem>>, vector<64x16xf32>
    %c0_24 = arith.constant 0 : index
    %c0_25 = arith.constant 0 : index
    %21 = vector.load %arg8[%c0_24, %c0_25] : memref<32x576xf32, #tpu.memory_space<vmem>>, vector<32x576xf32>
    %c0_26 = arith.constant 0 : index
    %c0_27 = arith.constant 0 : index
    %22 = vector.load %arg9[%c0_26, %c0_27] : memref<32x1xf32, #tpu.memory_space<vmem>>, vector<32x1xf32>
    %c0_28 = arith.constant 0 : index
    %c0_29 = arith.constant 0 : index
    %23 = vector.load %arg10[%c0_28, %c0_29] : memref<64x160xf32, #tpu.memory_space<vmem>>, vector<64x160xf32>
    %c0_30 = arith.constant 0 : index
    %c0_31 = arith.constant 0 : index
    %24 = vector.load %arg11[%c0_30, %c0_31] : memref<64x1xf32, #tpu.memory_space<vmem>>, vector<64x1xf32>
    %25 = arith.addf %1, %3 : vector<64x256xf32>
    %cst_32 = arith.constant dense<0.000000e+00> : vector<64xf32>
    %26 = vector.multi_reduction <add>, %25, %cst_32 [1] : vector<64x256xf32> to vector<64xf32>
    %27 = vector.shape_cast %26 : vector<64xf32> to vector<64x1xf32>
    %cst_33 = arith.constant 3.906250e-03 : f32
    %28 = vector.broadcast %cst_33 : f32 to vector<64x1xf32>
    %29 = arith.mulf %27, %28 : vector<64x1xf32>
    %cst_34 = arith.constant -3.40282347E+38 : f32
    %30 = vector.shape_cast %16 : vector<1x256xi1> to vector<1x256xi1>
    %31 = vector.broadcast %30 : vector<1x256xi1> to vector<64x256xi1>
    %32 = vector.broadcast %cst_34 : f32 to vector<64x256xf32>
    %33 = arith.select %31, %25, %32 : vector<64x256xi1>, vector<64x256xf32>
    %cst_35 = arith.constant dense<0xFF800000> : vector<64xf32>
    %34 = vector.multi_reduction <maximumf>, %33, %cst_35 [1] : vector<64x256xf32> to vector<64xf32>
    %35 = vector.shape_cast %34 : vector<64xf32> to vector<64x1xf32>
    %36 = vector.broadcast %29 : vector<64x1xf32> to vector<64x16xf32>
    %37 = arith.mulf %17, %36 : vector<64x16xf32>
    %cst_36 = arith.constant dense<0.000000e+00> : vector<16xf32>
    %38 = vector.multi_reduction <add>, %37, %cst_36 [0] : vector<64x16xf32> to vector<16xf32>
    %39 = vector.shape_cast %38 : vector<16xf32> to vector<1x16xf32>
    %cst_37 = arith.constant 0.000000e+00 : f32
    %40 = vector.broadcast %cst_37 : f32 to vector<1x16xf32>
    %41 = arith.maximumf %39, %40 : vector<1x16xf32>
    %42 = vector.broadcast %41 : vector<1x16xf32> to vector<64x16xf32>
    %43 = arith.mulf %18, %42 : vector<64x16xf32>
    %cst_38 = arith.constant dense<0.000000e+00> : vector<64xf32>
    %44 = vector.multi_reduction <add>, %43, %cst_38 [1] : vector<64x16xf32> to vector<64xf32>
    %45 = vector.shape_cast %44 : vector<64xf32> to vector<64x1xf32>
    %46 = vector.broadcast %35 : vector<64x1xf32> to vector<64x16xf32>
    %47 = arith.mulf %19, %46 : vector<64x16xf32>
    %cst_39 = arith.constant dense<0.000000e+00> : vector<16xf32>
    %48 = vector.multi_reduction <add>, %47, %cst_39 [0] : vector<64x16xf32> to vector<16xf32>
    %49 = vector.shape_cast %48 : vector<16xf32> to vector<1x16xf32>
    %cst_40 = arith.constant 0.000000e+00 : f32
    %50 = vector.broadcast %cst_40 : f32 to vector<1x16xf32>
    %51 = arith.maximumf %49, %50 : vector<1x16xf32>
    %52 = vector.broadcast %51 : vector<1x16xf32> to vector<64x16xf32>
    %53 = arith.mulf %20, %52 : vector<64x16xf32>
    %cst_41 = arith.constant dense<0.000000e+00> : vector<64xf32>
    %54 = vector.multi_reduction <add>, %53, %cst_41 [1] : vector<64x16xf32> to vector<64xf32>
    %55 = vector.shape_cast %54 : vector<64xf32> to vector<64x1xf32>
    %56 = arith.addf %45, %55 : vector<64x1xf32>
    %c17_i32 = arith.constant 17 : i32
    %57 = tpu.dynamic_rotate %25 by %c17_i32 dim 1 : vector<64x256xf32>, i32 -> vector<64x256xf32>
    %58 = vector.broadcast %5 : vector<1x256xf32> to vector<64x256xf32>
    %59 = arith.mulf %57, %58 : vector<64x256xf32>
    %c16_i32 = arith.constant 16 : i32
    %60 = tpu.dynamic_rotate %25 by %c16_i32 dim 1 : vector<64x256xf32>, i32 -> vector<64x256xf32>
    %61 = vector.broadcast %6 : vector<1x256xf32> to vector<64x256xf32>
    %62 = arith.mulf %60, %61 : vector<64x256xf32>
    %c15_i32 = arith.constant 15 : i32
    %63 = tpu.dynamic_rotate %25 by %c15_i32 dim 1 : vector<64x256xf32>, i32 -> vector<64x256xf32>
    %64 = vector.broadcast %7 : vector<1x256xf32> to vector<64x256xf32>
    %65 = arith.mulf %63, %64 : vector<64x256xf32>
    %c1_i32 = arith.constant 1 : i32
    %66 = tpu.dynamic_rotate %25 by %c1_i32 dim 1 : vector<64x256xf32>, i32 -> vector<64x256xf32>
    %67 = vector.broadcast %8 : vector<1x256xf32> to vector<64x256xf32>
    %68 = arith.mulf %66, %67 : vector<64x256xf32>
    %69 = vector.broadcast %9 : vector<1x256xf32> to vector<64x256xf32>
    %70 = arith.mulf %25, %69 : vector<64x256xf32>
    %c255_i32 = arith.constant 255 : i32
    %71 = tpu.dynamic_rotate %25 by %c255_i32 dim 1 : vector<64x256xf32>, i32 -> vector<64x256xf32>
    %72 = vector.broadcast %10 : vector<1x256xf32> to vector<64x256xf32>
    %73 = arith.mulf %71, %72 : vector<64x256xf32>
    %c241_i32 = arith.constant 241 : i32
    %74 = tpu.dynamic_rotate %25 by %c241_i32 dim 1 : vector<64x256xf32>, i32 -> vector<64x256xf32>
    %75 = vector.broadcast %11 : vector<1x256xf32> to vector<64x256xf32>
    %76 = arith.mulf %74, %75 : vector<64x256xf32>
    %c240_i32 = arith.constant 240 : i32
    %77 = tpu.dynamic_rotate %25 by %c240_i32 dim 1 : vector<64x256xf32>, i32 -> vector<64x256xf32>
    %78 = vector.broadcast %12 : vector<1x256xf32> to vector<64x256xf32>
    %79 = arith.mulf %77, %78 : vector<64x256xf32>
    %c239_i32 = arith.constant 239 : i32
    %80 = tpu.dynamic_rotate %25 by %c239_i32 dim 1 : vector<64x256xf32>, i32 -> vector<64x256xf32>
    %81 = vector.broadcast %13 : vector<1x256xf32> to vector<64x256xf32>
    %82 = arith.mulf %80, %81 : vector<64x256xf32>
    %83 = tpu.concatenate %59, %62, %65, %68, %70, %73, %76, %79, %82 in 0 : vector<64x256xf32>, vector<64x256xf32>, vector<64x256xf32>, vector<64x256xf32>, vector<64x256xf32>, vector<64x256xf32>, vector<64x256xf32>, vector<64x256xf32>, vector<64x256xf32> -> vector<576x256xf32>
    %cst_42 = arith.constant dense<0.000000e+00> : vector<32x256xf32>
    %84 = tpu.matmul %21, %83, %cst_42 {dimension_numbers = #tpu.dot_dimension_numbers<[1], [0], [0], [1], [0, 0, 1, 1], [], []>} : vector<32x576xf32>, vector<576x256xf32>, vector<32x256xf32> -> vector<32x256xf32>
    %85 = vector.broadcast %22 : vector<32x1xf32> to vector<32x256xf32>
    %86 = arith.addf %84, %85 : vector<32x256xf32>
    %cst_43 = arith.constant 0.000000e+00 : f32
    %87 = vector.broadcast %cst_43 : f32 to vector<32x256xf32>
    %88 = arith.maximumf %86, %87 : vector<32x256xf32>
    %89 = vector.extract_strided_slice %88 {offsets = [0, 0], sizes = [16, 256], strides = [1, 1]} : vector<32x256xf32> to vector<16x256xf32>
    %90 = vector.extract_strided_slice %88 {offsets = [16, 0], sizes = [16, 256], strides = [1, 1]} : vector<32x256xf32> to vector<16x256xf32>
    %c17_i32_44 = arith.constant 17 : i32
    %91 = tpu.dynamic_rotate %89 by %c17_i32_44 dim 1 : vector<16x256xf32>, i32 -> vector<16x256xf32>
    %92 = vector.broadcast %5 : vector<1x256xf32> to vector<16x256xf32>
    %93 = arith.mulf %91, %92 : vector<16x256xf32>
    %c16_i32_45 = arith.constant 16 : i32
    %94 = tpu.dynamic_rotate %89 by %c16_i32_45 dim 1 : vector<16x256xf32>, i32 -> vector<16x256xf32>
    %95 = vector.broadcast %6 : vector<1x256xf32> to vector<16x256xf32>
    %96 = arith.mulf %94, %95 : vector<16x256xf32>
    %c15_i32_46 = arith.constant 15 : i32
    %97 = tpu.dynamic_rotate %89 by %c15_i32_46 dim 1 : vector<16x256xf32>, i32 -> vector<16x256xf32>
    %98 = vector.broadcast %7 : vector<1x256xf32> to vector<16x256xf32>
    %99 = arith.mulf %97, %98 : vector<16x256xf32>
    %c1_i32_47 = arith.constant 1 : i32
    %100 = tpu.dynamic_rotate %89 by %c1_i32_47 dim 1 : vector<16x256xf32>, i32 -> vector<16x256xf32>
    %101 = vector.broadcast %8 : vector<1x256xf32> to vector<16x256xf32>
    %102 = arith.mulf %100, %101 : vector<16x256xf32>
    %103 = vector.broadcast %9 : vector<1x256xf32> to vector<16x256xf32>
    %104 = arith.mulf %89, %103 : vector<16x256xf32>
    %c255_i32_48 = arith.constant 255 : i32
    %105 = tpu.dynamic_rotate %89 by %c255_i32_48 dim 1 : vector<16x256xf32>, i32 -> vector<16x256xf32>
    %106 = vector.broadcast %10 : vector<1x256xf32> to vector<16x256xf32>
    %107 = arith.mulf %105, %106 : vector<16x256xf32>
    %c241_i32_49 = arith.constant 241 : i32
    %108 = tpu.dynamic_rotate %89 by %c241_i32_49 dim 1 : vector<16x256xf32>, i32 -> vector<16x256xf32>
    %109 = vector.broadcast %11 : vector<1x256xf32> to vector<16x256xf32>
    %110 = arith.mulf %108, %109 : vector<16x256xf32>
    %c240_i32_50 = arith.constant 240 : i32
    %111 = tpu.dynamic_rotate %89 by %c240_i32_50 dim 1 : vector<16x256xf32>, i32 -> vector<16x256xf32>
    %112 = vector.broadcast %12 : vector<1x256xf32> to vector<16x256xf32>
    %113 = arith.mulf %111, %112 : vector<16x256xf32>
    %c239_i32_51 = arith.constant 239 : i32
    %114 = tpu.dynamic_rotate %89 by %c239_i32_51 dim 1 : vector<16x256xf32>, i32 -> vector<16x256xf32>
    %115 = vector.broadcast %13 : vector<1x256xf32> to vector<16x256xf32>
    %116 = arith.mulf %114, %115 : vector<16x256xf32>
    %117 = tpu.concatenate %93, %96, %99, %102, %104, %107, %110, %113, %116, %90 in 0 : vector<16x256xf32>, vector<16x256xf32>, vector<16x256xf32>, vector<16x256xf32>, vector<16x256xf32>, vector<16x256xf32>, vector<16x256xf32>, vector<16x256xf32>, vector<16x256xf32>, vector<16x256xf32> -> vector<160x256xf32>
    %cst_52 = arith.constant dense<0.000000e+00> : vector<64x256xf32>
    %118 = tpu.matmul %23, %117, %cst_52 {dimension_numbers = #tpu.dot_dimension_numbers<[1], [0], [0], [1], [0, 0, 1, 1], [], []>} : vector<64x160xf32>, vector<160x256xf32>, vector<64x256xf32> -> vector<64x256xf32>
    %119 = vector.broadcast %24 : vector<64x1xf32> to vector<64x256xf32>
    %120 = arith.addf %118, %119 : vector<64x256xf32>
    %121 = vector.broadcast %56 : vector<64x1xf32> to vector<64x256xf32>
    %122 = arith.addf %120, %121 : vector<64x256xf32>
    %123 = arith.negf %122 : vector<64x256xf32>
    %124 = math.exp %123 : vector<64x256xf32>
    %cst_53 = arith.constant 1.000000e+00 : f32
    %125 = vector.broadcast %cst_53 : f32 to vector<64x256xf32>
    %126 = arith.addf %125, %124 : vector<64x256xf32>
    %127 = arith.divf %125, %126 : vector<64x256xf32>
    %128 = arith.mulf %4, %127 : vector<64x256xf32>
    %129 = arith.addf %3, %128 : vector<64x256xf32>
    %cst_54 = arith.constant dense<0.000000e+00> : vector<64xf32>
    %130 = vector.multi_reduction <add>, %129, %cst_54 [1] : vector<64x256xf32> to vector<64xf32>
    %131 = vector.shape_cast %130 : vector<64xf32> to vector<64x1xf32>
    %cst_55 = arith.constant 3.906250e-03 : f32
    %132 = vector.broadcast %cst_55 : f32 to vector<64x1xf32>
    %133 = arith.mulf %131, %132 : vector<64x1xf32>
    %cst_56 = arith.constant -3.40282347E+38 : f32
    %134 = vector.shape_cast %16 : vector<1x256xi1> to vector<1x256xi1>
    %135 = vector.broadcast %134 : vector<1x256xi1> to vector<64x256xi1>
    %136 = vector.broadcast %cst_56 : f32 to vector<64x256xf32>
    %137 = arith.select %135, %129, %136 : vector<64x256xi1>, vector<64x256xf32>
    %cst_57 = arith.constant dense<0xFF800000> : vector<64xf32>
    %138 = vector.multi_reduction <maximumf>, %137, %cst_57 [1] : vector<64x256xf32> to vector<64xf32>
    %139 = vector.shape_cast %138 : vector<64xf32> to vector<64x1xf32>
    %140 = vector.broadcast %133 : vector<64x1xf32> to vector<64x16xf32>
    %141 = arith.mulf %17, %140 : vector<64x16xf32>
    %cst_58 = arith.constant dense<0.000000e+00> : vector<16xf32>
    %142 = vector.multi_reduction <add>, %141, %cst_58 [0] : vector<64x16xf32> to vector<16xf32>
    %143 = vector.shape_cast %142 : vector<16xf32> to vector<1x16xf32>
    %cst_59 = arith.constant 0.000000e+00 : f32
    %144 = vector.broadcast %cst_59 : f32 to vector<1x16xf32>
    %145 = arith.maximumf %143, %144 : vector<1x16xf32>
    %146 = vector.broadcast %145 : vector<1x16xf32> to vector<64x16xf32>
    %147 = arith.mulf %18, %146 : vector<64x16xf32>
    %cst_60 = arith.constant dense<0.000000e+00> : vector<64xf32>
    %148 = vector.multi_reduction <add>, %147, %cst_60 [1] : vector<64x16xf32> to vector<64xf32>
    %149 = vector.shape_cast %148 : vector<64xf32> to vector<64x1xf32>
    %150 = vector.broadcast %139 : vector<64x1xf32> to vector<64x16xf32>
    %151 = arith.mulf %19, %150 : vector<64x16xf32>
    %cst_61 = arith.constant dense<0.000000e+00> : vector<16xf32>
    %152 = vector.multi_reduction <add>, %151, %cst_61 [0] : vector<64x16xf32> to vector<16xf32>
    %153 = vector.shape_cast %152 : vector<16xf32> to vector<1x16xf32>
    %cst_62 = arith.constant 0.000000e+00 : f32
    %154 = vector.broadcast %cst_62 : f32 to vector<1x16xf32>
    %155 = arith.maximumf %153, %154 : vector<1x16xf32>
    %156 = vector.broadcast %155 : vector<1x16xf32> to vector<64x16xf32>
    %157 = arith.mulf %20, %156 : vector<64x16xf32>
    %cst_63 = arith.constant dense<0.000000e+00> : vector<64xf32>
    %158 = vector.multi_reduction <add>, %157, %cst_63 [1] : vector<64x16xf32> to vector<64xf32>
    %159 = vector.shape_cast %158 : vector<64xf32> to vector<64x1xf32>
    %160 = arith.addf %149, %159 : vector<64x1xf32>
    %c17_i32_64 = arith.constant 17 : i32
    %161 = tpu.dynamic_rotate %129 by %c17_i32_64 dim 1 : vector<64x256xf32>, i32 -> vector<64x256xf32>
    %162 = vector.broadcast %5 : vector<1x256xf32> to vector<64x256xf32>
    %163 = arith.mulf %161, %162 : vector<64x256xf32>
    %c16_i32_65 = arith.constant 16 : i32
    %164 = tpu.dynamic_rotate %129 by %c16_i32_65 dim 1 : vector<64x256xf32>, i32 -> vector<64x256xf32>
    %165 = vector.broadcast %6 : vector<1x256xf32> to vector<64x256xf32>
    %166 = arith.mulf %164, %165 : vector<64x256xf32>
    %c15_i32_66 = arith.constant 15 : i32
    %167 = tpu.dynamic_rotate %129 by %c15_i32_66 dim 1 : vector<64x256xf32>, i32 -> vector<64x256xf32>
    %168 = vector.broadcast %7 : vector<1x256xf32> to vector<64x256xf32>
    %169 = arith.mulf %167, %168 : vector<64x256xf32>
    %c1_i32_67 = arith.constant 1 : i32
    %170 = tpu.dynamic_rotate %129 by %c1_i32_67 dim 1 : vector<64x256xf32>, i32 -> vector<64x256xf32>
    %171 = vector.broadcast %8 : vector<1x256xf32> to vector<64x256xf32>
    %172 = arith.mulf %170, %171 : vector<64x256xf32>
    %173 = vector.broadcast %9 : vector<1x256xf32> to vector<64x256xf32>
    %174 = arith.mulf %129, %173 : vector<64x256xf32>
    %c255_i32_68 = arith.constant 255 : i32
    %175 = tpu.dynamic_rotate %129 by %c255_i32_68 dim 1 : vector<64x256xf32>, i32 -> vector<64x256xf32>
    %176 = vector.broadcast %10 : vector<1x256xf32> to vector<64x256xf32>
    %177 = arith.mulf %175, %176 : vector<64x256xf32>
    %c241_i32_69 = arith.constant 241 : i32
    %178 = tpu.dynamic_rotate %129 by %c241_i32_69 dim 1 : vector<64x256xf32>, i32 -> vector<64x256xf32>
    %179 = vector.broadcast %11 : vector<1x256xf32> to vector<64x256xf32>
    %180 = arith.mulf %178, %179 : vector<64x256xf32>
    %c240_i32_70 = arith.constant 240 : i32
    %181 = tpu.dynamic_rotate %129 by %c240_i32_70 dim 1 : vector<64x256xf32>, i32 -> vector<64x256xf32>
    %182 = vector.broadcast %12 : vector<1x256xf32> to vector<64x256xf32>
    %183 = arith.mulf %181, %182 : vector<64x256xf32>
    %c239_i32_71 = arith.constant 239 : i32
    %184 = tpu.dynamic_rotate %129 by %c239_i32_71 dim 1 : vector<64x256xf32>, i32 -> vector<64x256xf32>
    %185 = vector.broadcast %13 : vector<1x256xf32> to vector<64x256xf32>
    %186 = arith.mulf %184, %185 : vector<64x256xf32>
    %187 = tpu.concatenate %163, %166, %169, %172, %174, %177, %180, %183, %186 in 0 : vector<64x256xf32>, vector<64x256xf32>, vector<64x256xf32>, vector<64x256xf32>, vector<64x256xf32>, vector<64x256xf32>, vector<64x256xf32>, vector<64x256xf32>, vector<64x256xf32> -> vector<576x256xf32>
    %cst_72 = arith.constant dense<0.000000e+00> : vector<32x256xf32>
    %188 = tpu.matmul %21, %187, %cst_72 {dimension_numbers = #tpu.dot_dimension_numbers<[1], [0], [0], [1], [0, 0, 1, 1], [], []>} : vector<32x576xf32>, vector<576x256xf32>, vector<32x256xf32> -> vector<32x256xf32>
    %189 = vector.broadcast %22 : vector<32x1xf32> to vector<32x256xf32>
    %190 = arith.addf %188, %189 : vector<32x256xf32>
    %cst_73 = arith.constant 0.000000e+00 : f32
    %191 = vector.broadcast %cst_73 : f32 to vector<32x256xf32>
    %192 = arith.maximumf %190, %191 : vector<32x256xf32>
    %193 = vector.extract_strided_slice %192 {offsets = [0, 0], sizes = [16, 256], strides = [1, 1]} : vector<32x256xf32> to vector<16x256xf32>
    %194 = vector.extract_strided_slice %192 {offsets = [16, 0], sizes = [16, 256], strides = [1, 1]} : vector<32x256xf32> to vector<16x256xf32>
    %c17_i32_74 = arith.constant 17 : i32
    %195 = tpu.dynamic_rotate %193 by %c17_i32_74 dim 1 : vector<16x256xf32>, i32 -> vector<16x256xf32>
    %196 = vector.broadcast %5 : vector<1x256xf32> to vector<16x256xf32>
    %197 = arith.mulf %195, %196 : vector<16x256xf32>
    %c16_i32_75 = arith.constant 16 : i32
    %198 = tpu.dynamic_rotate %193 by %c16_i32_75 dim 1 : vector<16x256xf32>, i32 -> vector<16x256xf32>
    %199 = vector.broadcast %6 : vector<1x256xf32> to vector<16x256xf32>
    %200 = arith.mulf %198, %199 : vector<16x256xf32>
    %c15_i32_76 = arith.constant 15 : i32
    %201 = tpu.dynamic_rotate %193 by %c15_i32_76 dim 1 : vector<16x256xf32>, i32 -> vector<16x256xf32>
    %202 = vector.broadcast %7 : vector<1x256xf32> to vector<16x256xf32>
    %203 = arith.mulf %201, %202 : vector<16x256xf32>
    %c1_i32_77 = arith.constant 1 : i32
    %204 = tpu.dynamic_rotate %193 by %c1_i32_77 dim 1 : vector<16x256xf32>, i32 -> vector<16x256xf32>
    %205 = vector.broadcast %8 : vector<1x256xf32> to vector<16x256xf32>
    %206 = arith.mulf %204, %205 : vector<16x256xf32>
    %207 = vector.broadcast %9 : vector<1x256xf32> to vector<16x256xf32>
    %208 = arith.mulf %193, %207 : vector<16x256xf32>
    %c255_i32_78 = arith.constant 255 : i32
    %209 = tpu.dynamic_rotate %193 by %c255_i32_78 dim 1 : vector<16x256xf32>, i32 -> vector<16x256xf32>
    %210 = vector.broadcast %10 : vector<1x256xf32> to vector<16x256xf32>
    %211 = arith.mulf %209, %210 : vector<16x256xf32>
    %c241_i32_79 = arith.constant 241 : i32
    %212 = tpu.dynamic_rotate %193 by %c241_i32_79 dim 1 : vector<16x256xf32>, i32 -> vector<16x256xf32>
    %213 = vector.broadcast %11 : vector<1x256xf32> to vector<16x256xf32>
    %214 = arith.mulf %212, %213 : vector<16x256xf32>
    %c240_i32_80 = arith.constant 240 : i32
    %215 = tpu.dynamic_rotate %193 by %c240_i32_80 dim 1 : vector<16x256xf32>, i32 -> vector<16x256xf32>
    %216 = vector.broadcast %12 : vector<1x256xf32> to vector<16x256xf32>
    %217 = arith.mulf %215, %216 : vector<16x256xf32>
    %c239_i32_81 = arith.constant 239 : i32
    %218 = tpu.dynamic_rotate %193 by %c239_i32_81 dim 1 : vector<16x256xf32>, i32 -> vector<16x256xf32>
    %219 = vector.broadcast %13 : vector<1x256xf32> to vector<16x256xf32>
    %220 = arith.mulf %218, %219 : vector<16x256xf32>
    %221 = tpu.concatenate %197, %200, %203, %206, %208, %211, %214, %217, %220, %194 in 0 : vector<16x256xf32>, vector<16x256xf32>, vector<16x256xf32>, vector<16x256xf32>, vector<16x256xf32>, vector<16x256xf32>, vector<16x256xf32>, vector<16x256xf32>, vector<16x256xf32>, vector<16x256xf32> -> vector<160x256xf32>
    %cst_82 = arith.constant dense<0.000000e+00> : vector<64x256xf32>
    %222 = tpu.matmul %23, %221, %cst_82 {dimension_numbers = #tpu.dot_dimension_numbers<[1], [0], [0], [1], [0, 0, 1, 1], [], []>} : vector<64x160xf32>, vector<160x256xf32>, vector<64x256xf32> -> vector<64x256xf32>
    %223 = vector.broadcast %24 : vector<64x1xf32> to vector<64x256xf32>
    %224 = arith.addf %222, %223 : vector<64x256xf32>
    %225 = vector.broadcast %160 : vector<64x1xf32> to vector<64x256xf32>
    %226 = arith.addf %224, %225 : vector<64x256xf32>
    %227 = arith.negf %226 : vector<64x256xf32>
    %228 = math.exp %227 : vector<64x256xf32>
    %cst_83 = arith.constant 1.000000e+00 : f32
    %229 = vector.broadcast %cst_83 : f32 to vector<64x256xf32>
    %230 = arith.addf %229, %228 : vector<64x256xf32>
    %231 = arith.divf %229, %230 : vector<64x256xf32>
    %232 = arith.mulf %4, %231 : vector<64x256xf32>
    %233 = arith.addf %3, %232 : vector<64x256xf32>
    %c0_84 = arith.constant 0 : index
    %c0_85 = arith.constant 0 : index
    %c0_86 = arith.constant 0 : index
    %234 = vector.load %arg12[%c0_84, %c0_85, %c0_86] : memref<1x64x256xf32, #tpu.memory_space<vmem>>, vector<1x64x256xf32>
    %235 = vector.shape_cast %234 : vector<1x64x256xf32> to vector<64x256xf32>
    %236 = vector.shape_cast %233 : vector<64x256xf32> to vector<1x64x256xf32>
    tpu.vector_store %arg12[%c0_84, %c0_85, %c0_86], %236 {strides = array<i32>} : memref<1x64x256xf32, #tpu.memory_space<vmem>>, vector<1x64x256xf32>,
    return
  }
  func.func @transform_0(%arg0: i32) -> (i32, i32, i32) {
    %c0_i32 = arith.constant 0 : i32
    %c0_i32_0 = arith.constant 0 : i32
    %c0_i32_1 = arith.constant 0 : i32
    return %arg0, %c0_i32, %c0_i32_0 : i32, i32, i32
  }
  func.func @transform_1(%arg0: i32) -> (i32, i32, i32) {
    %c0_i32 = arith.constant 0 : i32
    %c0_i32_0 = arith.constant 0 : i32
    %c0_i32_1 = arith.constant 0 : i32
    return %arg0, %c0_i32, %c0_i32_0 : i32, i32, i32
  }
  func.func @transform_2(%arg0: i32) -> (i32, i32) {
    %c0_i32 = arith.constant 0 : i32
    %c0_i32_0 = arith.constant 0 : i32
    %c0_i32_1 = arith.constant 0 : i32
    return %c0_i32, %c0_i32_0 : i32, i32
  }
  func.func @transform_3(%arg0: i32) -> (i32, i32) {
    %c0_i32 = arith.constant 0 : i32
    %c0_i32_0 = arith.constant 0 : i32
    %c0_i32_1 = arith.constant 0 : i32
    return %c0_i32, %c0_i32_0 : i32, i32
  }
  func.func @transform_4(%arg0: i32) -> (i32, i32) {
    %c0_i32 = arith.constant 0 : i32
    %c0_i32_0 = arith.constant 0 : i32
    %c0_i32_1 = arith.constant 0 : i32
    return %c0_i32, %c0_i32_0 : i32, i32
  }
  func.func @transform_5(%arg0: i32) -> (i32, i32) {
    %c0_i32 = arith.constant 0 : i32
    %c0_i32_0 = arith.constant 0 : i32
    %c0_i32_1 = arith.constant 0 : i32
    return %c0_i32, %c0_i32_0 : i32, i32
  }
  func.func @transform_6(%arg0: i32) -> (i32, i32) {
    %c0_i32 = arith.constant 0 : i32
    %c0_i32_0 = arith.constant 0 : i32
    %c0_i32_1 = arith.constant 0 : i32
    return %c0_i32, %c0_i32_0 : i32, i32
  }
  func.func @transform_7(%arg0: i32) -> (i32, i32) {
    %c0_i32 = arith.constant 0 : i32
    %c0_i32_0 = arith.constant 0 : i32
    %c0_i32_1 = arith.constant 0 : i32
    return %c0_i32, %c0_i32_0 : i32, i32
  }
  func.func @transform_8(%arg0: i32) -> (i32, i32) {
    %c0_i32 = arith.constant 0 : i32
    %c0_i32_0 = arith.constant 0 : i32
    %c0_i32_1 = arith.constant 0 : i32
    return %c0_i32, %c0_i32_0 : i32, i32
  }
  func.func @transform_9(%arg0: i32) -> (i32, i32) {
    %c0_i32 = arith.constant 0 : i32
    %c0_i32_0 = arith.constant 0 : i32
    %c0_i32_1 = arith.constant 0 : i32
    return %c0_i32, %c0_i32_0 : i32, i32
  }
  func.func @transform_10(%arg0: i32) -> (i32, i32) {
    %c0_i32 = arith.constant 0 : i32
    %c0_i32_0 = arith.constant 0 : i32
    %c0_i32_1 = arith.constant 0 : i32
    return %c0_i32, %c0_i32_0 : i32, i32
  }
  func.func @transform_11(%arg0: i32) -> (i32, i32, i32) {
    %c0_i32 = arith.constant 0 : i32
    %c0_i32_0 = arith.constant 0 : i32
    %c0_i32_1 = arith.constant 0 : i32
    return %arg0, %c0_i32, %c0_i32_0 : i32, i32, i32
  }
}

</mosaic_0001>

<bundles_post_ra>
// kernel: tpu_custom_call.1
= control target key start
LH: loop header
LB: loop body
LE: loop exit
PB: predicated region body
PF: predicated region fallthrough
CT: control target
= control target key end

     0   :  { %s8160_s0 = inlined_call_operand.vmem [shape: f32[2,64,256], index: 0, kind: input, shape index: {}]   ;;  %s8161_s1 = inlined_call_operand.hbm [shape: f32[2,64,256], index: 1, kind: input, shape index: {}]   ;;  %s8162_s2 = inlined_call_operand.hbm [shape: f32[10,256], index: 2, kind: input, shape index: {}]   ;;  %s8163_s3 = inlined_call_operand.vmem [shape: f32[64,16], index: 3, kind: input, shape index: {}]   ;;  %s8164_s4 = inlined_call_operand.vmem [shape: f32[64,16], index: 4, kind: input, shape index: {}]   ;;  %s8165_s5 = inlined_call_operand.vmem [shape: f32[64,16], index: 5, kind: input, shape index: {}]   ;;  %s8166_s6 = inlined_call_operand.vmem [shape: f32[64,16], index: 6, kind: input, shape index: {}]   ;;  %s8167_s7 = inlined_call_operand.vmem [shape: f32[32,576], index: 7, kind: input, shape index: {}]   ;;  %s8168_s8 = inlined_call_operand.vmem [shape: f32[32,1], index: 8, kind: input, shape index: {}]   ;;  %s8169_s9 = inlined_call_operand.hbm [shape: f32[64,160], index: 9, kind: input, shape index: {}]   ;;  %s8170_s10 = inlined_call_operand.vmem [shape: f32[64,1], index: 10, kind: input, shape index: {}]   ;;  %s8171_s11 = inlined_call_operand.hbm [shape: f32[2,64,256], index: 11, kind: output, shape index: {}]  }
   0x1   :  { %8316 = sst [smem:[#allocation87_spill]] %s8160_s0 }
   0x2   :  { %8317 = sst [smem:[#allocation88_spill]] %s8161_s1 }
   0x3   :  { %8318 = sst [smem:[#allocation89_spill]] %s8162_s2 }
   0x4   :  { %8319 = sst [smem:[#allocation90_spill]] %s8168_s8 }
   0x5   :  { %8320 = sst [smem:[#allocation91_spill]] %s8171_s11 }
   0x6   :  { %16 = vsyncpa [#allocation3], 0 }
   0x7   :  { %18 = vsyncpa [#allocation3 + $0x1], 0 }
   0x8   :  { %19 = vsyncpa [#allocation6], 0 }
   0x9   :  { %20 = vsyncpa [#allocation4], 0 }
   0xa   :  { %22 = vsyncpa [#allocation4 + $0x1], 0  ;;  %s4818_s17 = smov 0   ;;  %s4820_s18 = smov 0  }
   0xb   :  { %s4822_s19 = smov 0   ;;  %s4824_s20 = smov 0  }
   0xc LB: > { %8321 = sst [smem:[#allocation12_spill]] %s4727_s17  ;;  %s4839_s21 = sadd.s32 4294967295, %s4739_s20   ;;  %s4739_s20 = sphi %s4824_s20, %s8509_s20   ;;  %s4735_s19 = sphi %s4822_s19, %s8508_s19   ;;  %s4731_s18 = sphi %s4820_s18, %s8507_s18   ;;  %s4727_s17 = sphi %s4818_s17, %s8506_s17  }
   0xd   : > { %s3763_s22 = sadd.s32 4294967294, %s4739_s20   ;;  %p74_p0 = scmp.ne.s32.totalorder %s4731_s18, %s4727_s17 }
   0xe   : > { %p8172_p1 = scmp.eq.s32.totalorder %s4839_s21, 0  ;;  %p293_p3 = scmp.eq.s32.totalorder %s3763_s22, 1 }
   0xf   : > { %p3764_p5 = scmp.ge.s32.totalorder %s4739_s20, 1  ;;  %p300_p7 = scmp.lt.s32.totalorder %s4739_s20, 3 }
  0x10   : > { %p4848_p4 = por %p8172_p1, %p74_p0  ;;  %p4853_p6 = por %p293_p3, %p74_p0 }
  0x11   : > { %p4858_p8 = pnand %p3764_p5, %p300_p7  ;;  %s4741_s26 = smov [#allocation5]  }
  0x12   : > { %s8322_s23 = scalar_select %p4848_p4, 1, 0 }
  0x13   : > { %s8323_s24 = scalar_select %p4853_p6, 1, 0 }
  0x14   : > { %s312_s27 = sshll.u32 %s4741_s26, 4  ;;  %p4270_p9 = pneg %p4858_p8  ;;  %s4862_s27 = int_to_ptr.vmem [resolvable:$true] %s312_s27 }
  0x15   : > { %8324 = sst [smem:[#allocation13_spill]] %s8323_s24  ;;  %s4742_s29 = smov [#allocation7]  }
  0x16   : > { %p4869_p11 = pnand %p4270_p9, %p8172_p1  ;;  %s343_s30 = sshll.u32 %s4742_s29, 4  ;;  %s4873_s30 = int_to_ptr.vmem [resolvable:$true] %s343_s30 }
  0x17   : > { %s8327_s2 = sld [smem:[#allocation89_spill]] }
  0x18   : > { %p4585_p13 = pneg %p4869_p11 }
  0x1d   : > { %s4583_s14 = scalar_lea.hbm %s8327_s2, 512 }
  0x1e   : > { %p4584_p12 = scmp.ne.s32.totalorder %s8327_s2, %s4583_s14  ;;  %p4590_p5 = scmp.lt.u32.totalorder %s4583_s14, %s8327_s2 }
  0x20   : > { %p4586_p0 = pnand %p4585_p13, %p4584_p12 }
  0x22   : > { %p4587_p3 = pneg %p4586_p0 }
  0x24   : > { %p4592_p7 = pnand %p4590_p5, %p4587_p3 }
  0x26   : > { %4595 = shalt.err (!%p4592_p7)
}
  0x27   : > { %s4596_s29 = scalar_lea.vmem %s4862_s27, 512  ;;  %p4604_p2 = scmp.lt.s32.totalorder %s4862_s27, %s4862_s27 }
  0x28   : > { %p4597_p9 = scmp.ne.s32.totalorder %s4862_s27, %s4596_s29  ;;  %p4605_p12 = scmp.lt.s32.totalorder %s4596_s29, %s4596_s29 }
  0x2a   : > { %p4599_p10 = pnand %p4597_p9, %p4585_p13  ;;  %p4606_p0 = por %p4605_p12, %p4604_p2 }
  0x2c   : > { %p4600_p1 = pneg %p4599_p10 }
  0x2e   : > { %p4607_p6 = pnand %p4606_p0, %p4600_p1 }
  0x30   : > { %4610 = shalt.err (!%p4607_p6)
}
  0x31   : > { %s8176_s12 = smov 256   ;;  %s8177_s13 = smov 16  }
  0x32   : > { %4273 = dma.hbm_to_vmem [thread:$0]  (!%p4869_p11), %s8327_s2, 512, %s4862_s27, [#allocation6], %s8176_s12, %s8176_s12, %s8177_s13  }
  0x33   : > { %s4611_s26 = scalar_lea.hbm %s8169_s9, 2048 }
  0x34   : > { %p4612_p1 = scmp.ne.s32.totalorder %s8169_s9, %s4611_s26  ;;  %p4618_p10 = scmp.lt.u32.totalorder %s4611_s26, %s8169_s9 }
  0x36   : > { %p4614_p2 = pnand %p4612_p1, %p4585_p13 }
  0x38   : > { %p4615_p6 = pneg %p4614_p2 }
  0x3a   : > { %p4620_p3 = pnand %p4618_p10, %p4615_p6 }
  0x3c   : > { %4623 = shalt.err (!%p4620_p3)
}
  0x3d   : > { %s4624_s27 = scalar_lea.vmem %s4873_s30, 2048  ;;  %p4632_p12 = scmp.lt.s32.totalorder %s4873_s30, %s4873_s30 }
  0x3e   : > { %p4625_p5 = scmp.ne.s32.totalorder %s4873_s30, %s4624_s27  ;;  %p4633_p0 = scmp.lt.s32.totalorder %s4624_s27, %s4624_s27 }
  0x40   : > { %p4627_p7 = pnand %p4625_p5, %p4585_p13  ;;  %p4634_p1 = por %p4633_p0, %p4632_p12 }
  0x42   : > { %p4628_p9 = pneg %p4627_p7 }
  0x44   : > { %p4635_p2 = pnand %p4634_p1, %p4628_p9 }
  0x46   : > { %4638 = shalt.err (!%p4635_p2)
}
  0x47   : > { %4276 = dma.hbm_to_vmem [thread:$0]  (!%p4869_p11), %s8169_s9, 2048, %s4873_s30, [#allocation6], %s8176_s12, %s8176_s12, %s8177_s13  }
  0x48   : > { %s4934_s24 = sadd.s32 1, %s4739_s20   ;;  %s61_s28 = sadd.s32 1, %s4735_s19 }
  0x49   : > { %s58_s14 = ssub.s32 %s4739_s20, %s4934_s24  ;;  %p68_p13 = scmp.ne.s32.totalorder %s4735_s19, %s4731_s18 }
  0x4a   : > { %p59_p6 = scmp.eq.s32.totalorder %s58_s14, 0  ;;  %p69_p10 = scmp.eq.s32.totalorder %s4739_s20, 0 }
  0x4b   : > { %p8328_p3 = scmp.eq.s32.totalorder %s4839_s21, 1  ;;  %p4287_p7 = scmp.lt.s32.totalorder %s4739_s20, 2 }
  0x4c   : > { %s4950_s16 = scalar_select %p59_p6, %s4735_s19, %s61_s28  }
  0x4d   : > { %p4944_p5 = por %p8328_p3, %p68_p13  ;;  %p70_p9 = por %p69_p10, %p68_p13 }
  0x4e   : > { %s368_s22 = sand.u32 1, %s4735_s19   ;;  %s3839_s30 = sshll.u32 %s4739_s20, 11 }
  0x4f   : > { %s8329_s15 = scalar_select %p4944_p5, 1, 0 }
  0x50   : > { %s3768_s26 = sshll.u32 %s368_s22, 7  ;;  %s8330_s1 = sld [smem:[#allocation88_spill]] }
  0x51   : > { %s372_s17 = scalar_lea.vmem [#allocation2], %s3768_s26  ;;  %p4961_p11 = pnand %p4287_p7, %p70_p9 }
  0x52   : > { %s379_s14 = sshll.u32 %s372_s17, 4  ;;  %s4965_s12 = scalar_lea.sflag [#allocation3], %s368_s22  ;;  %s4959_s14 = int_to_ptr.vmem [resolvable:$true] %s379_s14 }
  0x53   : > { %p4641_p0 = pneg %p4961_p11 }
  0x56   : > { %s4957_s11 = scalar_lea.hbm %s8330_s1, %s3839_s30  ;;  %s4644_s29 = scalar_lea.hbm %s8330_s1, 4096 }
  0x57   : > { %s4639_s13 = scalar_lea.hbm %s4957_s11, 2048  ;;  %p4645_p13 = scmp.lt.u32.totalorder %s4957_s11, %s8330_s1 }
  0x58   : > { %p4640_p12 = scmp.ne.s32.totalorder %s4957_s11, %s4639_s13  ;;  %p4646_p6 = scmp.lt.u32.totalorder %s4644_s29, %s4639_s13 }
  0x59   : > { %p4648_p3 = scmp.lt.u32.totalorder %s4639_s13, %s4957_s11 }
  0x5a   : > { %p4642_p1 = pnand %p4641_p0, %p4640_p12  ;;  %p4647_p10 = por %p4646_p6, %p4645_p13 }
  0x5c   : > { %p4643_p2 = pneg %p4642_p1  ;;  %p4649_p7 = por %p4648_p3, %p4647_p10 }
  0x5e   : > { %p4650_p9 = pnand %p4649_p7, %p4643_p2 }
  0x60   : > { %4653 = shalt.err (!%p4650_p9)
}
  0x61   : > { %s4654_s22 = scalar_lea.vmem %s4959_s14, 2048  ;;  %s4745_s26 = smov [#allocation2]  }
  0x62   : > { %p4655_p12 = scmp.ne.s32.totalorder %s4959_s14, %s4654_s22  ;;  %s4659_s30 = sshll.u32 %s4745_s26, 4  ;;  %s4660_s30 = int_to_ptr.vmem [resolvable:$false] %s4659_s30 }
  0x63   : > { %s4661_s27 = scalar_lea.vmem %s4660_s30, 4096  ;;  %p4662_p4 = scmp.lt.s32.totalorder %s4959_s14, %s4660_s30 }
  0x64   : > { %p4657_p1 = pnand %p4655_p12, %p4641_p0  ;;  %p4663_p13 = scmp.lt.s32.totalorder %s4661_s27, %s4654_s22 }
  0x66   : > { %p4658_p5 = pneg %p4657_p1  ;;  %p4664_p6 = por %p4663_p13, %p4662_p4 }
  0x68   : > { %p4665_p10 = pnand %p4664_p6, %p4658_p5 }
  0x6a   : > { %4668 = shalt.err (!%p4665_p10)
}
  0x6b   : > { %s8332_s13 = smov 16   ;;  %s8333_s29 = smov 256  }
  0x6c   : > { %4280 = dma.hbm_to_vmem [thread:$0]  (!%p4961_p11), %s4957_s11, 2048, %s4959_s14, %s4965_s12, %s8333_s29, %s8333_s29, %s8332_s13  }
  0x6d   : > { %391 = sbr.rel (%p4858_p8) target bundleno = 2338 (0x922), region = 64 }
  0x74   : > { %s4999_s17 = sand.u32 1, %s4731_s18   ;;  %p8334_p4 = scmp.ne.s32.totalorder %s8322_s23, 0 }
  0x75   : > { %s8180_s22 = sshll.u32 %s4999_s17, 7  ;;  %s394_s26 = scalar_lea.sflag [#allocation3], %s4999_s17 }
  0x76   : > { %s5005_s28 = scalar_lea.vmem [#allocation2], %s8180_s22 }
  0x77   : > { %4714 = dma.done.wait (%p8334_p4), %s394_s26, 2048  }
  0x78   : > { %4716 = vsyncadd (%p8334_p4), %s394_s26, 4294965248  ;;  %p8335_p5 = scmp.eq.s32.totalorder %s4839_s21, 0 }
  0x7a   : > { %4718 = dma.done.wait (%p8335_p5), [#allocation6], 2560   ;;  %p8336_p8 = pmov %p8335_p5 }
  0x7b   : > { %p449_p11 = scmp.lt.s32.totalorder %s4839_s21, 1  ;;  %s8337_s0 = sld [smem:[#allocation87_spill]]  ;;  %v471_v1 = vld [vmem:[%s5005_s28 + $0x8] sm:$0xff]  ;;  %v470_v4 = vld [vmem:[%s5005_s28] sm:$0xff]  ;;  %v473_v6 = vld [vmem:[%s5005_s28 + $0x18] sm:$0xff]  ;;  %v651_v48 = vlaneseq  ;;  %vm1491_vm8 = vcmask 523264  }
  0x7c   : > { %4720 = vsyncadd (%p8336_p8), [#allocation6], 4294964736  ;;  %v472_v9 = vld [vmem:[%s5005_s28 + $0x10] sm:$0xff]  ;;  %s8197_s30 = smov 17   ;;  %v474_v15 = vld [vmem:[%s5005_s28 + $0x20] sm:$0xff]  ;;  %s8195_s27 = smov 16  }
  0x7d   : > { %s450_s25 = scalar_select %p449_p11, %s4839_s21, 1  ;;  %v476_v13 = vld [vmem:[%s5005_s28 + $0x30] sm:$0xff]  ;;  %v477_v19 = vld [vmem:[%s5005_s28 + $0x38] sm:$0xff]  ;;  %v475_v21 = vld [vmem:[%s5005_s28 + $0x28] sm:$0xff]  ;;  %v652_v49 = vshrl.u32 %v651_v48, 7  ;;  %v5198_v50 = vand.u32 127, %v651_v48 }
  0x7e   : > { %v480_v25 = vld [vmem:[%s5005_s28 + $0x50] sm:$0xff]  ;;  %v478_v27 = vld [vmem:[%s5005_s28 + $0x40] sm:$0xff]  ;;  %v481_v31 = vld [vmem:[%s5005_s28 + $0x58] sm:$0xff]  ;;  %s8193_s13 = smov 15   ;;  %s8191_s29 = smov 1   ;;  %vm1951_vm9 = vcmask 261120  }
  0x7f   : > { %s3840_s12 = sshll.u32 %s450_s25, 7  ;;  %v479_v33 = vld [vmem:[%s5005_s28 + $0x48] sm:$0xff]  ;;  %v484_v37 = vld [vmem:[%s5005_s28 + $0x70] sm:$0xff]  ;;  %v482_v39 = vld [vmem:[%s5005_s28 + $0x60] sm:$0xff]  ;;  %v5202_v51 = vsub.s32 1, %v652_v49  ;;  %v5206_v53 = vsub.s32 0, %v652_v49 }
  0x80   : > { %v485_v43 = vld [vmem:[%s5005_s28 + $0x78] sm:$0xff]  ;;  %v483_v45 = vld [vmem:[%s5005_s28 + $0x68] sm:$0xff]  ;;  %vm868_vm0 = vcmp.lt.s32.totalorder %v5198_v50, 17  ;;  %vm944_vm1 = vcmp.lt.s32.totalorder %v5198_v50, 16  ;;  %s8183_s11 = smov 113   ;;  %vm1020_vm2 = vcmp.lt.s32.totalorder %v5198_v50, 15 }
  0x81   : > { %s5020_s23 = scalar_lea.vmem %s8337_s0, %s3840_s12  ;;  %v502_v52 = vld [vmem:[#allocation5] ss:$8 sm:$0x3]  ;;  %s8187_s12 = smov 127   ;;  %vm1096_vm3 = vcmp.lt.s32.totalorder %v5198_v50, 1  ;;  %vm1199_vm4 = vcmp.lt.s32.totalorder %v5198_v50, 127 }
  0x82   : > { %v455_v0 = vld [vmem:[%s5020_s23 + $0x8] sm:$0xff]  ;;  %v454_v2 = vld [vmem:[%s5020_s23] sm:$0xff]  ;;  %v457_v5 = vld [vmem:[%s5020_s23 + $0x18] sm:$0xff]  ;;  %v5212_v56 = vrot.slane %v502_v52, %v5202_v51  ;;  %v5219_v58 = vrot.slane %v502_v52, %v5206_v53  ;;  %s8181_s14 = smov 112   ;;  %s8185_s26 = smov 111   ;;  %vm1275_vm5 = vcmp.lt.s32.totalorder %v5198_v50, 113 }
  0x83   : > { %v5025_v3 = vadd.f32 %v471_v1, %v455_v0  ;;  %v5030_v7 = vadd.f32 %v470_v4, %v454_v2  ;;  %v456_v8 = vld [vmem:[%s5020_s23 + $0x10] sm:$0xff]  ;;  %v5036_v10 = vadd.f32 %v473_v6, %v457_v5  ;;  %v458_v14 = vld [vmem:[%s5020_s23 + $0x20] sm:$0xff]  ;;  %v461_v18 = vld [vmem:[%s5020_s23 + $0x38] sm:$0xff]  ;;  %s8350_s8 = sld [smem:[#allocation90_spill]]  ;;  %vm1351_vm6 = vcmp.lt.s32.totalorder %v5198_v50, 112  ;;  %s8361_s22 = smov 127  }
  0x84   : > { %v5040_v11 = vadd.f32 %v472_v9, %v456_v8  ;;  %v460_v12 = vld [vmem:[%s5020_s23 + $0x30] sm:$0xff]  ;;  %v5052_v17 = vadd.f32 %v474_v15, %v458_v14  ;;  %v459_v20 = vld [vmem:[%s5020_s23 + $0x28] sm:$0xff]  ;;  %v5060_v22 = vadd.f32 %v477_v19, %v461_v18  ;;  %v462_v26 = vld [vmem:[%s5020_s23 + $0x40] sm:$0xff]  ;;  %8338 = vst [vmem:[#allocation14_spill] sm:$0xff] %v5212_v56  ;;  %vm1427_vm7 = vcmp.lt.s32.totalorder %v5198_v50, 111  ;;  %s8378_s2 = smov 17  }
  0x85   : > { %850 = vrot.lane.b32.xlu1 %v5025_v3, %s8197_s30  ;;  %834 = vrot.lane.b32.xlu0 %v5030_v7, %s8197_s30  ;;  %v5048_v16 = vadd.f32 %v476_v13, %v460_v12  ;;  %v5064_v23 = vadd.f32 %v475_v21, %v459_v20  ;;  %v464_v24 = vld [vmem:[%s5020_s23 + $0x50] sm:$0xff]  ;;  %v5076_v29 = vadd.f32 %v478_v27, %v462_v26  ;;  %v465_v30 = vld [vmem:[%s5020_s23 + $0x58] sm:$0xff]  ;;  %vm709_vm13 = vcmask 130048   ;;  %s8381_s0 = smov 15   ;;  %s8383_s1 = smov 1   ;;  %v4520_v50 = vld [vmem:[#allocation7] sm:$0xff] }
  0x86   : > { %v5072_v28 = vadd.f32 %v480_v25, %v464_v24  ;;  %v463_v32 = vld [vmem:[%s5020_s23 + $0x48] sm:$0xff]  ;;  %v5084_v34 = vadd.f32 %v481_v31, %v465_v30  ;;  %v468_v36 = vld [vmem:[%s5020_s23 + $0x70] sm:$0xff]  ;;  %v466_v38 = vld [vmem:[%s5020_s23 + $0x60] sm:$0xff]  ;;  %8339 = vst [vmem:[#allocation15_spill] sm:$0xff] %v5219_v58  ;;  %s3841_s25 = sshll.u32 %s4839_s21, 11  ;;  %s3646_s21 = scalar_lea.sflag [#allocation4], %s4999_s17 }
  0x87   : > { %v5088_v35 = vadd.f32 %v479_v33, %v463_v32  ;;  %v5096_v40 = vadd.f32 %v484_v37, %v468_v36  ;;  %v5100_v41 = vadd.f32 %v482_v39, %v466_v38  ;;  %v469_v42 = vld [vmem:[%s5020_s23 + $0x78] sm:$0xff]  ;;  %v467_v44 = vld [vmem:[%s5020_s23 + $0x68] sm:$0xff]  ;;  %p8501_p2 = scmp.ne.s32.totalorder %s8329_s15, 0 }
  0x88   : > { %v5108_v46 = vadd.f32 %v485_v43, %v469_v42  ;;  %v5112_v47 = vadd.f32 %v483_v45, %v467_v44  ;;  %v555_v1 = vld [vmem:[%s8167_s7 + $0x8] sm:$0xff] }
  0x89   : > { %852 = vrot.lane.b32.xlu1 %v5036_v10, %s8197_s30  ;;  %836 = vrot.lane.b32.xlu0 %v5040_v11, %s8197_s30 }
  0x8a   : > { %1568 = vmatprep.mubr.f32.mxu0 %v555_v1 }
  0x8d   : > { %840 = vrot.lane.b32.xlu1 %v5048_v16, %s8197_s30  ;;  %838 = vrot.lane.b32.xlu0 %v5052_v17, %s8197_s30 }
  0x91   : > { %856 = vrot.lane.b32.xlu1 %v5060_v22, %s8197_s30  ;;  %854 = vrot.lane.b32.xlu0 %v5064_v23, %s8197_s30 }
  0x95   : > { %844 = vrot.lane.b32.xlu1 %v5072_v28, %s8197_s30  ;;  %842 = vrot.lane.b32.xlu0 %v5076_v29, %s8197_s30 }
  0x99   : > { %860 = vrot.lane.b32.xlu1 %v5084_v34, %s8197_s30  ;;  %858 = vrot.lane.b32.xlu0 %v5088_v35, %s8197_s30 }
  0x9d   : > { %848 = vrot.lane.b32.xlu1 %v5096_v40, %s8197_s30  ;;  %846 = vrot.lane.b32.xlu0 %v5100_v41, %s8197_s30 }
  0xa1   : > { %864 = vrot.lane.b32.xlu1 %v5108_v46, %s8197_s30  ;;  %862 = vrot.lane.b32.xlu0 %v5112_v47, %s8197_s30 }
  0xa5   : > { %914 = vrot.lane.b32.xlu1 %v5040_v11, %s8195_s27  ;;  %912 = vrot.lane.b32.xlu0 %v5030_v7, %s8195_s27 }
  0xa9   : > { %930 = vrot.lane.b32.xlu1 %v5036_v10, %s8195_s27  ;;  %928 = vrot.lane.b32.xlu0 %v5025_v3, %s8195_s27 }
  0xad   : > { %918 = vrot.lane.b32.xlu1 %v5048_v16, %s8195_s27  ;;  %916 = vrot.lane.b32.xlu0 %v5052_v17, %s8195_s27 }
  0xb1   : > { %934 = vrot.lane.b32.xlu1 %v5060_v22, %s8195_s27  ;;  %932 = vrot.lane.b32.xlu0 %v5064_v23, %s8195_s27 }
  0xb5   : > { %922 = vrot.lane.b32.xlu1 %v5072_v28, %s8195_s27  ;;  %920 = vrot.lane.b32.xlu0 %v5076_v29, %s8195_s27 }
  0xb9   : > { %938 = vrot.lane.b32.xlu1 %v5084_v34, %s8195_s27  ;;  %936 = vrot.lane.b32.xlu0 %v5088_v35, %s8195_s27 }
  0xbd   : > { %926 = vrot.lane.b32.xlu1 %v5096_v40, %s8195_s27  ;;  %924 = vrot.lane.b32.xlu0 %v5100_v41, %s8195_s27 }
  0xc1   : > { %942 = vrot.lane.b32.xlu1 %v5108_v46, %s8195_s27  ;;  %940 = vrot.lane.b32.xlu0 %v5112_v47, %s8195_s27 }
  0xc5   : > { %990 = vrot.lane.b32.xlu1 %v5040_v11, %s8193_s13  ;;  %988 = vrot.lane.b32.xlu0 %v5030_v7, %s8193_s13 }
  0xc9   : > { %1006 = vrot.lane.b32.xlu1 %v5036_v10, %s8193_s13  ;;  %1004 = vrot.lane.b32.xlu0 %v5025_v3, %s8193_s13 }
  0xcd   : > { %994 = vrot.lane.b32.xlu1 %v5048_v16, %s8193_s13  ;;  %992 = vrot.lane.b32.xlu0 %v5052_v17, %s8193_s13 }
  0xd1   : > { %1010 = vrot.lane.b32.xlu1 %v5060_v22, %s8193_s13  ;;  %1008 = vrot.lane.b32.xlu0 %v5064_v23, %s8193_s13 }
  0xd5   : > { %998 = vrot.lane.b32.xlu1 %v5072_v28, %s8193_s13  ;;  %996 = vrot.lane.b32.xlu0 %v5076_v29, %s8193_s13 }
  0xd9   : > { %1014 = vrot.lane.b32.xlu1 %v5084_v34, %s8193_s13  ;;  %1012 = vrot.lane.b32.xlu0 %v5088_v35, %s8193_s13 }
  0xdd   : > { %1002 = vrot.lane.b32.xlu1 %v5096_v40, %s8193_s13  ;;  %1000 = vrot.lane.b32.xlu0 %v5100_v41, %s8193_s13 }
  0xe1   : > { %1018 = vrot.lane.b32.xlu1 %v5108_v46, %s8193_s13  ;;  %1016 = vrot.lane.b32.xlu0 %v5112_v47, %s8193_s13 }
  0xe5   : > { %1066 = vrot.lane.b32.xlu1 %v5040_v11, %s8191_s29  ;;  %1064 = vrot.lane.b32.xlu0 %v5030_v7, %s8191_s29 }
  0xe9   : > { %1082 = vrot.lane.b32.xlu1 %v5036_v10, %s8191_s29  ;;  %1080 = vrot.lane.b32.xlu0 %v5025_v3, %s8191_s29 }
  0xed   : > { %1070 = vrot.lane.b32.xlu1 %v5048_v16, %s8191_s29  ;;  %1068 = vrot.lane.b32.xlu0 %v5052_v17, %s8191_s29 }
  0xf1   : > { %1086 = vrot.lane.b32.xlu1 %v5060_v22, %s8191_s29  ;;  %1084 = vrot.lane.b32.xlu0 %v5064_v23, %s8191_s29 }
  0xf5   : > { %1074 = vrot.lane.b32.xlu1 %v5072_v28, %s8191_s29  ;;  %1072 = vrot.lane.b32.xlu0 %v5076_v29, %s8191_s29 }
  0xf7   : > { %v851_v54 = vpop.permute.xlu1 %850  ;;  %v835_v55 = vpop.permute.xlu0 %834 }
  0xf8   : > { %v869_v57 = vsel %vm868_vm0, %v835_v55, %v851_v54  ;;  %v877_v59 = vsel %vm868_vm0, %v851_v54, %v835_v55 }
  0xf9   : > { %1090 = vrot.lane.b32.xlu1 %v5084_v34, %s8191_s29  ;;  %1088 = vrot.lane.b32.xlu0 %v5088_v35, %s8191_s29  ;;  %v897_v0 = vmul.f32 %v5212_v56, %v869_v57  ;;  %v896_v4 = vmul.f32 %v5219_v58, %v877_v59 }
  0xfb   : > { %v853_v60 = vpop.permute.xlu1 %852  ;;  %v837_v61 = vpop.permute.xlu0 %836 }
  0xfc   : > { %v878_v62 = vsel %vm868_vm0, %v853_v60, %v837_v61  ;;  %v870_v63 = vsel %vm868_vm0, %v837_v61, %v853_v60 }
  0xfd   : > { %1078 = vrot.lane.b32.xlu1 %v5096_v40, %s8191_s29  ;;  %1076 = vrot.lane.b32.xlu0 %v5100_v41, %s8191_s29  ;;  %v899_v2 = vmul.f32 %v5212_v56, %v870_v63  ;;  %v898_v5 = vmul.f32 %v5219_v58, %v878_v62 }
  0xff   : > { %v841_v6 = vpop.permute.xlu1 %840  ;;  %v839_v8 = vpop.permute.xlu0 %838  ;;  %v3842_v9 = vpack.c.bf16 %v899_v2, %v897_v0  ;;  %v3844_v12 = vpack.c.bf16 %v898_v5, %v896_v4  ;;  %v504_v5 = vld [vmem:[#allocation5 + $0x1] ss:$8 sm:$0x3] }
 0x101   : > { %1094 = vrot.lane.b32.xlu1 %v5108_v46, %s8191_s29  ;;  %1092 = vrot.lane.b32.xlu0 %v5112_v47, %s8191_s29 }
 0x102   : > { %3843 = vmatprep.subr.bf16.mxu0 %v3842_v9 }
 0x103   : > { %3845 = vmatpush1.bf16.msra.mxu0 %v3844_v12  ;;  %v857_v13 = vpop.permute.xlu1 %856  ;;  %v855_v18 = vpop.permute.xlu0 %854 }
 0x104   : > { %v872_v14 = vsel %vm868_vm0, %v841_v6, %v857_v13  ;;  %v880_v15 = vsel %vm868_vm0, %v857_v13, %v841_v6  ;;  %v871_v21 = vsel %vm868_vm0, %v839_v8, %v855_v18  ;;  %v879_v24 = vsel %vm868_vm0, %v855_v18, %v839_v8 }
 0x105   : > { %v902_v19 = vmul.f32 %v5219_v58, %v880_v15  ;;  %v903_v20 = vmul.f32 %v5212_v56, %v872_v14  ;;  %1169 = vrot.lane.b32.xlu1 %v5040_v11, %s8187_s12  ;;  %v900_v25 = vmul.f32 %v5219_v58, %v879_v24  ;;  %v901_v26 = vmul.f32 %v5212_v56, %v871_v21 }
 0x106   : > { %1167 = vrot.lane.b32.xlu0 %v5030_v7, %s8187_s12  ;;  %v5302_v13 = vrot.slane %v504_v5, %v5206_v53  ;;  %v5305_v14 = vrot.slane %v504_v5, %v5202_v51 }
 0x107   : > { %v845_v27 = vpop.permute.xlu1 %844  ;;  %v843_v30 = vpop.permute.xlu0 %842  ;;  %v3846_v31 = vpack.c.bf16 %v903_v20, %v901_v26  ;;  %v3848_v32 = vpack.c.bf16 %v902_v19, %v900_v25 }
 0x108   : > { %8340 = vst [vmem:[#allocation16_spill] sm:$0xff] %v5302_v13  ;;  %8341 = vst [vmem:[#allocation17_spill] sm:$0xff] %v5305_v14 }
 0x109   : > { %1185 = vrot.lane.b32.xlu1 %v5036_v10, %s8187_s12  ;;  %3847 = vmatprep.subr.bf16.mxu0 %v3846_v31 }
 0x10a   : > { %1183 = vrot.lane.b32.xlu0 %v5025_v3, %s8187_s12  ;;  %3849 = vmatpush1.bf16.msra.mxu0 %v3848_v32 }
 0x10b   : > { %v861_v33 = vpop.permute.xlu1 %860  ;;  %v859_v38 = vpop.permute.xlu0 %858 }
 0x10c   : > { %v874_v36 = vsel %vm868_vm0, %v845_v27, %v861_v33  ;;  %v882_v37 = vsel %vm868_vm0, %v861_v33, %v845_v27  ;;  %v873_v43 = vsel %vm868_vm0, %v843_v30, %v859_v38  ;;  %v881_v44 = vsel %vm868_vm0, %v859_v38, %v843_v30 }
 0x10d   : > { %v906_v39 = vmul.f32 %v5219_v58, %v882_v37  ;;  %v907_v42 = vmul.f32 %v5212_v56, %v874_v36  ;;  %1173 = vrot.lane.b32.xlu1 %v5048_v16, %s8187_s12  ;;  %v904_v45 = vmul.f32 %v5219_v58, %v881_v44  ;;  %v905_v48 = vmul.f32 %v5212_v56, %v873_v43 }
 0x10e   : > { %1171 = vrot.lane.b32.xlu0 %v5052_v17, %s8187_s12 }
 0x10f   : > { %v849_v49 = vpop.permute.xlu1 %848  ;;  %v847_v52 = vpop.permute.xlu0 %846  ;;  %v3850_v54 = vpack.c.bf16 %v907_v42, %v905_v48  ;;  %v3852_v55 = vpack.c.bf16 %v906_v39, %v904_v45 }
 0x111   : > { %1189 = vrot.lane.b32.xlu1 %v5060_v22, %s8187_s12  ;;  %3851 = vmatprep.subr.bf16.mxu0 %v3850_v54 }
 0x112   : > { %1187 = vrot.lane.b32.xlu0 %v5064_v23, %s8187_s12  ;;  %3853 = vmatpush1.bf16.msra.mxu0 %v3852_v55 }
 0x113   : > { %v865_v57 = vpop.permute.xlu1 %864  ;;  %v863_v61 = vpop.permute.xlu0 %862 }
 0x114   : > { %v876_v59 = vsel %vm868_vm0, %v849_v49, %v865_v57  ;;  %v884_v60 = vsel %vm868_vm0, %v865_v57, %v849_v49  ;;  %v875_v0 = vsel %vm868_vm0, %v847_v52, %v863_v61  ;;  %v883_v1 = vsel %vm868_vm0, %v863_v61, %v847_v52 }
 0x115   : > { %v910_v62 = vmul.f32 %v5219_v58, %v884_v60  ;;  %v911_v63 = vmul.f32 %v5212_v56, %v876_v59  ;;  %1177 = vrot.lane.b32.xlu1 %v5072_v28, %s8187_s12  ;;  %v908_v2 = vmul.f32 %v5219_v58, %v883_v1  ;;  %v909_v4 = vmul.f32 %v5212_v56, %v875_v0 }
 0x116   : > { %1175 = vrot.lane.b32.xlu0 %v5076_v29, %s8187_s12 }
 0x117   : > { %v915_v6 = vpop.permute.xlu1 %914  ;;  %v913_v8 = vpop.permute.xlu0 %912  ;;  %v3854_v9 = vpack.c.bf16 %v911_v63, %v909_v4  ;;  %v3856_v12 = vpack.c.bf16 %v910_v62, %v908_v2 }
 0x119   : > { %1193 = vrot.lane.b32.xlu1 %v5084_v34, %s8187_s12  ;;  %3855 = vmatprep.subr.bf16.mxu0 %v3854_v9 }
 0x11a   : > { %1191 = vrot.lane.b32.xlu0 %v5088_v35, %s8187_s12  ;;  %3857 = vmatpush1.bf16.msra.mxu0 %v3856_v12 }
 0x11b   : > { %v931_v15 = vpop.permute.xlu1 %930  ;;  %v929_v20 = vpop.permute.xlu0 %928 }
 0x11c   : > { %v946_v18 = vsel %vm944_vm1, %v915_v6, %v931_v15  ;;  %v954_v19 = vsel %vm944_vm1, %v931_v15, %v915_v6  ;;  %v945_v25 = vsel %vm944_vm1, %v913_v8, %v929_v20  ;;  %v953_v26 = vsel %vm944_vm1, %v929_v20, %v913_v8 }
 0x11d   : > { %v974_v21 = vmul.f32 %v5302_v13, %v954_v19  ;;  %v975_v24 = vmul.f32 %v5305_v14, %v946_v18  ;;  %1181 = vrot.lane.b32.xlu1 %v5096_v40, %s8187_s12  ;;  %v972_v27 = vmul.f32 %v5302_v13, %v953_v26  ;;  %v973_v30 = vmul.f32 %v5305_v14, %v945_v25 }
 0x11e   : > { %1179 = vrot.lane.b32.xlu0 %v5100_v41, %s8187_s12 }
 0x11f   : > { %v919_v31 = vpop.permute.xlu1 %918  ;;  %v917_v32 = vpop.permute.xlu0 %916  ;;  %v3858_v33 = vpack.c.bf16 %v975_v24, %v973_v30  ;;  %v3860_v36 = vpack.c.bf16 %v974_v21, %v972_v27 }
 0x121   : > { %1197 = vrot.lane.b32.xlu1 %v5108_v46, %s8187_s12  ;;  %3859 = vmatprep.subr.bf16.mxu0 %v3858_v33 }
 0x122   : > { %1195 = vrot.lane.b32.xlu0 %v5112_v47, %s8187_s12  ;;  %3861 = vmatpush1.bf16.msra.mxu0 %v3860_v36  ;;  %s8363_s12 = smov 112  }
 0x123   : > { %v935_v37 = vpop.permute.xlu1 %934  ;;  %v933_v42 = vpop.permute.xlu0 %932 }
 0x124   : > { %v948_v38 = vsel %vm944_vm1, %v919_v31, %v935_v37  ;;  %v956_v39 = vsel %vm944_vm1, %v935_v37, %v919_v31  ;;  %v947_v45 = vsel %vm944_vm1, %v917_v32, %v933_v42  ;;  %v955_v48 = vsel %vm944_vm1, %v933_v42, %v917_v32  ;;  %v506_v32 = vld [vmem:[#allocation5 + $0x2] ss:$8 sm:$0x3] }
 0x125   : > { %v978_v43 = vmul.f32 %v5302_v13, %v956_v39  ;;  %v979_v44 = vmul.f32 %v5305_v14, %v948_v38  ;;  %1245 = vrot.lane.b32.xlu1 %v5040_v11, %s8183_s11  ;;  %v976_v49 = vmul.f32 %v5302_v13, %v955_v48  ;;  %v977_v52 = vmul.f32 %v5305_v14, %v947_v45 }
 0x126   : > { %1243 = vrot.lane.b32.xlu0 %v5030_v7, %s8183_s11  ;;  %v5389_v39 = vrot.slane %v506_v32, %v5206_v53  ;;  %v5392_v42 = vrot.slane %v506_v32, %v5202_v51 }
 0x127   : > { %v923_v54 = vpop.permute.xlu1 %922  ;;  %v921_v55 = vpop.permute.xlu0 %920  ;;  %v3862_v57 = vpack.c.bf16 %v979_v44, %v977_v52  ;;  %v3864_v59 = vpack.c.bf16 %v978_v43, %v976_v49 }
 0x128   : > { %8342 = vst [vmem:[#allocation18_spill] sm:$0xff] %v5389_v39  ;;  %8343 = vst [vmem:[#allocation19_spill] sm:$0xff] %v5392_v42 }
 0x129   : > { %1261 = vrot.lane.b32.xlu1 %v5036_v10, %s8183_s11  ;;  %3863 = vmatprep.subr.bf16.mxu0 %v3862_v57 }
 0x12a   : > { %1259 = vrot.lane.b32.xlu0 %v5025_v3, %s8183_s11  ;;  %3865 = vmatpush1.bf16.msra.mxu0 %v3864_v59 }
 0x12b   : > { %v939_v60 = vpop.permute.xlu1 %938  ;;  %v937_v63 = vpop.permute.xlu0 %936 }
 0x12c   : > { %v950_v61 = vsel %vm944_vm1, %v923_v54, %v939_v60  ;;  %v958_v62 = vsel %vm944_vm1, %v939_v60, %v923_v54  ;;  %v949_v2 = vsel %vm944_vm1, %v921_v55, %v937_v63  ;;  %v957_v4 = vsel %vm944_vm1, %v937_v63, %v921_v55 }
 0x12d   : > { %v982_v0 = vmul.f32 %v5302_v13, %v958_v62  ;;  %v983_v1 = vmul.f32 %v5305_v14, %v950_v61  ;;  %1249 = vrot.lane.b32.xlu1 %v5048_v16, %s8183_s11  ;;  %v980_v5 = vmul.f32 %v5302_v13, %v957_v4  ;;  %v981_v6 = vmul.f32 %v5305_v14, %v949_v2 }
 0x12e   : > { %1247 = vrot.lane.b32.xlu0 %v5052_v17, %s8183_s11 }
 0x12f   : > { %v927_v8 = vpop.permute.xlu1 %926  ;;  %v925_v9 = vpop.permute.xlu0 %924  ;;  %v3866_v12 = vpack.c.bf16 %v983_v1, %v981_v6  ;;  %v3868_v15 = vpack.c.bf16 %v982_v0, %v980_v5 }
 0x131   : > { %1265 = vrot.lane.b32.xlu1 %v5060_v22, %s8183_s11  ;;  %3867 = vmatprep.subr.bf16.mxu0 %v3866_v12 }
 0x132   : > { %1263 = vrot.lane.b32.xlu0 %v5064_v23, %s8183_s11  ;;  %3869 = vmatpush1.bf16.msra.mxu0 %v3868_v15 }
 0x133   : > { %v943_v18 = vpop.permute.xlu1 %942  ;;  %v941_v21 = vpop.permute.xlu0 %940 }
 0x134   : > { %v952_v19 = vsel %vm944_vm1, %v927_v8, %v943_v18  ;;  %v960_v20 = vsel %vm944_vm1, %v943_v18, %v927_v8  ;;  %v951_v26 = vsel %vm944_vm1, %v925_v9, %v941_v21  ;;  %v959_v27 = vsel %vm944_vm1, %v941_v21, %v925_v9 }
 0x135   : > { %v986_v24 = vmul.f32 %v5302_v13, %v960_v20  ;;  %v987_v25 = vmul.f32 %v5305_v14, %v952_v19  ;;  %1253 = vrot.lane.b32.xlu1 %v5072_v28, %s8183_s11  ;;  %v984_v30 = vmul.f32 %v5302_v13, %v959_v27  ;;  %v985_v31 = vmul.f32 %v5305_v14, %v951_v26 }
 0x136   : > { %1251 = vrot.lane.b32.xlu0 %v5076_v29, %s8183_s11 }
 0x137   : > { %v991_v33 = vpop.permute.xlu1 %990  ;;  %v989_v36 = vpop.permute.xlu0 %988  ;;  %v3870_v37 = vpack.c.bf16 %v987_v25, %v985_v31  ;;  %v3872_v38 = vpack.c.bf16 %v986_v24, %v984_v30 }
 0x139   : > { %1269 = vrot.lane.b32.xlu1 %v5084_v34, %s8183_s11  ;;  %3871 = vmatprep.subr.bf16.mxu0 %v3870_v37 }
 0x13a   : > { %1267 = vrot.lane.b32.xlu0 %v5088_v35, %s8183_s11  ;;  %3873 = vmatpush1.bf16.msra.mxu0 %v3872_v38 }
 0x13b   : > { %v1007_v43 = vpop.permute.xlu1 %1006  ;;  %v1005_v48 = vpop.permute.xlu0 %1004 }
 0x13c   : > { %v1022_v44 = vsel %vm1020_vm2, %v991_v33, %v1007_v43  ;;  %v1030_v45 = vsel %vm1020_vm2, %v1007_v43, %v991_v33  ;;  %v1021_v54 = vsel %vm1020_vm2, %v989_v36, %v1005_v48  ;;  %v1029_v55 = vsel %vm1020_vm2, %v1005_v48, %v989_v36 }
 0x13d   : > { %v1050_v49 = vmul.f32 %v5389_v39, %v1030_v45  ;;  %v1051_v52 = vmul.f32 %v5392_v42, %v1022_v44  ;;  %1257 = vrot.lane.b32.xlu1 %v5096_v40, %s8183_s11  ;;  %v1048_v57 = vmul.f32 %v5389_v39, %v1029_v55  ;;  %v1049_v59 = vmul.f32 %v5392_v42, %v1021_v54 }
 0x13e   : > { %1255 = vrot.lane.b32.xlu0 %v5100_v41, %s8183_s11 }
 0x13f   : > { %v995_v60 = vpop.permute.xlu1 %994  ;;  %v993_v61 = vpop.permute.xlu0 %992  ;;  %v3874_v62 = vpack.c.bf16 %v1051_v52, %v1049_v59  ;;  %v3876_v63 = vpack.c.bf16 %v1050_v49, %v1048_v57 }
 0x141   : > { %1273 = vrot.lane.b32.xlu1 %v5108_v46, %s8183_s11  ;;  %3875 = vmatprep.subr.bf16.mxu0 %v3874_v62 }
 0x142   : > { %1271 = vrot.lane.b32.xlu0 %v5112_v47, %s8183_s11  ;;  %3877 = vmatpush1.bf16.msra.mxu0 %v3876_v63  ;;  %v508_v63 = vld [vmem:[#allocation5 + $0x3] ss:$8 sm:$0x3]  ;;  %s8362_s11 = smov 113  }
 0x143   : > { %v1011_v0 = vpop.permute.xlu1 %1010  ;;  %v1009_v4 = vpop.permute.xlu0 %1008 }
 0x144   : > { %v1024_v1 = vsel %vm1020_vm2, %v995_v60, %v1011_v0  ;;  %v1032_v2 = vsel %vm1020_vm2, %v1011_v0, %v995_v60  ;;  %v1023_v8 = vsel %vm1020_vm2, %v993_v61, %v1009_v4  ;;  %v1031_v9 = vsel %vm1020_vm2, %v1009_v4, %v993_v61 }
 0x145   : > { %v1054_v5 = vmul.f32 %v5389_v39, %v1032_v2  ;;  %v1055_v6 = vmul.f32 %v5392_v42, %v1024_v1  ;;  %1321 = vrot.lane.b32.xlu1 %v5040_v11, %s8181_s14  ;;  %v1052_v12 = vmul.f32 %v5389_v39, %v1031_v9  ;;  %v1053_v15 = vmul.f32 %v5392_v42, %v1023_v8 }
 0x146   : > { %1319 = vrot.lane.b32.xlu0 %v5030_v7, %s8181_s14 }
 0x147   : > { %v999_v18 = vpop.permute.xlu1 %998  ;;  %v997_v19 = vpop.permute.xlu0 %996  ;;  %v3878_v20 = vpack.c.bf16 %v1055_v6, %v1053_v15  ;;  %v3880_v21 = vpack.c.bf16 %v1054_v5, %v1052_v12  ;;  %v5476_v5 = vrot.slane %v508_v63, %v5206_v53  ;;  %v5479_v6 = vrot.slane %v508_v63, %v5202_v51  ;;  %v510_v63 = vld [vmem:[#allocation5 + $0x4] ss:$8 sm:$0x3] }
 0x149   : > { %1337 = vrot.lane.b32.xlu1 %v5036_v10, %s8181_s14  ;;  %3879 = vmatprep.subr.bf16.mxu0 %v3878_v20  ;;  %8344 = vst [vmem:[#allocation20_spill] sm:$0xff] %v5476_v5  ;;  %8345 = vst [vmem:[#allocation21_spill] sm:$0xff] %v5479_v6 }
 0x14a   : > { %1335 = vrot.lane.b32.xlu0 %v5025_v3, %s8181_s14  ;;  %3881 = vmatpush1.bf16.msra.mxu0 %v3880_v21 }
 0x14b   : > { %v1015_v24 = vpop.permute.xlu1 %1014  ;;  %v1013_v27 = vpop.permute.xlu0 %1012 }
 0x14c   : > { %v1026_v25 = vsel %vm1020_vm2, %v999_v18, %v1015_v24  ;;  %v1034_v26 = vsel %vm1020_vm2, %v1015_v24, %v999_v18  ;;  %v1025_v32 = vsel %vm1020_vm2, %v997_v19, %v1013_v27  ;;  %v1033_v33 = vsel %vm1020_vm2, %v1013_v27, %v997_v19 }
 0x14d   : > { %v1058_v30 = vmul.f32 %v5389_v39, %v1034_v26  ;;  %v1059_v31 = vmul.f32 %v5392_v42, %v1026_v25  ;;  %1325 = vrot.lane.b32.xlu1 %v5048_v16, %s8181_s14  ;;  %v1056_v36 = vmul.f32 %v5389_v39, %v1033_v33  ;;  %v1057_v37 = vmul.f32 %v5392_v42, %v1025_v32 }
 0x14e   : > { %1323 = vrot.lane.b32.xlu0 %v5052_v17, %s8181_s14 }
 0x14f   : > { %v1003_v38 = vpop.permute.xlu1 %1002  ;;  %v1001_v43 = vpop.permute.xlu0 %1000  ;;  %v3882_v44 = vpack.c.bf16 %v1059_v31, %v1057_v37  ;;  %v3884_v45 = vpack.c.bf16 %v1058_v30, %v1056_v36 }
 0x151   : > { %1341 = vrot.lane.b32.xlu1 %v5060_v22, %s8181_s14  ;;  %3883 = vmatprep.subr.bf16.mxu0 %v3882_v44 }
 0x152   : > { %1339 = vrot.lane.b32.xlu0 %v5064_v23, %s8181_s14  ;;  %3885 = vmatpush1.bf16.msra.mxu0 %v3884_v45 }
 0x153   : > { %v1019_v48 = vpop.permute.xlu1 %1018  ;;  %v1017_v54 = vpop.permute.xlu0 %1016 }
 0x154   : > { %v1028_v49 = vsel %vm1020_vm2, %v1003_v38, %v1019_v48  ;;  %v1036_v52 = vsel %vm1020_vm2, %v1019_v48, %v1003_v38  ;;  %v1027_v59 = vsel %vm1020_vm2, %v1001_v43, %v1017_v54  ;;  %v1035_v60 = vsel %vm1020_vm2, %v1017_v54, %v1001_v43 }
 0x155   : > { %v1062_v55 = vmul.f32 %v5389_v39, %v1036_v52  ;;  %v1063_v57 = vmul.f32 %v5392_v42, %v1028_v49  ;;  %1329 = vrot.lane.b32.xlu1 %v5072_v28, %s8181_s14  ;;  %v1060_v61 = vmul.f32 %v5389_v39, %v1035_v60  ;;  %v1061_v62 = vmul.f32 %v5392_v42, %v1027_v59 }
 0x156   : > { %1327 = vrot.lane.b32.xlu0 %v5076_v29, %s8181_s14 }
 0x157   : > { %v1067_v0 = vpop.permute.xlu1 %1066  ;;  %v1065_v1 = vpop.permute.xlu0 %1064  ;;  %v3886_v2 = vpack.c.bf16 %v1063_v57, %v1061_v62  ;;  %v3888_v4 = vpack.c.bf16 %v1062_v55, %v1060_v61 }
 0x159   : > { %1345 = vrot.lane.b32.xlu1 %v5084_v34, %s8181_s14  ;;  %3887 = vmatprep.subr.bf16.mxu0 %v3886_v2 }
 0x15a   : > { %1343 = vrot.lane.b32.xlu0 %v5088_v35, %s8181_s14  ;;  %3889 = vmatpush1.bf16.msra.mxu0 %v3888_v4 }
 0x15b   : > { %v1083_v8 = vpop.permute.xlu1 %1082  ;;  %v1081_v15 = vpop.permute.xlu0 %1080 }
 0x15c   : > { %v1098_v9 = vsel %vm1096_vm3, %v1067_v0, %v1083_v8  ;;  %v1106_v12 = vsel %vm1096_vm3, %v1083_v8, %v1067_v0  ;;  %v1097_v20 = vsel %vm1096_vm3, %v1065_v1, %v1081_v15  ;;  %v1105_v21 = vsel %vm1096_vm3, %v1081_v15, %v1065_v1 }
 0x15d   : > { %v1126_v18 = vmul.f32 %v5476_v5, %v1106_v12  ;;  %v1127_v19 = vmul.f32 %v5479_v6, %v1098_v9  ;;  %1333 = vrot.lane.b32.xlu1 %v5096_v40, %s8181_s14  ;;  %v1124_v24 = vmul.f32 %v5476_v5, %v1105_v21  ;;  %v1125_v25 = vmul.f32 %v5479_v6, %v1097_v20 }
 0x15e   : > { %1331 = vrot.lane.b32.xlu0 %v5100_v41, %s8181_s14  ;;  %v5540_v15 = vrot.slane %v510_v63, %v5202_v51 }
 0x15f   : > { %v1071_v26 = vpop.permute.xlu1 %1070  ;;  %v1069_v27 = vpop.permute.xlu0 %1068  ;;  %v3890_v30 = vpack.c.bf16 %v1127_v19, %v1125_v25  ;;  %v3892_v31 = vpack.c.bf16 %v1126_v18, %v1124_v24  ;;  %v5547_v24 = vrot.slane %v510_v63, %v5206_v53 }
 0x160   : > { %8346 = vst [vmem:[#allocation22_spill] sm:$0xff] %v5540_v15  ;;  %v1152_v25 = vmul.f32 %v5540_v15, %v5025_v3 }
 0x161   : > { %1349 = vrot.lane.b32.xlu1 %v5108_v46, %s8181_s14  ;;  %3891 = vmatprep.subr.bf16.mxu0 %v3890_v30  ;;  %8347 = vst [vmem:[#allocation23_spill] sm:$0xff] %v5547_v24  ;;  %v1155_v63 = vmul.f32 %v5547_v24, %v5052_v17 }
 0x162   : > { %1347 = vrot.lane.b32.xlu0 %v5112_v47, %s8181_s14  ;;  %3893 = vmatpush1.bf16.msra.mxu0 %v3892_v31 }
 0x163   : > { %v1087_v32 = vpop.permute.xlu1 %1086  ;;  %v1085_v37 = vpop.permute.xlu0 %1084 }
 0x164   : > { %v1100_v33 = vsel %vm1096_vm3, %v1071_v26, %v1087_v32  ;;  %v1108_v36 = vsel %vm1096_vm3, %v1087_v32, %v1071_v26  ;;  %v1099_v44 = vsel %vm1096_vm3, %v1069_v27, %v1085_v37  ;;  %v1107_v45 = vsel %vm1096_vm3, %v1085_v37, %v1069_v27 }
 0x165   : > { %v1130_v38 = vmul.f32 %v5476_v5, %v1108_v36  ;;  %v1131_v43 = vmul.f32 %v5479_v6, %v1100_v33  ;;  %1397 = vrot.lane.b32.xlu1 %v5040_v11, %s8185_s26  ;;  %v1128_v48 = vmul.f32 %v5476_v5, %v1107_v45  ;;  %v1129_v49 = vmul.f32 %v5479_v6, %v1099_v44 }
 0x166   : > { %1395 = vrot.lane.b32.xlu0 %v5030_v7, %s8185_s26  ;;  %v1154_v26 = vmul.f32 %v5540_v15, %v5036_v10 }
 0x167   : > { %v1075_v52 = vpop.permute.xlu1 %1074  ;;  %v1073_v54 = vpop.permute.xlu0 %1072  ;;  %v3894_v55 = vpack.c.bf16 %v1131_v43, %v1129_v49  ;;  %v3896_v57 = vpack.c.bf16 %v1130_v38, %v1128_v48  ;;  %v1151_v48 = vmul.f32 %v5547_v24, %v5030_v7  ;;  %v1153_v49 = vmul.f32 %v5547_v24, %v5040_v11 }
 0x168   : > { %v3906_v45 = vpack.c.bf16 %v1154_v26, %v1152_v25  ;;  %v559_v25 = vld [vmem:[%s8167_s7 + $0x28] sm:$0xff] }
 0x169   : > { %1413 = vrot.lane.b32.xlu1 %v5036_v10, %s8185_s26  ;;  %3895 = vmatprep.subr.bf16.mxu0 %v3894_v55 }
 0x16a   : > { %1411 = vrot.lane.b32.xlu0 %v5025_v3, %s8185_s26  ;;  %3897 = vmatpush1.bf16.msra.mxu0 %v3896_v57  ;;  %v1156_v57 = vmul.f32 %v5540_v15, %v5064_v23 }
 0x16b   : > { %v1091_v59 = vpop.permute.xlu1 %1090  ;;  %v1089_v62 = vpop.permute.xlu0 %1088 }
 0x16c   : > { %v1102_v60 = vsel %vm1096_vm3, %v1075_v52, %v1091_v59  ;;  %v1110_v61 = vsel %vm1096_vm3, %v1091_v59, %v1075_v52  ;;  %v1101_v2 = vsel %vm1096_vm3, %v1073_v54, %v1089_v62  ;;  %v1109_v4 = vsel %vm1096_vm3, %v1089_v62, %v1073_v54 }
 0x16d   : > { %v1134_v0 = vmul.f32 %v5476_v5, %v1110_v61  ;;  %v1135_v1 = vmul.f32 %v5479_v6, %v1102_v60  ;;  %1401 = vrot.lane.b32.xlu1 %v5048_v16, %s8185_s26  ;;  %v1132_v8 = vmul.f32 %v5476_v5, %v1109_v4  ;;  %v1133_v9 = vmul.f32 %v5479_v6, %v1101_v2  ;;  %v554_v61 = vld [vmem:[%s8167_s7] sm:$0xff] }
 0x16e   : > { %1399 = vrot.lane.b32.xlu0 %v5052_v17, %s8185_s26  ;;  %v1158_v59 = vmul.f32 %v5540_v15, %v5060_v22  ;;  %v3908_v62 = vpack.c.bf16 %v1153_v49, %v1151_v48  ;;  %v1160_v4 = vmul.f32 %v5540_v15, %v5088_v35  ;;  %v1165_v48 = vmul.f32 %v5547_v24, %v5096_v40  ;;  %v564_v49 = vld [vmem:[%s8167_s7 + $0x50] sm:$0xff] }
 0x16f   : > { %v1079_v12 = vpop.permute.xlu1 %1078  ;;  %v1077_v18 = vpop.permute.xlu0 %1076  ;;  %v3898_v19 = vpack.c.bf16 %v1135_v1, %v1133_v9  ;;  %v3900_v20 = vpack.c.bf16 %v1134_v0, %v1132_v8  ;;  %v1157_v0 = vmul.f32 %v5547_v24, %v5048_v16  ;;  %v1162_v8 = vmul.f32 %v5540_v15, %v5084_v34  ;;  %v560_v9 = vld [vmem:[%s8167_s7 + $0x30] sm:$0xff] }
 0x170   : > { %v3910_v2 = vpack.c.bf16 %v1158_v59, %v1156_v57  ;;  %v570_v59 = vld [vmem:[%s8167_s7 + $0x80] sm:$0xff] }
 0x171   : > { %1417 = vrot.lane.b32.xlu1 %v5060_v22, %s8185_s26  ;;  %3899 = vmatprep.subr.bf16.mxu0 %v3898_v19  ;;  %v3912_v19 = vpack.c.bf16 %v1157_v0, %v1155_v63 }
 0x172   : > { %1415 = vrot.lane.b32.xlu0 %v5064_v23, %s8185_s26  ;;  %3901 = vmatpush1.bf16.msra.mxu0 %v3900_v20  ;;  %v1159_v20 = vmul.f32 %v5547_v24, %v5076_v29 }
 0x173   : > { %v1095_v21 = vpop.permute.xlu1 %1094  ;;  %v1093_v31 = vpop.permute.xlu0 %1092 }
 0x174   : > { %v1104_v27 = vsel %vm1096_vm3, %v1079_v12, %v1095_v21  ;;  %v1112_v30 = vsel %vm1096_vm3, %v1095_v21, %v1079_v12  ;;  %v1103_v36 = vsel %vm1096_vm3, %v1077_v18, %v1093_v31  ;;  %v1111_v37 = vsel %vm1096_vm3, %v1093_v31, %v1077_v18  ;;  %v512_v12 = vld [vmem:[#allocation5 + $0x5] ss:$8 sm:$0x3] }
 0x175   : > { %v1138_v32 = vmul.f32 %v5476_v5, %v1112_v30  ;;  %v1139_v33 = vmul.f32 %v5479_v6, %v1104_v27  ;;  %1405 = vrot.lane.b32.xlu1 %v5072_v28, %s8185_s26  ;;  %v1136_v38 = vmul.f32 %v5476_v5, %v1111_v37  ;;  %v1137_v43 = vmul.f32 %v5479_v6, %v1103_v36 }
 0x176   : > { %1403 = vrot.lane.b32.xlu0 %v5076_v29, %s8185_s26  ;;  %v1161_v21 = vmul.f32 %v5547_v24, %v5072_v28  ;;  %v3914_v27 = vpack.c.bf16 %v1162_v8, %v1160_v4  ;;  %v1164_v30 = vmul.f32 %v5540_v15, %v5112_v47  ;;  %v1166_v31 = vmul.f32 %v5540_v15, %v5108_v46 }
 0x177   : > { %v1170_v44 = vpop.permute.xlu1 %1169  ;;  %v3902_v54 = vpack.c.bf16 %v1139_v33, %v1137_v43  ;;  %v3904_v55 = vpack.c.bf16 %v1138_v32, %v1136_v38  ;;  %v565_v32 = vld [vmem:[%s8167_s7 + $0x58] sm:$0xff]  ;;  %v5615_v33 = vrot.slane %v512_v12, %v5202_v51 }
 0x178   : > { %v1168_v52 = vpop.permute.xlu0 %1167  ;;  %v3916_v43 = vpack.c.bf16 %v1161_v21, %v1159_v20  ;;  %v3918_v57 = vpack.c.bf16 %v1166_v31, %v1164_v30  ;;  %v574_v30 = vld [vmem:[%s8350_s8] sm:$0xff] }
 0x179   : > { %1421 = vrot.lane.b32.xlu1 %v5084_v34, %s8185_s26  ;;  %3903 = vmatprep.subr.bf16.mxu0 %v3902_v54  ;;  %8348 = vst [vmem:[#allocation24_spill] sm:$0xff] %v5615_v33  ;;  %v5633_v54 = vrot.slane %v512_v12, %v5206_v53  ;;  %v557_v12 = vld [vmem:[%s8167_s7 + $0x18] sm:$0xff] }
 0x17a   : > { %1419 = vrot.lane.b32.xlu0 %v5088_v35, %s8185_s26  ;;  %3905 = vmatpush1.bf16.msra.mxu0 %v3904_v55 }
 0x17b   : > { %v1186_v60 = vpop.permute.xlu1 %1185  ;;  %3907 = vmatprep.subr.bf16.mxu0 %v3906_v45  ;;  %v1163_v45 = vmul.f32 %v5547_v24, %v5100_v41  ;;  %8349 = vst [vmem:[#allocation25_spill] sm:$0xff] %v5633_v54 }
 0x17c   : > { %v1184_v1 = vpop.permute.xlu0 %1183  ;;  %v1209_v36 = vsel %vm1199_vm4, %v1186_v60, %v1170_v44 }
 0x17d   : > { %1409 = vrot.lane.b32.xlu1 %v5096_v40, %s8185_s26  ;;  %1569 = vmatmul.mubr.f32.vlgmr.msra.gmra.mrb[0].mxu0 %v554_v61  ;;  %v1208_v37 = vsel %vm1199_vm4, %v1184_v1, %v1168_v52  ;;  %v1201_v61 = vsel %vm1199_vm4, %v1170_v44, %v1186_v60  ;;  %v1200_v63 = vsel %vm1199_vm4, %v1168_v52, %v1184_v1  ;;  %v569_v44 = vld [vmem:[%s8167_s7 + $0x78] sm:$0xff] }
 0x17e   : > { %1407 = vrot.lane.b32.xlu0 %v5100_v41, %s8185_s26  ;;  %3909 = vmatpush1.bf16.msra.mxu0 %v3908_v62  ;;  %v1230_v62 = vmul.f32 %v5615_v33, %v1209_v36  ;;  %v1228_v0 = vmul.f32 %v5615_v33, %v1208_v37  ;;  %v1229_v60 = vmul.f32 %v5633_v54, %v1201_v61  ;;  %v577_v61 = vld [vmem:[%s8350_s8 + $0x18] sm:$0xff] }
 0x17f   : > { %v1174_v18 = vpop.permute.xlu1 %1173  ;;  %1574 = vmatprep.mubr.f32.mxu0 %v560_v9  ;;  %3911 = vmatprep.subr.bf16.mxu0 %v3910_v2  ;;  %v3920_v9 = vpack.c.bf16 %v1165_v48, %v1163_v45  ;;  %v1227_v52 = vmul.f32 %v5633_v54, %v1200_v63 }
 0x180   : > { %v1172_v26 = vpop.permute.xlu0 %1171  ;;  %v3922_v20 = vpack.c.bf16 %v1230_v62, %v1228_v0 }
 0x181   : > { %1425 = vrot.lane.b32.xlu1 %v5108_v46, %s8185_s26  ;;  %1575 = vmatmul.mubr.f32.gmra.mrb[2].mxu0 %v559_v25 }
 0x182   : > { %1423 = vrot.lane.b32.xlu0 %v5112_v47, %s8185_s26  ;;  %3913 = vmatpush1.bf16.msra.mxu0 %v3912_v19  ;;  %s8364_s26 = smov 111  }
 0x183   : > { %v1190_v38 = vpop.permute.xlu1 %1189  ;;  %1580 = vmatprep.mubr.f32.mxu0 %v565_v32  ;;  %3915 = vmatprep.subr.bf16.mxu0 %v3914_v27  ;;  %v3924_v32 = vpack.c.bf16 %v1229_v60, %v1227_v52 }
 0x184   : > { %v1188_v55 = vpop.permute.xlu0 %1187  ;;  %v1211_v2 = vsel %vm1199_vm4, %v1190_v38, %v1174_v18  ;;  %v1203_v19 = vsel %vm1199_vm4, %v1174_v18, %v1190_v38  ;;  %v4754_v38 = vmov 0  }
 0x185   : > { %1581 = vmatmul.mubr.f32.gmra.mrb[4].mxu0 %v564_v49  ;;  %v1210_v4 = vsel %vm1199_vm4, %v1188_v55, %v1172_v26  ;;  %v1234_v21 = vmul.f32 %v5615_v33, %v1211_v2  ;;  %v1202_v25 = vsel %vm1199_vm4, %v1172_v26, %v1188_v55  ;;  %v1233_v36 = vmul.f32 %v5633_v54, %v1203_v19  ;;  %v575_v26 = vld [vmem:[%s8350_s8 + $0x8] sm:$0xff] }
 0x186   : > { %3917 = vmatpush1.bf16.msra.mxu0 %v3916_v43  ;;  %1586 = vmatprep.mubr.f32.mxu0 %v570_v59  ;;  %v1232_v27 = vmul.f32 %v5615_v33, %v1210_v4  ;;  %v1231_v43 = vmul.f32 %v5633_v54, %v1202_v25  ;;  %v576_v4 = vld [vmem:[%s8350_s8 + $0x10] sm:$0xff]  ;;  %s8380_s8 = smov 16  }
 0x187   : > { %v1178_v8 = vpop.permute.xlu1 %1177  ;;  %3919 = vmatprep.subr.bf16.mxu0 %v3918_v57  ;;  %4338 = vset.pattern.permute.xlu0 %v4754_v38 }
 0x188   : > { %v1176_v1 = vpop.permute.xlu0 %1175  ;;  %1473 = vperm.xlu0 %4338, %v574_v30   ;;  %v3926_v59 = vpack.c.bf16 %v1234_v21, %v1232_v27  ;;  %4339 = vset.pattern.permute.xlu1 %v4754_v38 }
 0x189   : > { %1587 = vmatmul.mubr.f32.gmra.mrb[6].mxu0 %v569_v44  ;;  %1478 = vperm.xlu1 %4339, %v575_v26  }
 0x18a   : > { %3921 = vmatpush1.bf16.msra.mxu0 %v3920_v9  ;;  %1657 = vmatprep.mubr.f32.mxu0 %v557_v12 }
 0x18b   : > { %v1194_v31 = vpop.permute.xlu1 %1193  ;;  %3923 = vmatprep.subr.bf16.mxu0 %v3922_v20 }
 0x18c   : > { %v1213_v18 = vsel %vm1199_vm4, %v1194_v31, %v1178_v8  ;;  %v1192_v37 = vpop.permute.xlu0 %1191  ;;  %v1205_v45 = vsel %vm1199_vm4, %v1178_v8, %v1194_v31  ;;  %v3928_v8 = vpack.c.bf16 %v1233_v36, %v1231_v43  ;;  %1488 = vperm.xlu0 %4338, %v577_v61   ;;  %v514_v31 = vld [vmem:[#allocation5 + $0x6] ss:$8 sm:$0x3] }
 0x18d   : > { %v1204_v48 = vsel %vm1199_vm4, %v1176_v1, %v1192_v37  ;;  %v1212_v49 = vsel %vm1199_vm4, %v1192_v37, %v1176_v1  ;;  %v1238_v55 = vmul.f32 %v5615_v33, %v1213_v18  ;;  %v1237_v63 = vmul.f32 %v5633_v54, %v1205_v45  ;;  %1483 = vperm.xlu1 %4339, %v576_v4  }
 0x18e   : > { %v1236_v57 = vmul.f32 %v5615_v33, %v1212_v49  ;;  %3925 = vmatpush1.bf16.msra.mxu0 %v3924_v32  ;;  %v1235_v0 = vmul.f32 %v5633_v54, %v1204_v48  ;;  %v5704_v26 = vrot.slane %v514_v31, %v5206_v53  ;;  %v5707_v43 = vrot.slane %v514_v31, %v5202_v51 }
 0x18f   : > { %v1182_v62 = vpop.permute.xlu1 %1181  ;;  %3927 = vmatprep.subr.bf16.mxu0 %v3926_v59 }
 0x190   : > { %v1180_v2 = vpop.permute.xlu0 %1179  ;;  %v3930_v9 = vpack.c.bf16 %v1238_v55, %v1236_v57  ;;  %v3932_v60 = vpack.c.bf16 %v1237_v63, %v1235_v0  ;;  %8351 = vst [vmem:[#allocation26_spill] sm:$0xff] %v5704_v26  ;;  %8352 = vst [vmem:[#allocation27_spill] sm:$0xff] %v5707_v43 }
 0x192   : > { %3929 = vmatpush1.bf16.msra.mxu0 %v3928_v8 }
 0x193   : > { %v1198_v44 = vpop.permute.xlu1 %1197  ;;  %3931 = vmatprep.subr.bf16.mxu0 %v3930_v9 }
 0x194   : > { %v1207_v52 = vsel %vm1199_vm4, %v1182_v62, %v1198_v44  ;;  %v1215_v1 = vsel %vm1199_vm4, %v1198_v44, %v1182_v62  ;;  %v1196_v12 = vpop.permute.xlu0 %1195 }
 0x195   : > { %v1241_v19 = vmul.f32 %v5633_v54, %v1207_v52  ;;  %v1242_v20 = vmul.f32 %v5615_v33, %v1215_v1  ;;  %v1206_v21 = vsel %vm1199_vm4, %v1180_v2, %v1196_v12  ;;  %v1214_v25 = vsel %vm1199_vm4, %v1196_v12, %v1180_v2 }
 0x196   : > { %v1239_v27 = vmul.f32 %v5633_v54, %v1206_v21  ;;  %v1240_v30 = vmul.f32 %v5615_v33, %v1214_v25  ;;  %3933 = vmatpush1.bf16.msra.mxu0 %v3932_v60 }
 0x197   : > { %v1246_v32 = vpop.permute.xlu1 %1245 }
 0x198   : > { %v3936_v36 = vpack.c.bf16 %v1241_v19, %v1239_v27  ;;  %v1244_v18 = vpop.permute.xlu0 %1243  ;;  %v3934_v37 = vpack.c.bf16 %v1242_v20, %v1240_v30 }
 0x19a   : > { %3935 = vmatprep.subr.bf16.mxu0 %v3934_v37 }
 0x19b   : > { %3937 = vmatpush1.bf16.msra.mxu0 %v3936_v36  ;;  %v1262_v45 = vpop.permute.xlu1 %1261 }
 0x19c   : > { %v1277_v48 = vsel %vm1275_vm5, %v1246_v32, %v1262_v45  ;;  %v1285_v49 = vsel %vm1275_vm5, %v1262_v45, %v1246_v32  ;;  %v1260_v55 = vpop.permute.xlu0 %1259 }
 0x19d   : > { %v1305_v57 = vmul.f32 %v5704_v26, %v1277_v48  ;;  %v1306_v59 = vmul.f32 %v5707_v43, %v1285_v49  ;;  %v1276_v61 = vsel %vm1275_vm5, %v1244_v18, %v1260_v55  ;;  %v1284_v62 = vsel %vm1275_vm5, %v1260_v55, %v1244_v18 }
 0x19e   : > { %v1303_v63 = vmul.f32 %v5704_v26, %v1276_v61  ;;  %v1304_v0 = vmul.f32 %v5707_v43, %v1284_v62 }
 0x19f   : > { %v1250_v2 = vpop.permute.xlu1 %1249 }
 0x1a0   : > { %v3940_v4 = vpack.c.bf16 %v1305_v57, %v1303_v63  ;;  %v1248_v8 = vpop.permute.xlu0 %1247  ;;  %v3938_v9 = vpack.c.bf16 %v1306_v59, %v1304_v0 }
 0x1a2   : > { %3939 = vmatprep.subr.bf16.mxu0 %v3938_v9 }
 0x1a3   : > { %3941 = vmatpush1.bf16.msra.mxu0 %v3940_v4  ;;  %v1266_v44 = vpop.permute.xlu1 %1265 }
 0x1a4   : > { %v1279_v60 = vsel %vm1275_vm5, %v1250_v2, %v1266_v44  ;;  %v1287_v52 = vsel %vm1275_vm5, %v1266_v44, %v1250_v2  ;;  %v1264_v1 = vpop.permute.xlu0 %1263 }
 0x1a5   : > { %v1309_v12 = vmul.f32 %v5704_v26, %v1279_v60  ;;  %v1310_v19 = vmul.f32 %v5707_v43, %v1287_v52  ;;  %v1278_v20 = vsel %vm1275_vm5, %v1248_v8, %v1264_v1  ;;  %v1286_v21 = vsel %vm1275_vm5, %v1264_v1, %v1248_v8 }
 0x1a6   : > { %v1307_v25 = vmul.f32 %v5704_v26, %v1278_v20  ;;  %v1308_v27 = vmul.f32 %v5707_v43, %v1286_v21 }
 0x1a7   : > { %v1254_v30 = vpop.permute.xlu1 %1253 }
 0x1a8   : > { %v3944_v31 = vpack.c.bf16 %v1309_v12, %v1307_v25  ;;  %v1252_v32 = vpop.permute.xlu0 %1251  ;;  %v3942_v36 = vpack.c.bf16 %v1310_v19, %v1308_v27  ;;  %v516_v25 = vld [vmem:[#allocation5 + $0x7] ss:$8 sm:$0x3] }
 0x1aa   : > { %3943 = vmatprep.subr.bf16.mxu0 %v3942_v36  ;;  %v5759_v36 = vrot.slane %v516_v25, %v5206_v53 }
 0x1ab   : > { %3945 = vmatpush1.bf16.msra.mxu0 %v3944_v31  ;;  %v1270_v18 = vpop.permute.xlu1 %1269 }
 0x1ac   : > { %v1281_v37 = vsel %vm1275_vm5, %v1254_v30, %v1270_v18  ;;  %v1289_v45 = vsel %vm1275_vm5, %v1270_v18, %v1254_v30  ;;  %v1268_v48 = vpop.permute.xlu0 %1267  ;;  %8353 = vst [vmem:[#allocation28_spill] sm:$0xff] %v5759_v36  ;;  %v5762_v18 = vrot.slane %v516_v25, %v5202_v51 }
 0x1ad   : > { %v1313_v49 = vmul.f32 %v5704_v26, %v1281_v37  ;;  %v1314_v55 = vmul.f32 %v5707_v43, %v1289_v45  ;;  %v1280_v57 = vsel %vm1275_vm5, %v1252_v32, %v1268_v48  ;;  %v1288_v59 = vsel %vm1275_vm5, %v1268_v48, %v1252_v32 }
 0x1ae   : > { %v1311_v61 = vmul.f32 %v5704_v26, %v1280_v57  ;;  %v1312_v62 = vmul.f32 %v5707_v43, %v1288_v59  ;;  %8354 = vst [vmem:[#allocation29_spill] sm:$0xff] %v5762_v18 }
 0x1af   : > { %v1258_v63 = vpop.permute.xlu1 %1257 }
 0x1b0   : > { %v3948_v0 = vpack.c.bf16 %v1313_v49, %v1311_v61  ;;  %v1256_v2 = vpop.permute.xlu0 %1255  ;;  %v3946_v4 = vpack.c.bf16 %v1314_v55, %v1312_v62 }
 0x1b2   : > { %3947 = vmatprep.subr.bf16.mxu0 %v3946_v4 }
 0x1b3   : > { %3949 = vmatpush1.bf16.msra.mxu0 %v3948_v0  ;;  %v1274_v8 = vpop.permute.xlu1 %1273 }
 0x1b4   : > { %v1283_v9 = vsel %vm1275_vm5, %v1258_v63, %v1274_v8  ;;  %v1291_v44 = vsel %vm1275_vm5, %v1274_v8, %v1258_v63  ;;  %v1272_v60 = vpop.permute.xlu0 %1271 }
 0x1b5   : > { %v1317_v52 = vmul.f32 %v5704_v26, %v1283_v9  ;;  %v1318_v1 = vmul.f32 %v5707_v43, %v1291_v44  ;;  %v1282_v12 = vsel %vm1275_vm5, %v1256_v2, %v1272_v60  ;;  %v1290_v19 = vsel %vm1275_vm5, %v1272_v60, %v1256_v2 }
 0x1b6   : > { %v1315_v20 = vmul.f32 %v5704_v26, %v1282_v12  ;;  %v1316_v21 = vmul.f32 %v5707_v43, %v1290_v19 }
 0x1b7   : > { %v1322_v27 = vpop.permute.xlu1 %1321 }
 0x1b8   : > { %v3952_v30 = vpack.c.bf16 %v1317_v52, %v1315_v20  ;;  %v1320_v31 = vpop.permute.xlu0 %1319  ;;  %v3950_v32 = vpack.c.bf16 %v1318_v1, %v1316_v21 }
 0x1ba   : > { %3951 = vmatprep.subr.bf16.mxu0 %v3950_v32 }
 0x1bb   : > { %3953 = vmatpush1.bf16.msra.mxu0 %v3952_v30  ;;  %v1338_v37 = vpop.permute.xlu1 %1337 }
 0x1bc   : > { %v1353_v45 = vsel %vm1351_vm6, %v1322_v27, %v1338_v37  ;;  %v1361_v48 = vsel %vm1351_vm6, %v1338_v37, %v1322_v27  ;;  %v1336_v49 = vpop.permute.xlu0 %1335 }
 0x1bd   : > { %v1381_v55 = vmul.f32 %v5759_v36, %v1353_v45  ;;  %v1382_v57 = vmul.f32 %v5762_v18, %v1361_v48  ;;  %v1352_v59 = vsel %vm1351_vm6, %v1320_v31, %v1336_v49  ;;  %v1360_v61 = vsel %vm1351_vm6, %v1336_v49, %v1320_v31 }
 0x1be   : > { %v1379_v62 = vmul.f32 %v5759_v36, %v1352_v59  ;;  %v1380_v63 = vmul.f32 %v5762_v18, %v1360_v61 }
 0x1bf   : > { %v1326_v0 = vpop.permute.xlu1 %1325 }
 0x1c0   : > { %v3956_v2 = vpack.c.bf16 %v1381_v55, %v1379_v62  ;;  %v1324_v4 = vpop.permute.xlu0 %1323  ;;  %v3954_v8 = vpack.c.bf16 %v1382_v57, %v1380_v63 }
 0x1c2   : > { %3955 = vmatprep.subr.bf16.mxu0 %v3954_v8 }
 0x1c3   : > { %3957 = vmatpush1.bf16.msra.mxu0 %v3956_v2  ;;  %v1342_v9 = vpop.permute.xlu1 %1341 }
 0x1c4   : > { %v1355_v44 = vsel %vm1351_vm6, %v1326_v0, %v1342_v9  ;;  %v1363_v60 = vsel %vm1351_vm6, %v1342_v9, %v1326_v0  ;;  %v1340_v52 = vpop.permute.xlu0 %1339 }
 0x1c5   : > { %v1385_v1 = vmul.f32 %v5759_v36, %v1355_v44  ;;  %v1386_v12 = vmul.f32 %v5762_v18, %v1363_v60  ;;  %v1354_v19 = vsel %vm1351_vm6, %v1324_v4, %v1340_v52  ;;  %v1362_v20 = vsel %vm1351_vm6, %v1340_v52, %v1324_v4 }
 0x1c6   : > { %v1383_v21 = vmul.f32 %v5759_v36, %v1354_v19  ;;  %v1384_v25 = vmul.f32 %v5762_v18, %v1362_v20 }
 0x1c7   : > { %v1330_v27 = vpop.permute.xlu1 %1329 }
 0x1c8   : > { %v3960_v30 = vpack.c.bf16 %v1385_v1, %v1383_v21  ;;  %v1328_v31 = vpop.permute.xlu0 %1327  ;;  %v3958_v32 = vpack.c.bf16 %v1386_v12, %v1384_v25 }
 0x1ca   : > { %3959 = vmatprep.subr.bf16.mxu0 %v3958_v32 }
 0x1cb   : > { %3961 = vmatpush1.bf16.msra.mxu0 %v3960_v30  ;;  %v1346_v37 = vpop.permute.xlu1 %1345 }
 0x1cc   : > { %v1357_v45 = vsel %vm1351_vm6, %v1330_v27, %v1346_v37  ;;  %v1365_v48 = vsel %vm1351_vm6, %v1346_v37, %v1330_v27  ;;  %v1344_v49 = vpop.permute.xlu0 %1343  ;;  %v518_v27 = vld [vmem:[#allocation5 + $0x10] ss:$8 sm:$0x3] }
 0x1cd   : > { %v1389_v55 = vmul.f32 %v5759_v36, %v1357_v45  ;;  %v1390_v57 = vmul.f32 %v5762_v18, %v1365_v48  ;;  %v1356_v59 = vsel %vm1351_vm6, %v1328_v31, %v1344_v49  ;;  %v1364_v61 = vsel %vm1351_vm6, %v1344_v49, %v1328_v31 }
 0x1ce   : > { %v1387_v62 = vmul.f32 %v5759_v36, %v1356_v59  ;;  %v1388_v63 = vmul.f32 %v5762_v18, %v1364_v61  ;;  %v5814_v45 = vrot.slane %v518_v27, %v5206_v53  ;;  %v5817_v48 = vrot.slane %v518_v27, %v5202_v51 }
 0x1cf   : > { %v1334_v0 = vpop.permute.xlu1 %1333 }
 0x1d0   : > { %v3964_v2 = vpack.c.bf16 %v1389_v55, %v1387_v62  ;;  %v1332_v4 = vpop.permute.xlu0 %1331  ;;  %v3962_v8 = vpack.c.bf16 %v1390_v57, %v1388_v63  ;;  %8355 = vst [vmem:[#allocation30_spill] sm:$0xff] %v5814_v45  ;;  %8356 = vst [vmem:[#allocation31_spill] sm:$0xff] %v5817_v48  ;;  %v556_v55 = vld [vmem:[%s8167_s7 + $0x10] sm:$0xff]  ;;  %v562_v62 = vld [vmem:[%s8167_s7 + $0x40] sm:$0xff] }
 0x1d2   : > { %3963 = vmatprep.subr.bf16.mxu0 %v3962_v8 }
 0x1d3   : > { %3965 = vmatpush1.bf16.msra.mxu0 %v3964_v2  ;;  %v1350_v9 = vpop.permute.xlu1 %1349 }
 0x1d4   : > { %v1359_v44 = vsel %vm1351_vm6, %v1334_v0, %v1350_v9  ;;  %v1367_v60 = vsel %vm1351_vm6, %v1350_v9, %v1334_v0  ;;  %v1348_v52 = vpop.permute.xlu0 %1347 }
 0x1d5   : > { %v1393_v1 = vmul.f32 %v5759_v36, %v1359_v44  ;;  %v1394_v12 = vmul.f32 %v5762_v18, %v1367_v60  ;;  %v1358_v19 = vsel %vm1351_vm6, %v1332_v4, %v1348_v52  ;;  %v1366_v20 = vsel %vm1351_vm6, %v1348_v52, %v1332_v4  ;;  %v561_v60 = vld [vmem:[%s8167_s7 + $0x38] sm:$0xff] }
 0x1d6   : > { %v1391_v21 = vmul.f32 %v5759_v36, %v1358_v19  ;;  %v1392_v25 = vmul.f32 %v5762_v18, %v1366_v20  ;;  %v567_v19 = vld [vmem:[%s8167_s7 + $0x68] sm:$0xff] }
 0x1d7   : > { %v1398_v30 = vpop.permute.xlu1 %1397 }
 0x1d8   : > { %v3968_v31 = vpack.c.bf16 %v1393_v1, %v1391_v21  ;;  %v1396_v32 = vpop.permute.xlu0 %1395  ;;  %v3966_v37 = vpack.c.bf16 %v1394_v12, %v1392_v25  ;;  %v566_v21 = vld [vmem:[%s8167_s7 + $0x60] sm:$0xff] }
 0x1da   : > { %3967 = vmatprep.subr.bf16.mxu0 %v3966_v37 }
 0x1db   : > { %3969 = vmatpush1.bf16.msra.mxu0 %v3968_v31  ;;  %v1414_v49 = vpop.permute.xlu1 %1413  ;;  %v572_v31 = vld [vmem:[%s8167_s7 + $0x90] sm:$0xff] }
 0x1dc   : > { %v1429_v57 = vsel %vm1427_vm7, %v1398_v30, %v1414_v49  ;;  %v1437_v59 = vsel %vm1427_vm7, %v1414_v49, %v1398_v30  ;;  %v1412_v61 = vpop.permute.xlu0 %1411 }
 0x1dd   : > { %v1457_v63 = vmul.f32 %v5814_v45, %v1429_v57  ;;  %v1458_v0 = vmul.f32 %v5817_v48, %v1437_v59  ;;  %v1428_v2 = vsel %vm1427_vm7, %v1396_v32, %v1412_v61  ;;  %v1436_v4 = vsel %vm1427_vm7, %v1412_v61, %v1396_v32 }
 0x1de   : > { %v1455_v8 = vmul.f32 %v5814_v45, %v1428_v2  ;;  %v1456_v9 = vmul.f32 %v5817_v48, %v1436_v4  ;;  %1658 = vmatmul.mubr.f32.vlgmr.msra.gmra.mrb[0].mxu0 %v556_v55 }
 0x1df   : > { %v1402_v44 = vpop.permute.xlu1 %1401  ;;  %1663 = vmatprep.mubr.f32.mxu0 %v562_v62  ;;  %v571_v62 = vld [vmem:[%s8167_s7 + $0x88] sm:$0xff] }
 0x1e0   : > { %v3972_v52 = vpack.c.bf16 %v1457_v63, %v1455_v8  ;;  %v1400_v1 = vpop.permute.xlu0 %1399  ;;  %v3970_v12 = vpack.c.bf16 %v1458_v0, %v1456_v9  ;;  %v8189_v8 = vmov 0.0  }
 0x1e2   : > { %3971 = vmatprep.subr.bf16.mxu0 %v3970_v12  ;;  %1664 = vmatmul.mubr.f32.gmra.mrb[2].mxu0 %v561_v60 }
 0x1e3   : > { %3973 = vmatpush1.bf16.msra.mxu0 %v3972_v52  ;;  %v1418_v20 = vpop.permute.xlu1 %1417  ;;  %1669 = vmatprep.mubr.f32.mxu0 %v567_v19 }
 0x1e4   : > { %v1431_v25 = vsel %vm1427_vm7, %v1402_v44, %v1418_v20  ;;  %v1439_v27 = vsel %vm1427_vm7, %v1418_v20, %v1402_v44  ;;  %v1416_v30 = vpop.permute.xlu0 %1415 }
 0x1e5   : > { %v1461_v32 = vmul.f32 %v5814_v45, %v1431_v25  ;;  %v1462_v37 = vmul.f32 %v5817_v48, %v1439_v27  ;;  %v1430_v49 = vsel %vm1427_vm7, %v1400_v1, %v1416_v30  ;;  %v1438_v55 = vsel %vm1427_vm7, %v1416_v30, %v1400_v1 }
 0x1e6   : > { %v1459_v57 = vmul.f32 %v5814_v45, %v1430_v49  ;;  %v1460_v59 = vmul.f32 %v5817_v48, %v1438_v55  ;;  %1670 = vmatmul.mubr.f32.gmra.mrb[4].mxu0 %v566_v21 }
 0x1e7   : > { %v1406_v61 = vpop.permute.xlu1 %1405  ;;  %1675 = vmatprep.mubr.f32.mxu0 %v572_v31 }
 0x1e8   : > { %v3976_v63 = vpack.c.bf16 %v1461_v32, %v1459_v57  ;;  %v1404_v0 = vpop.permute.xlu0 %1403  ;;  %v3974_v2 = vpack.c.bf16 %v1462_v37, %v1460_v59 }
 0x1ea   : > { %3975 = vmatprep.subr.bf16.mxu0 %v3974_v2  ;;  %1676 = vmatmul.mubr.f32.gmra.mrb[6].mxu0 %v571_v62 }
 0x1eb   : > { %3977 = vmatpush1.bf16.msra.mxu0 %v3976_v63  ;;  %v1422_v4 = vpop.permute.xlu1 %1421  ;;  %1746 = vmatprep.mubr.f32.mxu0 %v8189_v8 }
 0x1ec   : > { %v1433_v9 = vsel %vm1427_vm7, %v1406_v61, %v1422_v4  ;;  %v1441_v44 = vsel %vm1427_vm7, %v1422_v4, %v1406_v61  ;;  %v1420_v60 = vpop.permute.xlu0 %1419 }
 0x1ed   : > { %v1465_v52 = vmul.f32 %v5814_v45, %v1433_v9  ;;  %v1466_v1 = vmul.f32 %v5817_v48, %v1441_v44  ;;  %v1432_v12 = vsel %vm1427_vm7, %v1404_v0, %v1420_v60  ;;  %v1440_v19 = vsel %vm1427_vm7, %v1420_v60, %v1404_v0  ;;  %v558_v9 = vld [vmem:[%s8167_s7 + $0x20] sm:$0xff]  ;;  %v563_v44 = vld [vmem:[%s8167_s7 + $0x48] sm:$0xff]  ;;  %v568_v60 = vld [vmem:[%s8167_s7 + $0x70] sm:$0xff] }
 0x1ee   : > { %v1463_v20 = vmul.f32 %v5814_v45, %v1432_v12  ;;  %v1464_v21 = vmul.f32 %v5817_v48, %v1440_v19 }
 0x1ef   : > { %v1410_v25 = vpop.permute.xlu1 %1409 }
 0x1f0   : > { %v3980_v27 = vpack.c.bf16 %v1465_v52, %v1463_v20  ;;  %v1408_v30 = vpop.permute.xlu0 %1407  ;;  %v3978_v31 = vpack.c.bf16 %v1466_v1, %v1464_v21  ;;  %v573_v52 = vld [vmem:[%s8167_s7 + $0x98] sm:$0xff] }
 0x1f2   : > { %3979 = vmatprep.subr.bf16.mxu0 %v3978_v31 }
 0x1f3   : > { %3981 = vmatpush1.bf16.msra.mxu0 %v3980_v27  ;;  %v1426_v32 = vpop.permute.xlu1 %1425 }
 0x1f4   : > { %v1435_v37 = vsel %vm1427_vm7, %v1410_v25, %v1426_v32  ;;  %v1443_v49 = vsel %vm1427_vm7, %v1426_v32, %v1410_v25  ;;  %v1424_v55 = vpop.permute.xlu0 %1423 }
 0x1f5   : > { %v1469_v57 = vmul.f32 %v5814_v45, %v1435_v37  ;;  %v1470_v59 = vmul.f32 %v5817_v48, %v1443_v49  ;;  %v1434_v61 = vsel %vm1427_vm7, %v1408_v30, %v1424_v55  ;;  %v1442_v62 = vsel %vm1427_vm7, %v1424_v55, %v1408_v30 }
 0x1f6   : > { %v1467_v63 = vmul.f32 %v5814_v45, %v1434_v61  ;;  %v1468_v0 = vmul.f32 %v5817_v48, %v1442_v62 }
 0x1f8   : > { %v3984_v2 = vpack.c.bf16 %v1469_v57, %v1467_v63  ;;  %v3982_v4 = vpack.c.bf16 %v1470_v59, %v1468_v0 }
 0x1fa   : > { %3983 = vmatprep.subr.bf16.mxu0 %v3982_v4 }
 0x1fb   : > { %3985 = vmatpush1.bf16.msra.mxu0 %v3984_v2 }
 0x1fe   : > { %3778 = vmatmul.mubr.msk.f32.vlgmr.msra.gmra.mrb[0].mxu0 %vm1491_vm8, %v558_v9 }
 0x1ff   : > { %1752 = vmatprep.mubr.f32.mxu0 %v8189_v8 }
 0x202   : > { %3779 = vmatmul.mubr.msk.f32.gmra.mrb[2].mxu0 %vm1491_vm8, %v563_v44 }
 0x203   : > { %1758 = vmatprep.mubr.f32.mxu0 %v8189_v8 }
 0x206   : > { %3780 = vmatmul.mubr.msk.f32.gmra.mrb[4].mxu0 %vm1491_vm8, %v568_v60 }
 0x207   : > { %1764 = vmatprep.mubr.f32.mxu0 %v8189_v8  ;;  %v5908_v1 = vpop.permute.xlu0 %1473 }
 0x208   : > { %8357 = vst [vmem:[#allocation32_spill] sm:$0xff] %v5908_v1  ;;  %v5912_v27 = vpop.permute.xlu1 %1478 }
 0x209   : > { %8358 = vst [vmem:[#allocation33_spill] sm:$0xff] %v5912_v27 }
 0x20a   : > { %3781 = vmatmul.mubr.msk.f32.gmra.mrb[6].mxu0 %vm1491_vm8, %v573_v52 }
 0x20b   : > { %v5936_v60 = vpop.permute.xlu0 %1488 }
 0x20c   : > { %v5925_v0 = vpop.permute.xlu1 %1483  ;;  %8360 = vst [vmem:[#allocation35_spill] sm:$0xff] %v5936_v60 }
 0x20d   : > { %8359 = vst [vmem:[#allocation34_spill] sm:$0xff] %v5925_v0 }
 0x2d1   : > { %v1748_v12 = vpop.f32.mrb[0].mxu0 }
 0x2d2   : > { %v4210_v19 = vadd.f32 %v1748_v12, %v5908_v1  ;;  %v1750_v20 = vpop.f32.mrb[1].mxu0 }
 0x2d3   : > { %v4211_v21 = vadd.f32 %v1750_v20, %v5908_v1 }
 0x2d4   : > { %v1771_v25 = vmax.f32 %v4210_v19, 0.0 }
 0x2d5   : > { %v1754_v30 = vpop.f32.mrb[2].mxu0  ;;  %v1772_v37 = vmax.f32 %v4211_v21, 0.0 }
 0x2d6   : > { %v4212_v31 = vadd.f32 %v1754_v30, %v5912_v27  ;;  %v1756_v32 = vpop.f32.mrb[3].mxu0  ;;  %1779 = vrot.lane.b32.xlu1 %v1771_v25, %s8197_s30  ;;  %v5920_v62 = vmul.f32 %v1771_v25, %v5547_v24 }
 0x2d7   : > { %v4213_v49 = vadd.f32 %v1756_v32, %v5912_v27  ;;  %v5928_v2 = vmul.f32 %v1772_v37, %v5540_v15 }
 0x2d8   : > { %v1773_v55 = vmax.f32 %v4212_v31, 0.0 }
 0x2d9   : > { %v1774_v57 = vmax.f32 %v4213_v49, 0.0  ;;  %v1760_v59 = vpop.f32.mrb[4].mxu0 }
 0x2da   : > { %v1762_v61 = vpop.f32.mrb[5].mxu0  ;;  %1781 = vrot.lane.b32.xlu0 %v1773_v55, %s8197_s30  ;;  %1795 = vrot.lane.b32.xlu1 %v1771_v25, %s8195_s27  ;;  %v5923_v63 = vmul.f32 %v1773_v55, %v5547_v24  ;;  %v4214_v9 = vadd.f32 %v1760_v59, %v5925_v0 }
 0x2db   : > { %v5931_v4 = vmul.f32 %v1774_v57, %v5540_v15  ;;  %v4215_v52 = vadd.f32 %v1762_v61, %v5925_v0 }
 0x2dc   : > { %v4004_v44 = vpack.c.bf16 %v5923_v63, %v5920_v62  ;;  %v1775_v31 = vmax.f32 %v4214_v9, 0.0  ;;  %v579_v9 = vld [vmem:[#allocation7 + $0x8] sm:$0xff] }
 0x2dd   : > { %v1766_v12 = vpop.f32.mrb[6].mxu0  ;;  %v4002_v19 = vpack.c.bf16 %v5931_v4, %v5928_v2  ;;  %v1776_v49 = vmax.f32 %v4215_v52, 0.0  ;;  %3782 = vmatprep.mubr.msk.f32.mxu1 %vm1951_vm9, %v579_v9  ;;  %3810 = vmatprep.mubr.msk.f32.mxu0 %vm1951_vm9, %v579_v9 }
 0x2de   : > { %v4216_v20 = vadd.f32 %v1766_v12, %v5936_v60  ;;  %v1768_v21 = vpop.f32.mrb[7].mxu0  ;;  %1797 = vrot.lane.b32.xlu0 %v1773_v55, %s8195_s27  ;;  %1811 = vrot.lane.b32.xlu1 %v1771_v25, %s8193_s13 }
 0x2df   : > { %v4217_v30 = vadd.f32 %v1768_v21, %v5936_v60  ;;  %v621_v21 = vadd.f32 %v5036_v10, %v5040_v11 }
 0x2e0   : > { %v1777_v32 = vmax.f32 %v4216_v20, 0.0  ;;  %v8365_v20 = vmov 0 }
 0x2e1   : > { %v1778_v59 = vmax.f32 %v4217_v30, 0.0 }
 0x2e2   : > { %v5945_v8 = vpack.c.bf16 %v1777_v32, %v1775_v31  ;;  %1813 = vrot.lane.b32.xlu0 %v1773_v55, %s8193_s13  ;;  %1827 = vrot.lane.b32.xlu1 %v1771_v25, %s8191_s29 }
 0x2e3   : > { %v5949_v61 = vpack.c.bf16 %v1778_v59, %v1776_v49 }
 0x2e6   : > { %1829 = vrot.lane.b32.xlu0 %v1773_v55, %s8191_s29  ;;  %1847 = vrot.lane.b32.xlu1 %v1771_v25, %s8361_s22 }
 0x2ea   : > { %1849 = vrot.lane.b32.xlu0 %v1773_v55, %s8361_s22  ;;  %1863 = vrot.lane.b32.xlu1 %v1771_v25, %s8362_s11 }
 0x2ee   : > { %1865 = vrot.lane.b32.xlu0 %v1773_v55, %s8362_s11  ;;  %1879 = vrot.lane.b32.xlu1 %v1771_v25, %s8363_s12 }
 0x2f2   : > { %1881 = vrot.lane.b32.xlu0 %v1773_v55, %s8363_s12  ;;  %1783 = vrot.lane.b32.xlu1 %v1772_v37, %s8197_s30 }
 0x2f6   : > { %1785 = vrot.lane.b32.xlu0 %v1774_v57, %s8197_s30  ;;  %1799 = vrot.lane.b32.xlu1 %v1772_v37, %s8195_s27 }
 0x2fa   : > { %1801 = vrot.lane.b32.xlu0 %v1774_v57, %s8195_s27  ;;  %1815 = vrot.lane.b32.xlu1 %v1772_v37, %s8193_s13  ;;  %s8487_s27 = sshll.u32 %s4999_s17, 7 }
 0x2fb   : > { %s8064_s14 = scalar_lea.vmem [#allocation8], %s8487_s27 }
 0x2fe   : > { %1817 = vrot.lane.b32.xlu0 %v1774_v57, %s8193_s13  ;;  %1831 = vrot.lane.b32.xlu1 %v1772_v37, %s8191_s29 }
 0x302   : > { %1833 = vrot.lane.b32.xlu0 %v1774_v57, %s8191_s29  ;;  %1895 = vrot.lane.b32.xlu1 %v1771_v25, %s8364_s26  ;;  %v520_v25 = vld [vmem:[#allocation5 + $0x11] ss:$8 sm:$0x3] }
 0x303   : > { %vm521_vm10 = vcmp.gt.f32.partialorder %v520_v25, 0.5 }
 0x306   : > { %1897 = vrot.lane.b32.xlu0 %v1773_v55, %s8364_s26  ;;  %1851 = vrot.lane.b32.xlu1 %v1772_v37, %s8361_s22  ;;  %v650_v55 = vsel %vm521_vm10, 1, %v4754_v38  ;;  %v624_v38 = vadd.f32 %v5064_v23, %v5052_v17 }
 0x307   : > { %v654_v52 = vrot.slane %v650_v55, %v5206_v53  ;;  %v658_v12 = vrot.slane %v650_v55, %v5202_v51 }
 0x309   : > { %vm5981_vm11 = vcmp.eq.s32.totalorder %v654_v52, 1  ;;  %vm5985_vm12 = vcmp.eq.s32.totalorder %v658_v12, 1 }
 0x30a   : > { %1853 = vrot.lane.b32.xlu0 %v1774_v57, %s8361_s22  ;;  %1867 = vrot.lane.b32.xlu1 %v1772_v37, %s8362_s11  ;;  %v8366_v20 = vsel %vm5981_vm11, 4294967295, %v8365_v20  ;;  %v661_v53 = vsel %vm5981_vm11, %v5030_v7, -3.4028235e+38  ;;  %v662_v51 = vsel %vm5985_vm12, %v5025_v3, -3.4028235e+38 }
 0x30b   : > { %8367 = vst [vmem:[#allocation36_spill] sm:$0xff] %v8366_v20  ;;  %v677_v30 = vmax.f32 %v661_v53, %v662_v51  ;;  %v663_v31 = vsel %vm5981_vm11, %v5040_v11, -3.4028235e+38  ;;  %v664_v32 = vsel %vm5985_vm12, %v5036_v10, -3.4028235e+38  ;;  %v630_v10 = vadd.f32 %v5088_v35, %v5076_v29 }
 0x30c   : > { %v665_v49 = vsel %vm5981_vm11, %v5052_v17, -3.4028235e+38  ;;  %v666_v59 = vsel %vm5985_vm12, %v5064_v23, -3.4028235e+38  ;;  %v667_v9 = vsel %vm5981_vm11, %v5048_v16, -3.4028235e+38  ;;  %v633_v23 = vadd.f32 %v5084_v34, %v5072_v28 }
 0x30d   : > { %v683_v11 = vmax.f32 %v665_v49, %v666_v59  ;;  %v668_v25 = vsel %vm5985_vm12, %v5060_v22, -3.4028235e+38  ;;  %v669_v55 = vsel %vm5981_vm11, %v5076_v29, -3.4028235e+38  ;;  %v670_v52 = vsel %vm5985_vm12, %v5088_v35, -3.4028235e+38 }
 0x30e   : > { %1869 = vrot.lane.b32.xlu0 %v1774_v57, %s8362_s11  ;;  %1883 = vrot.lane.b32.xlu1 %v1772_v37, %s8363_s12  ;;  %v686_v17 = vmax.f32 %v667_v9, %v668_v25  ;;  %v671_v12 = vsel %vm5981_vm11, %v5072_v28, -3.4028235e+38  ;;  %v639_v35 = vadd.f32 %v5108_v46, %v5096_v40  ;;  %v673_v53 = vsel %vm5981_vm11, %v5100_v41, -3.4028235e+38 }
 0x30f   : > { %v674_v51 = vsel %vm5985_vm12, %v5112_v47, -3.4028235e+38  ;;  %v675_v28 = vsel %vm5981_vm11, %v5096_v40, -3.4028235e+38 }
 0x312   : > { %1885 = vrot.lane.b32.xlu0 %v1774_v57, %s8363_s12  ;;  %1899 = vrot.lane.b32.xlu1 %v1772_v37, %s8364_s26  ;;  %v8368_v37 = vmov 0 }
 0x313   : > { %v8369_v37 = vsel %vm5985_vm12, 4294967295, %v8368_v37 }
 0x314   : > { %8370 = vst [vmem:[#allocation37_spill] sm:$0xff] %v8369_v37 }
 0x316   : > { %1901 = vrot.lane.b32.xlu0 %v1774_v57, %s8364_s26  ;;  %v618_v57 = vadd.f32 %v5025_v3, %v5030_v7  ;;  %v680_v7 = vmax.f32 %v663_v31, %v664_v32  ;;  %v627_v3 = vadd.f32 %v5060_v22, %v5048_v16  ;;  %v689_v16 = vmax.f32 %v669_v55, %v670_v52 }
 0x317   : > { %v636_v22 = vadd.f32 %v5112_v47, %v5100_v41  ;;  %v695_v31 = vmax.f32 %v673_v53, %v674_v51 }
 0x335   : > { %622 = vadd.xlane.f32.xlu0 %v621_v21  ;;  %v672_v21 = vsel %vm5985_vm12, %v5084_v34, -3.4028235e+38  ;;  %v676_v34 = vsel %vm5985_vm12, %v5108_v46, -3.4028235e+38 }
 0x336   : > { %619 = vadd.xlane.f32.xlu1 %v618_v57  ;;  %v692_v29 = vmax.f32 %v671_v12, %v672_v21  ;;  %v698_v32 = vmax.f32 %v675_v28, %v676_v34 }
 0x339   : > { %625 = vadd.xlane.f32.xlu0 %v624_v38 }
 0x33a   : > { %678 = vmax.xlane.f32.xlu1 %v677_v30 }
 0x33d   : > { %681 = vmax.xlane.f32.xlu0 %v680_v7 }
 0x33e   : > { %628 = vadd.xlane.f32.xlu1 %v627_v3 }
 0x341   : > { %684 = vmax.xlane.f32.xlu0 %v683_v11 }
 0x342   : > { %631 = vadd.xlane.f32.xlu1 %v630_v10 }
 0x345   : > { %687 = vmax.xlane.f32.xlu0 %v686_v17 }
 0x346   : > { %634 = vadd.xlane.f32.xlu1 %v633_v23 }
 0x348   : > { %v1780_v57 = vpop.permute.xlu1 %1779 }
 0x349   : > { %690 = vmax.xlane.f32.xlu0 %v689_v16 }
 0x34a   : > { %637 = vadd.xlane.f32.xlu1 %v636_v22 }
 0x34c   : > { %v1782_v38 = vpop.permute.xlu0 %1781  ;;  %v1796_v30 = vpop.permute.xlu1 %1795 }
 0x34d   : > { %693 = vmax.xlane.f32.xlu0 %v692_v29 }
 0x34e   : > { %640 = vadd.xlane.f32.xlu1 %v639_v35 }
 0x350   : > { %v1798_v7 = vpop.permute.xlu0 %1797  ;;  %v1812_v41 = vpop.permute.xlu1 %1811 }
 0x351   : > { %696 = vmax.xlane.f32.xlu0 %v695_v31 }
 0x352   : > { %699 = vmax.xlane.f32.xlu1 %v698_v32 }
 0x354   : > { %v1814_v3 = vpop.permute.xlu0 %1813  ;;  %v1828_v47 = vpop.permute.xlu1 %1827 }
 0x358   : > { %v1830_v49 = vpop.permute.xlu0 %1829  ;;  %v6053_v59 = vpop.permute.xlu1 %1847 }
 0x35c   : > { %v6055_v40 = vpop.permute.xlu0 %1849  ;;  %v6057_v11 = vpop.permute.xlu1 %1863 }
 0x360   : > { %v6059_v46 = vpop.permute.xlu0 %1865  ;;  %v6061_v10 = vpop.permute.xlu1 %1879 }
 0x364   : > { %v6063_v9 = vpop.permute.xlu0 %1881  ;;  %v1784_v25 = vpop.permute.xlu1 %1783 }
 0x365   : > { %v1789_v17 = vsel %vm868_vm0, %v1784_v25, %v1780_v57  ;;  %v1787_v23 = vsel %vm868_vm0, %v1780_v57, %v1784_v25 }
 0x366   : > { %v1792_v12 = vmul.f32 %v1787_v23, %v5212_v56  ;;  %v1791_v29 = vmul.f32 %v1789_v17, %v5219_v58 }
 0x368   : > { %v1786_v55 = vpop.permute.xlu0 %1785  ;;  %v1800_v52 = vpop.permute.xlu1 %1799 }
 0x369   : > { %v1790_v16 = vsel %vm868_vm0, %v1786_v55, %v1782_v38  ;;  %v1788_v22 = vsel %vm868_vm0, %v1782_v38, %v1786_v55  ;;  %v1803_v53 = vsel %vm944_vm1, %v1796_v30, %v1800_v52  ;;  %v1805_v57 = vsel %vm944_vm1, %v1800_v52, %v1796_v30 }
 0x36a   : > { %v1794_v21 = vmul.f32 %v1788_v22, %v5212_v56  ;;  %v1793_v35 = vmul.f32 %v1790_v16, %v5219_v58  ;;  %v1807_v25 = vmul.f32 %v1805_v57, %v5302_v13  ;;  %v1808_v17 = vmul.f32 %v1803_v53, %v5305_v14 }
 0x36c   : > { %v1802_v51 = vpop.permute.xlu0 %1801  ;;  %v1816_v28 = vpop.permute.xlu1 %1815  ;;  %v3986_v34 = vpack.c.bf16 %v1794_v21, %v1792_v12  ;;  %v3988_v31 = vpack.c.bf16 %v1793_v35, %v1791_v29 }
 0x36d   : > { %v1804_v38 = vsel %vm944_vm1, %v1798_v7, %v1802_v51  ;;  %v1806_v32 = vsel %vm944_vm1, %v1802_v51, %v1798_v7  ;;  %v1819_v30 = vsel %vm1020_vm2, %v1812_v41, %v1816_v28  ;;  %v1821_v52 = vsel %vm1020_vm2, %v1816_v28, %v1812_v41 }
 0x36e   : > { %v1809_v23 = vmul.f32 %v1806_v32, %v5302_v13  ;;  %v1810_v55 = vmul.f32 %v1804_v38, %v5305_v14  ;;  %3987 = vmatprep.subr.bf16.mxu1 %v3986_v34  ;;  %v1823_v35 = vmul.f32 %v1821_v52, %v5389_v39  ;;  %v1824_v53 = vmul.f32 %v1819_v30, %v5392_v42 }
 0x36f   : > { %3989 = vmatpush1.bf16.msra.mxu1 %v3988_v31 }
 0x370   : > { %v1818_v16 = vpop.permute.xlu0 %1817  ;;  %v1832_v22 = vpop.permute.xlu1 %1831  ;;  %v3990_v12 = vpack.c.bf16 %v1810_v55, %v1808_v17  ;;  %v3992_v7 = vpack.c.bf16 %v1809_v23, %v1807_v25 }
 0x371   : > { %v1820_v21 = vsel %vm1020_vm2, %v1814_v3, %v1818_v16  ;;  %v1822_v29 = vsel %vm1020_vm2, %v1818_v16, %v1814_v3  ;;  %v1835_v41 = vsel %vm1096_vm3, %v1828_v47, %v1832_v22  ;;  %v1837_v28 = vsel %vm1096_vm3, %v1832_v22, %v1828_v47 }
 0x372   : > { %v1825_v57 = vmul.f32 %v1822_v29, %v5389_v39  ;;  %v1826_v51 = vmul.f32 %v1820_v21, %v5392_v42  ;;  %3991 = vmatprep.subr.bf16.mxu1 %v3990_v12  ;;  %v1839_v17 = vmul.f32 %v1837_v28, %v5476_v5  ;;  %v1840_v23 = vmul.f32 %v1835_v41, %v5479_v6 }
 0x373   : > { %3993 = vmatpush1.bf16.msra.mxu1 %v3992_v7 }
 0x374   : > { %v1834_v34 = vpop.permute.xlu0 %1833  ;;  %v1896_v31 = vpop.permute.xlu1 %1895  ;;  %v3994_v38 = vpack.c.bf16 %v1826_v51, %v1824_v53  ;;  %v3996_v3 = vpack.c.bf16 %v1825_v57, %v1823_v35 }
 0x375   : > { %v1836_v32 = vsel %vm1096_vm3, %v1830_v49, %v1834_v34  ;;  %v1838_v25 = vsel %vm1096_vm3, %v1834_v34, %v1830_v49 }
 0x376   : > { %v1841_v55 = vmul.f32 %v1838_v25, %v5476_v5  ;;  %v1842_v30 = vmul.f32 %v1836_v32, %v5479_v6  ;;  %3995 = vmatprep.subr.bf16.mxu1 %v3994_v38 }
 0x377   : > { %3997 = vmatpush1.bf16.msra.mxu1 %v3996_v3 }
 0x378   : > { %v1898_v47 = vpop.permute.xlu0 %1897  ;;  %v1852_v52 = vpop.permute.xlu1 %1851  ;;  %v3998_v16 = vpack.c.bf16 %v1842_v30, %v1840_v23  ;;  %v4000_v22 = vpack.c.bf16 %v1841_v55, %v1839_v17 }
 0x379   : > { %v1855_v12 = vsel %vm1199_vm4, %v6053_v59, %v1852_v52  ;;  %v1857_v49 = vsel %vm1199_vm4, %v1852_v52, %v6053_v59 }
 0x37a   : > { %3999 = vmatprep.subr.bf16.mxu1 %v3998_v16  ;;  %v1859_v53 = vmul.f32 %v1855_v12, %v5633_v54  ;;  %v1860_v57 = vmul.f32 %v1857_v49, %v5615_v33 }
 0x37b   : > { %4001 = vmatpush1.bf16.msra.mxu1 %v4000_v22 }
 0x37c   : > { %v1854_v7 = vpop.permute.xlu0 %1853  ;;  %4003 = vmatprep.subr.bf16.mxu1 %v4002_v19  ;;  %v1868_v21 = vpop.permute.xlu1 %1867 }
 0x37d   : > { %v1856_v29 = vsel %vm1199_vm4, %v6055_v40, %v1854_v7  ;;  %v1858_v35 = vsel %vm1199_vm4, %v1854_v7, %v6055_v40  ;;  %v1871_v2 = vsel %vm1275_vm5, %v6057_v11, %v1868_v21  ;;  %v1873_v4 = vsel %vm1275_vm5, %v1868_v21, %v6057_v11 }
 0x37e   : > { %v1861_v59 = vmul.f32 %v1856_v29, %v5633_v54  ;;  %v1862_v51 = vmul.f32 %v1858_v35, %v5615_v33  ;;  %v1875_v3 = vmul.f32 %v1871_v2, %v5704_v26  ;;  %v1876_v11 = vmul.f32 %v1873_v4, %v5707_v43  ;;  %v578_v4 = vld [vmem:[#allocation7] sm:$0xff] }
 0x37f   : > { %4005 = vmatpush1.bf16.msra.mxu1 %v4004_v44 }
 0x380   : > { %v1870_v19 = vpop.permute.xlu0 %1869  ;;  %v1884_v40 = vpop.permute.xlu1 %1883  ;;  %v4006_v41 = vpack.c.bf16 %v1862_v51, %v1860_v57  ;;  %v4008_v28 = vpack.c.bf16 %v1861_v59, %v1859_v53 }
 0x381   : > { %v1872_v34 = vsel %vm1275_vm5, %v6059_v46, %v1870_v19  ;;  %v1874_v38 = vsel %vm1275_vm5, %v1870_v19, %v6059_v46  ;;  %v1887_v63 = vsel %vm1351_vm6, %v6061_v10, %v1884_v40  ;;  %v1889_v44 = vsel %vm1351_vm6, %v1884_v40, %v6061_v10  ;;  %v580_v19 = vld [vmem:[#allocation7 + $0x10] sm:$0xff]  ;;  %v583_v40 = vld [vmem:[#allocation7 + $0x28] sm:$0xff] }
 0x382   : > { %v1877_v32 = vmul.f32 %v1872_v34, %v5704_v26  ;;  %v1878_v62 = vmul.f32 %v1874_v38, %v5707_v43  ;;  %4007 = vmatprep.subr.bf16.mxu1 %v4006_v41  ;;  %v1891_v52 = vmul.f32 %v1887_v63, %v5759_v36  ;;  %v1892_v16 = vmul.f32 %v1889_v44, %v5762_v18  ;;  %v582_v41 = vld [vmem:[#allocation7 + $0x20] sm:$0xff]  ;;  %v584_v34 = vld [vmem:[#allocation7 + $0x30] sm:$0xff]  ;;  %v587_v38 = vld [vmem:[#allocation7 + $0x48] sm:$0xff] }
 0x383   : > { %4009 = vmatpush1.bf16.msra.mxu1 %v4008_v28  ;;  %v585_v28 = vld [vmem:[#allocation7 + $0x38] sm:$0xff]  ;;  %v592_v63 = vld [vmem:[#allocation7 + $0x70] sm:$0xff]  ;;  %v4468_v44 = vld [vmem:[%s8167_s7 + $0x8] sm:$0xff] }
 0x384   : > { %v1886_v25 = vpop.permute.xlu0 %1885  ;;  %v1900_v46 = vpop.permute.xlu1 %1899  ;;  %v4010_v17 = vpack.c.bf16 %v1878_v62, %v1876_v11  ;;  %v4012_v23 = vpack.c.bf16 %v1877_v32, %v1875_v3  ;;  %v588_v3 = vld [vmem:[#allocation7 + $0x50] sm:$0xff]  ;;  %v591_v11 = vld [vmem:[#allocation7 + $0x68] sm:$0xff]  ;;  %v590_v32 = vld [vmem:[#allocation7 + $0x60] sm:$0xff] }
 0x385   : > { %v1888_v55 = vsel %vm1351_vm6, %v6063_v9, %v1886_v25  ;;  %v1890_v30 = vsel %vm1351_vm6, %v1886_v25, %v6063_v9  ;;  %v1903_v12 = vsel %vm1427_vm7, %v1896_v31, %v1900_v46  ;;  %v1905_v49 = vsel %vm1427_vm7, %v1900_v46, %v1896_v31  ;;  %v593_v62 = vld [vmem:[#allocation7 + $0x78] sm:$0xff] }
 0x386   : > { %v1893_v22 = vmul.f32 %v1888_v55, %v5759_v36  ;;  %v1894_v10 = vmul.f32 %v1890_v30, %v5762_v18  ;;  %4011 = vmatprep.subr.bf16.mxu1 %v4010_v17  ;;  %v1907_v53 = vmul.f32 %v1903_v12, %v5814_v45  ;;  %v1908_v57 = vmul.f32 %v1905_v49, %v5817_v48 }
 0x387   : > { %4013 = vmatpush1.bf16.msra.mxu1 %v4012_v23 }
 0x388   : > { %v1902_v7 = vpop.permute.xlu0 %1901  ;;  %v4014_v21 = vpack.c.bf16 %v1894_v10, %v1892_v16  ;;  %v4016_v29 = vpack.c.bf16 %v1893_v22, %v1891_v52  ;;  %v523_v52 = vld [vmem:[%s8163_s3 + $0x8] sm:$0xff]  ;;  %v522_v16 = vld [vmem:[%s8163_s3] sm:$0xff] }
 0x389   : > { %v1904_v9 = vsel %vm1427_vm7, %v1898_v47, %v1902_v7  ;;  %v1906_v35 = vsel %vm1427_vm7, %v1902_v7, %v1898_v47  ;;  %v581_v47 = vld [vmem:[#allocation7 + $0x18] sm:$0xff] }
 0x38a   : > { %v1909_v59 = vmul.f32 %v1904_v9, %v5814_v45  ;;  %v1910_v51 = vmul.f32 %v1906_v35, %v5817_v48  ;;  %4015 = vmatprep.subr.bf16.mxu1 %v4014_v21  ;;  %v524_v21 = vld [vmem:[%s8163_s3 + $0x10] sm:$0xff] }
 0x38b   : > { %4017 = vmatpush1.bf16.msra.mxu1 %v4016_v29  ;;  %v539_v29 = vld [vmem:[%s8165_s5 + $0x8] sm:$0xff] }
 0x38c   : > { %v4018_v31 = vpack.c.bf16 %v1910_v51, %v1908_v57  ;;  %v4020_v2 = vpack.c.bf16 %v1909_v59, %v1907_v53  ;;  %v525_v53 = vld [vmem:[%s8163_s3 + $0x18] sm:$0xff] }
 0x38e   : > { %4019 = vmatprep.subr.bf16.mxu1 %v4018_v31 }
 0x38f   : > { %4021 = vmatpush1.bf16.msra.mxu1 %v4020_v2  ;;  %v538_v2 = vld [vmem:[%s8165_s5] sm:$0xff] }
 0x390   : > { %4023 = vmatprep.subr.bf16.mxu1 %v5949_v61  ;;  %v589_v61 = vld [vmem:[#allocation7 + $0x58] sm:$0xff] }
 0x393   : > { %4025 = vmatpush1.bf16.msra.mxu1 %v5945_v8  ;;  %v586_v8 = vld [vmem:[#allocation7 + $0x40] sm:$0xff] }
 0x396   : > { %2041 = vmatmul.mubr.f32.vlgmr.msra.gmra.mrb[0].mxu1 %v578_v4  ;;  %v540_v4 = vld [vmem:[%s8165_s5 + $0x10] sm:$0xff] }
 0x397   : > { %3783 = vmatprep.mubr.msk.f32.mxu1 %vm1951_vm9, %v581_v47 }
 0x39a   : > { %2047 = vmatmul.mubr.f32.gmra.mrb[2].mxu1 %v580_v19 }
 0x39b   : > { %3784 = vmatprep.mubr.msk.f32.mxu1 %vm1951_vm9, %v583_v40  ;;  %v526_v40 = vld [vmem:[%s8163_s3 + $0x20] sm:$0xff] }
 0x39e   : > { %2053 = vmatmul.mubr.f32.gmra.mrb[4].mxu1 %v582_v41 }
 0x39f   : > { %3785 = vmatprep.mubr.msk.f32.mxu1 %vm1951_vm9, %v585_v28  ;;  %v541_v28 = vld [vmem:[%s8165_s5 + $0x18] sm:$0xff] }
 0x3a2   : > { %2059 = vmatmul.mubr.f32.gmra.mrb[6].mxu1 %v584_v34 }
 0x3a3   : > { %3786 = vmatprep.mubr.msk.f32.mxu1 %vm1951_vm9, %v587_v38 }
 0x3a6   : > { %2065 = vmatmul.mubr.f32.gmra.mrb[8].mxu1 %v586_v8 }
 0x3a7   : > { %3787 = vmatprep.mubr.msk.f32.mxu1 %vm1951_vm9, %v589_v61 }
 0x3aa   : > { %2071 = vmatmul.mubr.f32.gmra.mrb[10].mxu1 %v588_v3  ;;  %v527_v3 = vld [vmem:[%s8163_s3 + $0x28] sm:$0xff] }
 0x3ab   : > { %3788 = vmatprep.mubr.msk.f32.mxu1 %vm1951_vm9, %v591_v11 }
 0x3ae   : > { %2077 = vmatmul.mubr.f32.gmra.mrb[12].mxu1 %v590_v32 }
 0x3af   : > { %3789 = vmatprep.mubr.msk.f32.mxu1 %vm1951_vm9, %v593_v62 }
 0x3b2   : > { %2083 = vmatmul.mubr.f32.gmra.mrb[14].mxu1 %v592_v63 }
 0x3b3   : > { %3029 = vmatprep.mubr.f32.mxu1 %v4468_v44  ;;  %v542_v44 = vld [vmem:[%s8165_s5 + $0x20] sm:$0xff] }
 0x3c2   : > { %v623_v25 = vpop.xlane.xlu0 %622 }
 0x3c3   : > { %v620_v46 = vpop.xlane.xlu1 %619  ;;  %v643_v55 = vmul.f32 0.00390625, %v623_v25 }
 0x3c4   : > { %v642_v30 = vmul.f32 0.00390625, %v620_v46 }
 0x3c5   : > { %v702_v12 = vmul.f32 %v643_v55, %v523_v52 }
 0x3c6   : > { %v626_v17 = vpop.xlane.xlu0 %625  ;;  %v701_v49 = vmul.f32 %v642_v30, %v522_v16 }
 0x3c7   : > { %v679_v23 = vpop.xlane.xlu1 %678  ;;  %v644_v7 = vmul.f32 0.00390625, %v626_v17  ;;  %v711_v59 = vsel %vm709_vm13, %v702_v12, 0.0 }
 0x3c8   : > { %v710_v51 = vsel %vm709_vm13, %v701_v49, 0.0  ;;  %v764_v8 = vmul.f32 %v679_v23, %v538_v2 }
 0x3c9   : > { %v703_v31 = vmul.f32 %v644_v7, %v524_v21  ;;  %v712_v38 = vadd.f32 %v711_v59, %v710_v51 }
 0x3ca   : > { %v682_v22 = vpop.xlane.xlu0 %681  ;;  %v772_v52 = vsel %vm709_vm13, %v764_v8, 0.0 }
 0x3cb   : > { %v629_v10 = vpop.xlane.xlu1 %628  ;;  %v765_v19 = vmul.f32 %v682_v22, %v539_v29  ;;  %v713_v32 = vsel %vm709_vm13, %v703_v31, 0.0  ;;  %v543_v29 = vld [vmem:[%s8165_s5 + $0x28] sm:$0xff] }
 0x3cc   : > { %v645_v9 = vmul.f32 0.00390625, %v629_v10  ;;  %v714_v30 = vadd.f32 %v713_v32, %v712_v38  ;;  %v528_v10 = vld [vmem:[%s8163_s3 + $0x30] sm:$0xff] }
 0x3cd   : > { %v773_v25 = vsel %vm709_vm13, %v765_v19, 0.0 }
 0x3ce   : > { %v685_v35 = vpop.xlane.xlu0 %684  ;;  %v704_v41 = vmul.f32 %v645_v9, %v525_v53  ;;  %v774_v49 = vadd.f32 %v773_v25, %v772_v52 }
 0x3cf   : > { %v632_v57 = vpop.xlane.xlu1 %631  ;;  %v766_v61 = vmul.f32 %v685_v35, %v540_v4 }
 0x3d0   : > { %v646_v47 = vmul.f32 0.00390625, %v632_v57  ;;  %v715_v17 = vsel %vm709_vm13, %v704_v41, 0.0 }
 0x3d1   : > { %v775_v16 = vsel %vm709_vm13, %v766_v61, 0.0  ;;  %v716_v9 = vadd.f32 %v715_v17, %v714_v30  ;;  %v545_v61 = vld [vmem:[%s8165_s5 + $0x38] sm:$0xff] }
 0x3d2   : > { %v688_v34 = vpop.xlane.xlu0 %687  ;;  %v705_v62 = vmul.f32 %v646_v47, %v526_v40  ;;  %v776_v53 = vadd.f32 %v775_v16, %v774_v49  ;;  %v529_v47 = vld [vmem:[%s8163_s3 + $0x38] sm:$0xff] }
 0x3d3   : > { %v635_v11 = vpop.xlane.xlu1 %634  ;;  %v767_v46 = vmul.f32 %v688_v34, %v541_v28  ;;  %v544_v34 = vld [vmem:[%s8165_s5 + $0x30] sm:$0xff] }
 0x3d4   : > { %v647_v63 = vmul.f32 0.00390625, %v635_v11  ;;  %v717_v7 = vsel %vm709_vm13, %v705_v62, 0.0 }
 0x3d5   : > { %v777_v35 = vsel %vm709_vm13, %v767_v46, 0.0  ;;  %v718_v31 = vadd.f32 %v717_v7, %v716_v9 }
 0x3d6   : > { %v706_v23 = vmul.f32 %v647_v63, %v527_v3  ;;  %v691_v55 = vpop.xlane.xlu0 %690  ;;  %v778_v40 = vadd.f32 %v777_v35, %v776_v53 }
 0x3d7   : > { %v768_v22 = vmul.f32 %v691_v55, %v542_v44  ;;  %v638_v12 = vpop.xlane.xlu1 %637 }
 0x3d8   : > { %v648_v21 = vmul.f32 0.00390625, %v638_v12  ;;  %v719_v57 = vsel %vm709_vm13, %v706_v23, 0.0 }
 0x3d9   : > { %v779_v2 = vsel %vm709_vm13, %v768_v22, 0.0  ;;  %v720_v38 = vadd.f32 %v719_v57, %v718_v31 }
 0x3da   : > { %v707_v59 = vmul.f32 %v648_v21, %v528_v10  ;;  %v694_v51 = vpop.xlane.xlu0 %693  ;;  %v780_v3 = vadd.f32 %v779_v2, %v778_v40  ;;  %v546_v40 = vld [vmem:[%s8166_s6] sm:$0xff] }
 0x3db   : > { %v769_v4 = vmul.f32 %v694_v51, %v543_v29  ;;  %v641_v19 = vpop.xlane.xlu1 %640  ;;  %v530_v51 = vld [vmem:[%s8164_s4] sm:$0xff] }
 0x3dc   : > { %v721_v41 = vsel %vm709_vm13, %v707_v59, 0.0  ;;  %v649_v28 = vmul.f32 0.00390625, %v641_v19  ;;  %v531_v59 = vld [vmem:[%s8164_s4 + $0x8] sm:$0xff] }
 0x3dd   : > { %v781_v8 = vsel %vm709_vm13, %v769_v4, 0.0  ;;  %v722_v62 = vadd.f32 %v721_v41, %v720_v38  ;;  %v547_v19 = vld [vmem:[%s8166_s6 + $0x8] sm:$0xff] }
 0x3de   : > { %v708_v11 = vmul.f32 %v649_v28, %v529_v47  ;;  %v697_v32 = vpop.xlane.xlu0 %696  ;;  %v782_v25 = vadd.f32 %v781_v8, %v780_v3  ;;  %v532_v3 = vld [vmem:[%s8164_s4 + $0x10] sm:$0xff] }
 0x3df   : > { %v770_v63 = vmul.f32 %v697_v32, %v544_v34  ;;  %v700_v44 = vpop.xlane.xlu1 %699 }
 0x3e0   : > { %v723_v46 = vsel %vm709_vm13, %v708_v11, 0.0  ;;  %v771_v17 = vmul.f32 %v700_v44, %v545_v61  ;;  %v533_v61 = vld [vmem:[%s8164_s4 + $0x18] sm:$0xff] }
 0x3e1   : > { %v724_v23 = vadd.f32 %v723_v46, %v722_v62  ;;  %v783_v55 = vsel %vm709_vm13, %v770_v63, 0.0  ;;  %v549_v44 = vld [vmem:[%s8166_s6 + $0x18] sm:$0xff] }
 0x3e2   : > { %v784_v30 = vadd.f32 %v783_v55, %v782_v25  ;;  %v785_v52 = vsel %vm709_vm13, %v771_v17, 0.0  ;;  %v548_v25 = vld [vmem:[%s8166_s6 + $0x10] sm:$0xff] }
 0x3e3   : > { %v725_v16 = vrot.slane %v724_v23, 4 }
 0x3e4   : > { %v786_v22 = vadd.f32 %v785_v52, %v784_v30  ;;  %v534_v30 = vld [vmem:[%s8164_s4 + $0x20] sm:$0xff]  ;;  %v535_v52 = vld [vmem:[%s8164_s4 + $0x28] sm:$0xff] }
 0x3e5   : > { %v726_v10 = vadd.f32 %v725_v16, %v724_v23 }
 0x3e6   : > { %v787_v12 = vrot.slane %v786_v22, 4 }
 0x3e7   : > { %v727_v49 = vrot.slane %v726_v10, 2 }
 0x3e8   : > { %v788_v7 = vadd.f32 %v787_v12, %v786_v22 }
 0x3e9   : > { %v728_v21 = vadd.f32 %v727_v49, %v726_v10  ;;  %v551_v49 = vld [vmem:[%s8166_s6 + $0x28] sm:$0xff] }
 0x3ea   : > { %v789_v29 = vrot.slane %v788_v7, 2 }
 0x3eb   : > { %v729_v9 = vrot.slane %v728_v21, 1 }
 0x3ec   : > { %v790_v35 = vadd.f32 %v789_v29, %v788_v7  ;;  %v550_v7 = vld [vmem:[%s8166_s6 + $0x20] sm:$0xff] }
 0x3ed   : > { %v730_v53 = vadd.f32 %v729_v9, %v728_v21 }
 0x3ee   : > { %v791_v57 = vrot.slane %v790_v35, 1 }
 0x3ef   : > { %v731_v31 = vmax.f32 %v730_v53, 0.0  ;;  %v536_v53 = vld [vmem:[%s8164_s4 + $0x30] sm:$0xff] }
 0x3f0   : > { %v792_v2 = vadd.f32 %v791_v57, %v790_v35  ;;  %v537_v57 = vld [vmem:[%s8164_s4 + $0x38] sm:$0xff] }
 0x3f1   : > { %v733_v4 = vmul.f32 %v731_v31, %v531_v59  ;;  %v732_v47 = vmul.f32 %v731_v31, %v530_v51  ;;  %v735_v62 = vmul.f32 %v731_v31, %v533_v61  ;;  %v734_v63 = vmul.f32 %v731_v31, %v532_v3  ;;  %v595_v61 = vld [vmem:[%s8170_s10 + $0x8] sm:$0xff]  ;;  %v597_v3 = vld [vmem:[%s8170_s10 + $0x18] sm:$0xff] }
 0x3f2   : > { %v793_v41 = vmax.f32 %v792_v2, 0.0  ;;  %v736_v10 = vmul.f32 %v731_v31, %v534_v30  ;;  %v737_v12 = vmul.f32 %v731_v31, %v535_v52  ;;  %v738_v2 = vmul.f32 %v731_v31, %v536_v53 }
 0x3f3   : > { %v743_v28 = vsel %vm709_vm13, %v733_v4, 0.0  ;;  %v740_v34 = vsel %vm709_vm13, %v732_v47, 0.0  ;;  %v749_v46 = vsel %vm709_vm13, %v735_v62, 0.0  ;;  %v746_v17 = vsel %vm709_vm13, %v734_v63, 0.0  ;;  %v553_v47 = vld [vmem:[%s8166_s6 + $0x38] sm:$0xff]  ;;  %v600_v62 = vld [vmem:[%s8170_s10 + $0x30] sm:$0xff] }
 0x3f4   : > { %744 = vadd.xlane.f32.xlu1 %v743_v28  ;;  %741 = vadd.xlane.f32.xlu0 %v740_v34  ;;  %v795_v38 = vmul.f32 %v793_v41, %v547_v19  ;;  %v794_v8 = vmul.f32 %v793_v41, %v546_v40  ;;  %v797_v23 = vmul.f32 %v793_v41, %v549_v44  ;;  %v752_v21 = vsel %vm709_vm13, %v736_v10, 0.0  ;;  %v552_v19 = vld [vmem:[%s8166_s6 + $0x30] sm:$0xff]  ;;  %v598_v63 = vld [vmem:[%s8170_s10 + $0x20] sm:$0xff]  ;;  %v601_v44 = vld [vmem:[%s8170_s10 + $0x38] sm:$0xff] }
 0x3f5   : > { %v796_v55 = vmul.f32 %v793_v41, %v548_v25  ;;  %v755_v29 = vsel %vm709_vm13, %v737_v12, 0.0  ;;  %v799_v9 = vmul.f32 %v793_v41, %v551_v49  ;;  %v798_v35 = vmul.f32 %v793_v41, %v550_v7 }
 0x3f6   : > { %v805_v11 = vsel %vm709_vm13, %v795_v38, 0.0  ;;  %v802_v32 = vsel %vm709_vm13, %v794_v8, 0.0  ;;  %v811_v16 = vsel %vm709_vm13, %v797_v23, 0.0  ;;  %v739_v4 = vmul.f32 %v731_v31, %v537_v57 }
 0x3f7   : > { %v808_v22 = vsel %vm709_vm13, %v796_v55, 0.0  ;;  %v817_v59 = vsel %vm709_vm13, %v799_v9, 0.0  ;;  %v814_v51 = vsel %vm709_vm13, %v798_v35, 0.0  ;;  %v758_v40 = vsel %vm709_vm13, %v738_v2, 0.0 }
 0x3f8   : > { %806 = vadd.xlane.f32.xlu1 %v805_v11  ;;  %803 = vadd.xlane.f32.xlu0 %v802_v32  ;;  %v761_v28 = vsel %vm709_vm13, %v739_v4, 0.0  ;;  %v801_v34 = vmul.f32 %v793_v41, %v553_v47  ;;  %v800_v38 = vmul.f32 %v793_v41, %v552_v19  ;;  %v594_v41 = vld [vmem:[%s8170_s10] sm:$0xff]  ;;  %v599_v11 = vld [vmem:[%s8170_s10 + $0x28] sm:$0xff]  ;;  %v596_v32 = vld [vmem:[%s8170_s10 + $0x10] sm:$0xff] }
 0x3fa   : > { %v823_v31 = vsel %vm709_vm13, %v801_v34, 0.0  ;;  %v820_v8 = vsel %vm709_vm13, %v800_v38, 0.0 }
 0x3fc   : > { %750 = vadd.xlane.f32.xlu1 %v749_v46  ;;  %747 = vadd.xlane.f32.xlu0 %v746_v17 }
 0x400   : > { %812 = vadd.xlane.f32.xlu1 %v811_v16  ;;  %809 = vadd.xlane.f32.xlu0 %v808_v22 }
 0x404   : > { %753 = vadd.xlane.f32.xlu1 %v752_v21  ;;  %756 = vadd.xlane.f32.xlu0 %v755_v29 }
 0x408   : > { %818 = vadd.xlane.f32.xlu1 %v817_v59  ;;  %815 = vadd.xlane.f32.xlu0 %v814_v51 }
 0x40c   : > { %759 = vadd.xlane.f32.xlu1 %v758_v40  ;;  %762 = vadd.xlane.f32.xlu0 %v761_v28 }
 0x410   : > { %824 = vadd.xlane.f32.xlu1 %v823_v31  ;;  %821 = vadd.xlane.f32.xlu0 %v820_v8 }
 0x421   : > { %1918 = vperm.xlu1 %4339, %v595_v61  }
 0x425   : > { %1928 = vperm.xlu1 %4339, %v597_v3  }
 0x426   : > { %1913 = vperm.xlu0 %4338, %v594_v41  }
 0x429   : > { %1938 = vperm.xlu1 %4339, %v599_v11  }
 0x42a   : > { %1923 = vperm.xlu0 %4338, %v596_v32  }
 0x42d   : > { %1943 = vperm.xlu1 %4339, %v600_v62  }
 0x42e   : > { %1933 = vperm.xlu0 %4338, %v598_v63  }
 0x432   : > { %1948 = vperm.xlu0 %4338, %v601_v44  }
 0x469   : > { %v2042_v25 = vpop.f32.mrb[0].mxu1 }
 0x46a   : > { %v2044_v46 = vpop.f32.mrb[1].mxu1 }
 0x46d   : > { %v2048_v17 = vpop.f32.mrb[2].mxu1 }
 0x46e   : > { %v2050_v23 = vpop.f32.mrb[3].mxu1 }
 0x471   : > { %v6343_v55 = vpop.f32.mrb[4].mxu1 }
 0x472   : > { %v6345_v30 = vpop.f32.mrb[5].mxu1 }
 0x475   : > { %v2060_v52 = vpop.f32.mrb[6].mxu1 }
 0x476   : > { %v6347_v16 = vpop.f32.mrb[7].mxu1 }
 0x479   : > { %v6349_v22 = vpop.f32.mrb[8].mxu1 }
 0x47a   : > { %v6351_v10 = vpop.f32.mrb[9].mxu1 }
 0x47d   : > { %v6353_v12 = vpop.f32.mrb[10].mxu1 }
 0x47e   : > { %v6355_v49 = vpop.f32.mrb[11].mxu1 }
 0x481   : > { %v742_v7 = vpop.xlane.xlu0 %741  ;;  %v745_v21 = vpop.xlane.xlu1 %744 }
 0x482   : > { %v6357_v29 = vpop.f32.mrb[12].mxu1 }
 0x483   : > { %v6359_v9 = vpop.f32.mrb[13].mxu1 }
 0x485   : > { %v804_v35 = vpop.xlane.xlu0 %803  ;;  %v807_v53 = vpop.xlane.xlu1 %806 }
 0x486   : > { %v6361_v57 = vpop.f32.mrb[14].mxu1  ;;  %v827_v41 = vadd.f32 %v807_v53, %v745_v21  ;;  %v826_v63 = vadd.f32 %v804_v35, %v742_v7 }
 0x487   : > { %v6363_v59 = vpop.f32.mrb[15].mxu1 }
 0x489   : > { %v748_v51 = vpop.xlane.xlu0 %747  ;;  %v751_v2 = vpop.xlane.xlu1 %750 }
 0x48d   : > { %v810_v4 = vpop.xlane.xlu0 %809  ;;  %v813_v47 = vpop.xlane.xlu1 %812 }
 0x491   : > { %v6365_v19 = vpop.xlane.xlu0 %756  ;;  %v6367_v40 = vpop.xlane.xlu1 %753 }
 0x495   : > { %v6369_v28 = vpop.xlane.xlu0 %815  ;;  %v6371_v34 = vpop.xlane.xlu1 %818 }
 0x499   : > { %v6373_v38 = vpop.xlane.xlu1 %759  ;;  %v6375_v31 = vpop.xlane.xlu0 %762 }
 0x49d   : > { %v6377_v8 = vpop.xlane.xlu1 %824  ;;  %v6379_v61 = vpop.xlane.xlu0 %821 }
 0x4a1   : > { %v6381_v3 = vpop.permute.xlu1 %1918 }
 0x4a2   : > { %8371 = vst [vmem:[#allocation38_spill] sm:$0xff] %v6381_v3  ;;  %v2049_v11 = vadd.f32 %v2048_v17, %v6381_v3  ;;  %v2051_v20 = vadd.f32 %v2050_v23, %v6381_v3 }
 0x4a4   : > { %v2091_v32 = vadd.f32 %v2049_v11, %v827_v41  ;;  %v2092_v27 = vadd.f32 %v2051_v20, %v827_v41  ;;  %v4469_v20 = vld [vmem:[%s5020_s23 + $0x10] sm:$0xff] }
 0x4a5   : > { %v6384_v62 = vpop.permute.xlu0 %1913 }
 0x4a6   : > { %8372 = vst [vmem:[#allocation39_spill] sm:$0xff] %v6384_v62  ;;  %v3792_v44 = vmul.f32 -1.442695, %v2091_v32  ;;  %v2043_v37 = vadd.f32 %v2042_v25, %v6384_v62  ;;  %v2045_v1 = vadd.f32 %v2044_v46, %v6384_v62  ;;  %v3793_v21 = vmul.f32 -1.442695, %v2092_v27 }
 0x4a7   : > { %v829_v46 = vadd.f32 %v813_v47, %v751_v2 }
 0x4a8   : > { %4340 = vpow2.f32 %v3792_v44  ;;  %v2089_v60 = vadd.f32 %v2043_v37, %v826_v63  ;;  %v2090_v17 = vadd.f32 %v2045_v1, %v826_v63  ;;  %v4470_v37 = vld [vmem:[%s5005_s28 + $0x10] sm:$0xff]  ;;  %v4471_v63 = vld [vmem:[%s5020_s23] sm:$0xff] }
 0x4a9   : > { %v6393_v35 = vsub.f32 %v4469_v20, %v4470_v37  ;;  %v6396_v1 = vpop.permute.xlu0 %1923  ;;  %v4472_v44 = vld [vmem:[%s5005_s28] sm:$0xff] }
 0x4aa   : > { %v3790_v0 = vmul.f32 -1.442695, %v2089_v60  ;;  %v3791_v7 = vmul.f32 -1.442695, %v2090_v17  ;;  %v6389_v60 = vpop.permute.xlu1 %1928  ;;  %8375 = vst [vmem:[#allocation42_spill] sm:$0xff] %v6396_v1 }
 0x4ab   : > { %8373 = vst [vmem:[#allocation40_spill] sm:$0xff] %v6389_v60  ;;  %8374 = vst [vmem:[#allocation41_spill] sm:$0xff] %v6393_v35  ;;  %v2061_v27 = vadd.f32 %v2060_v52, %v6389_v60 }
 0x4ac   : > { %4342 = vpow2.f32 %v3790_v0 }
 0x4ad   : > { %4344 = vpow2.f32 %v3793_v21  ;;  %v6401_v21 = vsub.f32 %v4471_v63, %v4472_v44  ;;  %v2095_v17 = vadd.f32 %v2061_v27, %v829_v46 }
 0x4af   : > { %8376 = vst [vmem:[#allocation43_spill] sm:$0xff] %v6401_v21  ;;  %v3796_v47 = vmul.f32 -1.442695, %v2095_v17  ;;  %v4475_v17 = vld [vmem:[%s5020_s23 + $0x8] sm:$0xff] }
 0x4b2   : > { %v4341_v53 = vpop.eup %4340 }
 0x4b3   : > { %v2155_v11 = vadd.f32 1.0, %v4341_v53  ;;  %v2055_v53 = vadd.f32 %v6343_v55, %v6396_v1 }
 0x4b5   : > { %4346 = vrcp.f32 %v2155_v11 }
 0x4b6   : > { %v4343_v25 = vpop.eup %4342  ;;  %4348 = vpow2.f32 %v3791_v7 }
 0x4b7   : > { %v2153_v23 = vadd.f32 1.0, %v4343_v25  ;;  %v4345_v0 = vpop.eup %4344  ;;  %v828_v25 = vadd.f32 %v810_v4, %v748_v51  ;;  %v4473_v51 = vld [vmem:[%s5020_s23 + $0x18] sm:$0xff] }
 0x4b8   : > { %v2156_v11 = vadd.f32 1.0, %v4345_v0  ;;  %v4474_v4 = vld [vmem:[%s5005_s28 + $0x18] sm:$0xff] }
 0x4b9   : > { %4350 = vrcp.f32 %v2153_v23  ;;  %v2093_v20 = vadd.f32 %v2055_v53, %v828_v25  ;;  %v4476_v53 = vld [vmem:[%s5005_s28 + $0x8] sm:$0xff] }
 0x4ba   : > { %4352 = vrcp.f32 %v2156_v11  ;;  %v6433_v11 = vsub.f32 %v4475_v17, %v4476_v53  ;;  %v4478_v17 = vld [vmem:[%s5005_s28 + $0x30] sm:$0xff] }
 0x4bb   : > { %4354 = vpow2.f32 %v3796_v47  ;;  %v3794_v55 = vmul.f32 -1.442695, %v2093_v20 }
 0x4bc   : > { %8384 = vst [vmem:[#allocation47_spill] sm:$0xff] %v6433_v11 }
 0x4bf   : > { %v4347_v41 = vpop.eup %4346 }
 0x4c0   : > { %v2203_v32 = vmul.f32 %v4347_v41, %v6393_v35  ;;  %v4349_v7 = vpop.eup %4348 }
 0x4c1   : > { %v2154_v27 = vadd.f32 1.0, %v4349_v7 }
 0x4c2   : > { %v6405_v23 = vadd.f32 %v4470_v37, %v2203_v32  ;;  %v6422_v37 = vsub.f32 %v4473_v51, %v4474_v4  ;;  %v2063_v32 = vadd.f32 %v6347_v16, %v6389_v60 }
 0x4c3   : > { %v4351_v52 = vpop.eup %4350  ;;  %4356 = vrcp.f32 %v2154_v27 }
 0x4c4   : > { %8377 = vst [vmem:[#allocation44_spill] sm:$0xff] %v6405_v23  ;;  %v2201_v2 = vmul.f32 %v4351_v52, %v6401_v21  ;;  %2439 = vrot.lane.b32.xlu0 %v6405_v23, %s8378_s2  ;;  %4358 = vpow2.f32 %v3794_v55  ;;  %8382 = vst [vmem:[#allocation46_spill] sm:$0xff] %v6422_v37  ;;  %v4353_v0 = vpop.eup %4352  ;;  %v2096_v52 = vadd.f32 %v2063_v32, %v829_v46  ;;  %v6462_v32 = vpop.permute.xlu0 %1933 }
 0x4c5   : > { %v4355_v63 = vpop.eup %4354  ;;  %8388 = vst [vmem:[#allocation51_spill] sm:$0xff] %v6462_v32 }
 0x4c6   : > { %v6410_v41 = vadd.f32 %v4472_v44, %v2201_v2  ;;  %v2204_v44 = vmul.f32 %v4353_v0, %v6422_v37  ;;  %v2057_v2 = vadd.f32 %v6345_v30, %v6396_v1  ;;  %v2159_v16 = vadd.f32 1.0, %v4355_v63 }
 0x4c7   : > { %v3797_v55 = vmul.f32 -1.442695, %v2096_v52  ;;  %v831_v63 = vadd.f32 %v6371_v34, %v6365_v19  ;;  %v4479_v34 = vld [vmem:[%s5020_s23 + $0x20] sm:$0xff] }
 0x4c8   : > { %8379 = vst [vmem:[#allocation45_spill] sm:$0xff] %v6410_v41  ;;  %2503 = vrot.lane.b32.xlu0 %v6405_v23, %s8380_s8  ;;  %2437 = vrot.lane.b32.xlu1 %v6410_v41, %s8378_s2  ;;  %v6441_v20 = vadd.f32 %v4474_v4, %v2204_v44  ;;  %v2094_v51 = vadd.f32 %v2057_v2, %v828_v25  ;;  %4360 = vrcp.f32 %v2159_v16  ;;  %v6454_v25 = vpop.permute.xlu1 %1938  ;;  %v4477_v44 = vld [vmem:[%s5020_s23 + $0x30] sm:$0xff] }
 0x4c9   : > { %4362 = vpow2.f32 %v3797_v55  ;;  %8387 = vst [vmem:[#allocation50_spill] sm:$0xff] %v6454_v25  ;;  %v2073_v4 = vadd.f32 %v6353_v12, %v6454_v25  ;;  %v2067_v12 = vadd.f32 %v6349_v22, %v6462_v32  ;;  %v830_v16 = vadd.f32 %v6369_v28, %v6367_v40 }
 0x4ca   : > { %8385 = vst [vmem:[#allocation48_spill] sm:$0xff] %v6441_v20  ;;  %v3795_v0 = vmul.f32 -1.442695, %v2094_v51 }
 0x4cb   : > { %v2099_v52 = vadd.f32 %v2073_v4, %v831_v63 }
 0x4cc   : > { %2567 = vrot.lane.b32.xlu0 %v6405_v23, %s8381_s0  ;;  %2501 = vrot.lane.b32.xlu1 %v6410_v41, %s8380_s8 }
 0x4cd   : > { %v4357_v7 = vpop.eup %4356  ;;  %v3800_v51 = vmul.f32 -1.442695, %v2099_v52 }
 0x4ce   : > { %v4359_v47 = vpop.eup %4358  ;;  %v2202_v27 = vmul.f32 %v4357_v7, %v6433_v11 }
 0x4cf   : > { %v2157_v30 = vadd.f32 1.0, %v4359_v47  ;;  %v4480_v47 = vld [vmem:[%s5005_s28 + $0x20] sm:$0xff] }
 0x4d0   : > { %2631 = vrot.lane.b32.xlu0 %v6405_v23, %s8383_s1  ;;  %2565 = vrot.lane.b32.xlu1 %v6410_v41, %s8381_s0  ;;  %v6448_v46 = vadd.f32 %v4476_v53, %v2202_v27  ;;  %v6468_v53 = vsub.f32 %v4477_v44, %v4478_v17  ;;  %v6481_v27 = vsub.f32 %v4479_v34, %v4480_v47 }
 0x4d1   : > { %4364 = vrcp.f32 %v2157_v30  ;;  %v2097_v30 = vadd.f32 %v2067_v12, %v830_v16  ;;  %v2069_v12 = vadd.f32 %v6351_v10, %v6462_v32 }
 0x4d2   : > { %8386 = vst [vmem:[#allocation49_spill] sm:$0xff] %v6448_v46  ;;  %4366 = vpow2.f32 %v3795_v0  ;;  %8389 = vst [vmem:[#allocation52_spill] sm:$0xff] %v6468_v53  ;;  %v4361_v7 = vpop.eup %4360 }
 0x4d3   : > { %v4363_v2 = vpop.eup %4362  ;;  %v2207_v19 = vmul.f32 %v4361_v7, %v6468_v53  ;;  %8390 = vst [vmem:[#allocation53_spill] sm:$0xff] %v6481_v27  ;;  %4368 = vpow2.f32 %v3800_v51  ;;  %v3798_v28 = vmul.f32 -1.442695, %v2097_v30  ;;  %v2098_v51 = vadd.f32 %v2069_v12, %v830_v16 }
 0x4d4   : > { %2711 = vrot.lane.b32.xlu0 %v6405_v23, %s8361_s22  ;;  %2629 = vrot.lane.b32.xlu1 %v6410_v41, %s8383_s1  ;;  %v2160_v22 = vadd.f32 1.0, %v4363_v2  ;;  %v4481_v2 = vld [vmem:[%s5020_s23 + $0x38] sm:$0xff] }
 0x4d5   : > { %v6487_v4 = vadd.f32 %v4478_v17, %v2207_v19  ;;  %v2075_v17 = vadd.f32 %v6355_v49, %v6454_v25  ;;  %v4482_v19 = vld [vmem:[%s5005_s28 + $0x38] sm:$0xff] }
 0x4d6   : > { %4370 = vrcp.f32 %v2160_v22  ;;  %v6510_v34 = vsub.f32 %v4481_v2, %v4482_v19  ;;  %v4483_v22 = vld [vmem:[%s5020_s23 + $0x28] sm:$0xff]  ;;  %v6536_v2 = vpop.permute.xlu1 %1943 }
 0x4d7   : > { %8391 = vst [vmem:[#allocation54_spill] sm:$0xff] %v6487_v4  ;;  %4372 = vpow2.f32 %v3798_v28  ;;  %v2100_v52 = vadd.f32 %v2075_v17, %v831_v63  ;;  %v6525_v17 = vpop.permute.xlu0 %1948  ;;  %8397 = vst [vmem:[#allocation60_spill] sm:$0xff] %v6536_v2 }
 0x4d8   : > { %2455 = vrot.lane.b32.xlu0 %v6441_v20, %s8378_s2  ;;  %2709 = vrot.lane.b32.xlu1 %v6410_v41, %s8361_s22  ;;  %8393 = vst [vmem:[#allocation56_spill] sm:$0xff] %v6510_v34  ;;  %8395 = vst [vmem:[#allocation58_spill] sm:$0xff] %v6525_v17 }
 0x4db   : > { %v4365_v55 = vpop.eup %4364 }
 0x4dc   : > { %2519 = vrot.lane.b32.xlu0 %v6441_v20, %s8380_s8  ;;  %2453 = vrot.lane.b32.xlu1 %v6448_v46, %s8378_s2  ;;  %v4367_v0 = vpop.eup %4366  ;;  %v2205_v40 = vmul.f32 %v4365_v55, %v6481_v27  ;;  %v3801_v55 = vmul.f32 -1.442695, %v2100_v52 }
 0x4dd   : > { %v2158_v44 = vadd.f32 1.0, %v4367_v0  ;;  %v4369_v49 = vpop.eup %4368  ;;  %v4484_v0 = vld [vmem:[%s5005_s28 + $0x28] sm:$0xff] }
 0x4de   : > { %v6494_v7 = vadd.f32 %v4480_v47, %v2205_v40  ;;  %v2163_v10 = vadd.f32 1.0, %v4369_v49  ;;  %v6519_v40 = vsub.f32 %v4483_v22, %v4484_v0  ;;  %v2085_v49 = vadd.f32 %v6361_v57, %v6525_v17 }
 0x4df   : > { %4374 = vrcp.f32 %v2158_v44  ;;  %v3799_v44 = vmul.f32 -1.442695, %v2098_v51 }
 0x4e0   : > { %2583 = vrot.lane.b32.xlu0 %v6441_v20, %s8381_s0  ;;  %2517 = vrot.lane.b32.xlu1 %v6448_v46, %s8380_s8  ;;  %8392 = vst [vmem:[#allocation55_spill] sm:$0xff] %v6494_v7  ;;  %v4371_v47 = vpop.eup %4370  ;;  %8394 = vst [vmem:[#allocation57_spill] sm:$0xff] %v6519_v40  ;;  %4376 = vpow2.f32 %v3801_v55  ;;  %v2079_v55 = vadd.f32 %v6357_v29, %v6536_v2 }
 0x4e1   : > { %v4373_v63 = vpop.eup %4372  ;;  %v2208_v30 = vmul.f32 %v4371_v47, %v6510_v34  ;;  %4378 = vrcp.f32 %v2163_v10  ;;  %v832_v10 = vadd.f32 %v6379_v61, %v6373_v38 }
 0x4e2   : > { %v2161_v16 = vadd.f32 1.0, %v4373_v63  ;;  %4380 = vpow2.f32 %v3799_v44  ;;  %v4485_v63 = vld [vmem:[%s5020_s23 + $0x50] sm:$0xff] }
 0x4e3   : > { %v6527_v52 = vadd.f32 %v4482_v19, %v2208_v30  ;;  %v833_v19 = vadd.f32 %v6377_v8, %v6375_v31  ;;  %v4486_v31 = vld [vmem:[%s5005_s28 + $0x50] sm:$0xff]  ;;  %v2101_v22 = vadd.f32 %v2079_v55, %v832_v10 }
 0x4e4   : > { %2647 = vrot.lane.b32.xlu0 %v6441_v20, %s8383_s1  ;;  %2581 = vrot.lane.b32.xlu1 %v6448_v46, %s8381_s0  ;;  %4382 = vrcp.f32 %v2161_v16  ;;  %v6552_v8 = vsub.f32 %v4485_v63, %v4486_v31  ;;  %v4487_v16 = vld [vmem:[%s5020_s23 + $0x40] sm:$0xff]  ;;  %v2087_v63 = vadd.f32 %v6363_v59, %v6525_v17 }
 0x4e5   : > { %8396 = vst [vmem:[#allocation59_spill] sm:$0xff] %v6527_v52  ;;  %v2103_v51 = vadd.f32 %v2085_v49, %v833_v19  ;;  %v3802_v49 = vmul.f32 -1.442695, %v2101_v22  ;;  %v2081_v22 = vadd.f32 %v6359_v9, %v6536_v2 }
 0x4e6   : > { %8399 = vst [vmem:[#allocation62_spill] sm:$0xff] %v6552_v8 }
 0x4e7   : > { %v3804_v29 = vmul.f32 -1.442695, %v2103_v51 }
 0x4e8   : > { %2727 = vrot.lane.b32.xlu0 %v6441_v20, %s8361_s22  ;;  %2645 = vrot.lane.b32.xlu1 %v6448_v46, %s8383_s1 }
 0x4e9   : > { %v4375_v28 = vpop.eup %4374  ;;  %4384 = vpow2.f32 %v3804_v29  ;;  %v4489_v29 = vld [vmem:[%s5020_s23 + $0x58] sm:$0xff] }
 0x4ea   : > { %v2206_v12 = vmul.f32 %v4375_v28, %v6519_v40  ;;  %v4377_v57 = vpop.eup %4376 }
 0x4eb   : > { %v4379_v30 = vpop.eup %4378 }
 0x4ec   : > { %2443 = vrot.lane.b32.xlu0 %v6487_v4, %s8378_s2  ;;  %2725 = vrot.lane.b32.xlu1 %v6448_v46, %s8361_s22  ;;  %v6540_v47 = vadd.f32 %v4484_v0, %v2206_v12  ;;  %v2164_v0 = vadd.f32 1.0, %v4377_v57  ;;  %v4381_v28 = vpop.eup %4380  ;;  %v2211_v44 = vmul.f32 %v4379_v30, %v6552_v8  ;;  %v4488_v12 = vld [vmem:[%s5005_s28 + $0x40] sm:$0xff] }
 0x4ed   : > { %v6561_v38 = vsub.f32 %v4487_v16, %v4488_v12  ;;  %v2162_v55 = vadd.f32 1.0, %v4381_v28  ;;  %v2102_v16 = vadd.f32 %v2081_v22, %v832_v10 }
 0x4ee   : > { %8398 = vst [vmem:[#allocation61_spill] sm:$0xff] %v6540_v47  ;;  %v4383_v61 = vpop.eup %4382  ;;  %4386 = vrcp.f32 %v2164_v0  ;;  %v6567_v51 = vadd.f32 %v4486_v31, %v2211_v44  ;;  %v2104_v31 = vadd.f32 %v2087_v63, %v833_v19  ;;  %v4490_v0 = vld [vmem:[%s5005_s28 + $0x58] sm:$0xff] }
 0x4ef   : > { %8400 = vst [vmem:[#allocation63_spill] sm:$0xff] %v6561_v38  ;;  %v2209_v57 = vmul.f32 %v4383_v61, %v6561_v38  ;;  %4388 = vpow2.f32 %v3802_v49  ;;  %v6586_v28 = vsub.f32 %v4489_v29, %v4490_v0  ;;  %v4491_v49 = vld [vmem:[%s5020_s23 + $0x48] sm:$0xff]  ;;  %v3803_v29 = vmul.f32 -1.442695, %v2102_v16  ;;  %v4494_v16 = vld [vmem:[%s5005_s28 + $0x70] sm:$0xff] }
 0x4f0   : > { %2507 = vrot.lane.b32.xlu0 %v6487_v4, %s8380_s8  ;;  %2441 = vrot.lane.b32.xlu1 %v6494_v7, %s8378_s2  ;;  %8401 = vst [vmem:[#allocation64_spill] sm:$0xff] %v6567_v51  ;;  %4390 = vrcp.f32 %v2162_v55  ;;  %v4492_v55 = vld [vmem:[%s5005_s28 + $0x48] sm:$0xff] }
 0x4f1   : > { %v6576_v30 = vadd.f32 %v4488_v12, %v2209_v57  ;;  %8402 = vst [vmem:[#allocation65_spill] sm:$0xff] %v6586_v28  ;;  %v3805_v12 = vmul.f32 -1.442695, %v2104_v31  ;;  %v6595_v57 = vsub.f32 %v4491_v49, %v4492_v55  ;;  %v4495_v49 = vld [vmem:[%s5020_s23 + $0x60] sm:$0xff] }
 0x4f3   : > { %v4385_v59 = vpop.eup %4384  ;;  %8403 = vst [vmem:[#allocation66_spill] sm:$0xff] %v6595_v57  ;;  %4392 = vpow2.f32 %v3805_v12 }
 0x4f4   : > { %2571 = vrot.lane.b32.xlu0 %v6487_v4, %s8381_s0  ;;  %2505 = vrot.lane.b32.xlu1 %v6494_v7, %s8380_s8  ;;  %v2167_v9 = vadd.f32 1.0, %v4385_v59 }
 0x4f6   : > { %4394 = vrcp.f32 %v2167_v9 }
 0x4f7   : > { %4396 = vpow2.f32 %v3803_v29 }
 0x4f8   : > { %2635 = vrot.lane.b32.xlu0 %v6487_v4, %s8383_s1  ;;  %2569 = vrot.lane.b32.xlu1 %v6494_v7, %s8381_s0  ;;  %v4387_v44 = vpop.eup %4386 }
 0x4f9   : > { %v4389_v19 = vpop.eup %4388  ;;  %v2212_v61 = vmul.f32 %v4387_v44, %v6586_v28  ;;  %v4493_v44 = vld [vmem:[%s5020_s23 + $0x70] sm:$0xff] }
 0x4fa   : > { %v4391_v63 = vpop.eup %4390  ;;  %v2165_v10 = vadd.f32 1.0, %v4389_v19  ;;  %v6616_v12 = vsub.f32 %v4493_v44, %v4494_v16 }
 0x4fb   : > { %v6601_v22 = vadd.f32 %v4490_v0, %v2212_v61  ;;  %v2210_v31 = vmul.f32 %v4391_v63, %v6595_v57 }
 0x4fc   : > { %2715 = vrot.lane.b32.xlu0 %v6487_v4, %s8361_s22  ;;  %2633 = vrot.lane.b32.xlu1 %v6494_v7, %s8383_s1  ;;  %4398 = vrcp.f32 %v2165_v10  ;;  %8404 = vst [vmem:[#allocation67_spill] sm:$0xff] %v6616_v12 }
 0x4fd   : > { %v6608_v59 = vadd.f32 %v4492_v55, %v2210_v31  ;;  %v4393_v0 = vpop.eup %4392  ;;  %v4496_v55 = vld [vmem:[%s5005_s28 + $0x60] sm:$0xff] }
 0x4fe   : > { %v2168_v19 = vadd.f32 1.0, %v4393_v0  ;;  %v6624_v63 = vsub.f32 %v4495_v49, %v4496_v55 }
 0x500   : > { %2459 = vrot.lane.b32.xlu0 %v6527_v52, %s8378_s2  ;;  %2713 = vrot.lane.b32.xlu1 %v6494_v7, %s8361_s22  ;;  %v4395_v9 = vpop.eup %4394  ;;  %8405 = vst [vmem:[#allocation68_spill] sm:$0xff] %v6624_v63  ;;  %4400 = vrcp.f32 %v2168_v19  ;;  %v4497_v19 = vld [vmem:[%s5020_s23 + $0x78] sm:$0xff] }
 0x501   : > { %v4397_v61 = vpop.eup %4396  ;;  %v2215_v29 = vmul.f32 %v4395_v9, %v6616_v12 }
 0x502   : > { %v2166_v31 = vadd.f32 1.0, %v4397_v61  ;;  %v4498_v61 = vld [vmem:[%s5005_s28 + $0x78] sm:$0xff] }
 0x503   : > { %v6632_v44 = vadd.f32 %v4494_v16, %v2215_v29  ;;  %v6646_v49 = vsub.f32 %v4497_v19, %v4498_v61 }
 0x504   : > { %2523 = vrot.lane.b32.xlu0 %v6527_v52, %s8380_s8  ;;  %2457 = vrot.lane.b32.xlu1 %v6540_v47, %s8378_s2  ;;  %4402 = vrcp.f32 %v2166_v31 }
 0x505   : > { %8406 = vst [vmem:[#allocation69_spill] sm:$0xff] %v6632_v44  ;;  %8407 = vst [vmem:[#allocation70_spill] sm:$0xff] %v6646_v49 }
 0x506   : > { %v4399_v10 = vpop.eup %4398 }
 0x507   : > { %v2213_v0 = vmul.f32 %v4399_v10, %v6624_v63  ;;  %v4500_v10 = vld [vmem:[%s5005_s28 + $0x68] sm:$0xff] }
 0x508   : > { %2587 = vrot.lane.b32.xlu0 %v6527_v52, %s8381_s0  ;;  %2521 = vrot.lane.b32.xlu1 %v6540_v47, %s8380_s8 }
 0x509   : > { %v6638_v9 = vadd.f32 %v4496_v55, %v2213_v0  ;;  %v4499_v55 = vld [vmem:[%s5020_s23 + $0x68] sm:$0xff]  ;;  %s3659_s23 = sshll.u32 %s8064_s14, 4  ;;  %s8113_s23 = int_to_ptr.vmem [resolvable:$true] %s3659_s23 }
 0x50a   : > { %v4401_v29 = vpop.eup %4400  ;;  %v6654_v31 = vsub.f32 %v4499_v55, %v4500_v10 }
 0x50b   : > { %v2216_v0 = vmul.f32 %v4401_v29, %v6646_v49 }
 0x50c   : > { %2651 = vrot.lane.b32.xlu0 %v6527_v52, %s8383_s1  ;;  %2585 = vrot.lane.b32.xlu1 %v6540_v47, %s8381_s0  ;;  %8408 = vst [vmem:[#allocation71_spill] sm:$0xff] %v6654_v31 }
 0x50d   : > { %v6664_v8 = vadd.f32 %v4498_v61, %v2216_v0 }
 0x50e   : > { %v4403_v28 = vpop.eup %4402 }
 0x50f   : > { %v2214_v19 = vmul.f32 %v4403_v28, %v6654_v31  ;;  %8409 = vst [vmem:[#allocation72_spill] sm:$0xff] %v6664_v8 }
 0x510   : > { %2447 = vrot.lane.b32.xlu0 %v6567_v51, %s8378_s2  ;;  %2649 = vrot.lane.b32.xlu1 %v6540_v47, %s8383_s1 }
 0x511   : > { %v6674_v29 = vadd.f32 %v4500_v10, %v2214_v19 }
 0x514   : > { %2511 = vrot.lane.b32.xlu0 %v6567_v51, %s8380_s8  ;;  %2445 = vrot.lane.b32.xlu1 %v6576_v30, %s8378_s2 }
 0x518   : > { %2575 = vrot.lane.b32.xlu0 %v6567_v51, %s8381_s0  ;;  %2509 = vrot.lane.b32.xlu1 %v6576_v30, %s8380_s8 }
 0x51c   : > { %2639 = vrot.lane.b32.xlu0 %v6567_v51, %s8383_s1  ;;  %2573 = vrot.lane.b32.xlu1 %v6576_v30, %s8381_s0 }
 0x520   : > { %2463 = vrot.lane.b32.xlu0 %v6601_v22, %s8378_s2  ;;  %2637 = vrot.lane.b32.xlu1 %v6576_v30, %s8383_s1 }
 0x524   : > { %2527 = vrot.lane.b32.xlu0 %v6601_v22, %s8380_s8  ;;  %2461 = vrot.lane.b32.xlu1 %v6608_v59, %s8378_s2 }
 0x528   : > { %2591 = vrot.lane.b32.xlu0 %v6601_v22, %s8381_s0  ;;  %2525 = vrot.lane.b32.xlu1 %v6608_v59, %s8380_s8 }
 0x52c   : > { %2655 = vrot.lane.b32.xlu0 %v6601_v22, %s8383_s1  ;;  %2589 = vrot.lane.b32.xlu1 %v6608_v59, %s8381_s0 }
 0x530   : > { %2451 = vrot.lane.b32.xlu0 %v6632_v44, %s8378_s2  ;;  %2653 = vrot.lane.b32.xlu1 %v6608_v59, %s8383_s1 }
 0x534   : > { %2515 = vrot.lane.b32.xlu0 %v6632_v44, %s8380_s8  ;;  %2449 = vrot.lane.b32.xlu1 %v6638_v9, %s8378_s2 }
 0x536   : > { %v2440_v16 = vpop.permute.xlu0 %2439 }
 0x538   : > { %2579 = vrot.lane.b32.xlu0 %v6632_v44, %s8381_s0  ;;  %2513 = vrot.lane.b32.xlu1 %v6638_v9, %s8380_s8 }
 0x53a   : > { %v6657_v12 = vpop.permute.xlu0 %2503  ;;  %v2438_v63 = vpop.permute.xlu1 %2437 }
 0x53c   : > { %2643 = vrot.lane.b32.xlu0 %v6632_v44, %s8383_s1  ;;  %2577 = vrot.lane.b32.xlu1 %v6638_v9, %s8381_s0 }
 0x53e   : > { %v6666_v57 = vpop.permute.xlu0 %2567  ;;  %v6668_v55 = vpop.permute.xlu1 %2501 }
 0x540   : > { %2467 = vrot.lane.b32.xlu0 %v6664_v8, %s8378_s2  ;;  %2641 = vrot.lane.b32.xlu1 %v6638_v9, %s8383_s1 }
 0x542   : > { %v6676_v49 = vpop.permute.xlu0 %2631  ;;  %v6678_v38 = vpop.permute.xlu1 %2565 }
 0x544   : > { %2731 = vrot.lane.b32.xlu0 %v6527_v52, %s8361_s22  ;;  %2465 = vrot.lane.b32.xlu1 %v6674_v29, %s8378_s2 }
 0x546   : > { %v6684_v28 = vpop.permute.xlu0 %2711  ;;  %v6686_v61 = vpop.permute.xlu1 %2629 }
 0x547   : > { %8410 = vst [vmem:[#allocation73_spill] sm:$0xff] %v6684_v28 }
 0x548   : > { %2719 = vrot.lane.b32.xlu0 %v6567_v51, %s8361_s22  ;;  %2729 = vrot.lane.b32.xlu1 %v6540_v47, %s8361_s22 }
 0x54a   : > { %v2456_v10 = vpop.permute.xlu0 %2455  ;;  %v6692_v0 = vpop.permute.xlu1 %2709 }
 0x54b   : > { %8411 = vst [vmem:[#allocation74_spill] sm:$0xff] %v6692_v0  ;;  %v2470_v19 = vsel %vm868_vm0, %v2440_v16, %v2456_v10  ;;  %v2478_v31 = vsel %vm868_vm0, %v2456_v10, %v2440_v16 }
 0x54c   : > { %2735 = vrot.lane.b32.xlu0 %v6601_v22, %s8361_s22  ;;  %2529 = vrot.lane.b32.xlu1 %v6674_v29, %s8380_s8  ;;  %v2487_v37 = vmul.f32 %v2478_v31, %v5219_v58  ;;  %v2488_v35 = vmul.f32 %v2470_v19, %v5212_v56 }
 0x54e   : > { %v6702_v34 = vpop.permute.xlu0 %2519  ;;  %v2454_v53 = vpop.permute.xlu1 %2453 }
 0x54f   : > { %v2469_v40 = vsel %vm868_vm0, %v2438_v63, %v2454_v53  ;;  %v2477_v27 = vsel %vm868_vm0, %v2454_v53, %v2438_v63 }
 0x550   : > { %v2485_v11 = vmul.f32 %v2477_v27, %v5219_v58  ;;  %v2486_v21 = vmul.f32 %v2469_v40, %v5212_v56  ;;  %2531 = vrot.lane.b32.xlu0 %v6664_v8, %s8380_s8  ;;  %2593 = vrot.lane.b32.xlu1 %v6674_v29, %s8381_s0 }
 0x552   : > { %v4028_v16 = vpack.c.bf16 %v2487_v37, %v2485_v11  ;;  %v6716_v10 = vpop.permute.xlu0 %2583  ;;  %v6718_v17 = vpop.permute.xlu1 %2517  ;;  %v4026_v53 = vpack.c.bf16 %v2488_v35, %v2486_v21 }
 0x554   : > { %2723 = vrot.lane.b32.xlu0 %v6632_v44, %s8361_s22  ;;  %2657 = vrot.lane.b32.xlu1 %v6674_v29, %s8383_s1 }
 0x555   : > { %4027 = vmatprep.subr.bf16.mxu1 %v4026_v53 }
 0x556   : > { %4029 = vmatpush1.bf16.msra.mxu1 %v4028_v16  ;;  %v6724_v27 = vpop.permute.xlu0 %2647  ;;  %v6726_v40 = vpop.permute.xlu1 %2581 }
 0x558   : > { %2775 = vrot.lane.b32.xlu0 %v6405_v23, %s8362_s11  ;;  %2717 = vrot.lane.b32.xlu1 %v6576_v30, %s8361_s22 }
 0x55a   : > { %v6732_v37 = vpop.permute.xlu0 %2727  ;;  %v6734_v35 = vpop.permute.xlu1 %2645 }
 0x55b   : > { %8412 = vst [vmem:[#allocation75_spill] sm:$0xff] %v6732_v37 }
 0x55c   : > { %2791 = vrot.lane.b32.xlu0 %v6441_v20, %s8362_s11  ;;  %2733 = vrot.lane.b32.xlu1 %v6608_v59, %s8361_s22 }
 0x55e   : > { %v2444_v21 = vpop.permute.xlu0 %2443  ;;  %v6740_v11 = vpop.permute.xlu1 %2725 }
 0x55f   : > { %8413 = vst [vmem:[#allocation76_spill] sm:$0xff] %v6740_v11 }
 0x560   : > { %2595 = vrot.lane.b32.xlu0 %v6664_v8, %s8381_s0  ;;  %2721 = vrot.lane.b32.xlu1 %v6638_v9, %s8361_s22 }
 0x562   : > { %v6746_v63 = vpop.permute.xlu0 %2507  ;;  %v2442_v31 = vpop.permute.xlu1 %2441 }
 0x564   : > { %2779 = vrot.lane.b32.xlu0 %v6487_v4, %s8362_s11  ;;  %2737 = vrot.lane.b32.xlu1 %v6674_v29, %s8361_s22 }
 0x566   : > { %v6752_v19 = vpop.permute.xlu0 %2571  ;;  %v6754_v16 = vpop.permute.xlu1 %2505 }
 0x568   : > { %2795 = vrot.lane.b32.xlu0 %v6527_v52, %s8362_s11  ;;  %2773 = vrot.lane.b32.xlu1 %v6410_v41, %s8362_s11 }
 0x56a   : > { %v6760_v53 = vpop.permute.xlu0 %2635  ;;  %v6762_v2 = vpop.permute.xlu1 %2569 }
 0x56b   : > { %8414 = vst [vmem:[#allocation77_spill] sm:$0xff] %v6760_v53 }
 0x56c   : > { %2783 = vrot.lane.b32.xlu0 %v6567_v51, %s8362_s11  ;;  %2789 = vrot.lane.b32.xlu1 %v6448_v46, %s8362_s11 }
 0x56e   : > { %v6768_v25 = vpop.permute.xlu0 %2715  ;;  %v6770_v32 = vpop.permute.xlu1 %2633 }
 0x56f   : > { %8415 = vst [vmem:[#allocation78_spill] sm:$0xff] %v6768_v25 }
 0x570   : > { %2659 = vrot.lane.b32.xlu0 %v6664_v8, %s8383_s1  ;;  %2777 = vrot.lane.b32.xlu1 %v6494_v7, %s8362_s11 }
 0x572   : > { %v2460_v60 = vpop.permute.xlu0 %2459  ;;  %v6776_v1 = vpop.permute.xlu1 %2713 }
 0x573   : > { %8416 = vst [vmem:[#allocation79_spill] sm:$0xff] %v6776_v1  ;;  %v2472_v3 = vsel %vm868_vm0, %v2444_v21, %v2460_v60  ;;  %v2480_v62 = vsel %vm868_vm0, %v2460_v60, %v2444_v21 }
 0x574   : > { %2799 = vrot.lane.b32.xlu0 %v6601_v22, %s8362_s11  ;;  %2793 = vrot.lane.b32.xlu1 %v6540_v47, %s8362_s11  ;;  %v2491_v26 = vmul.f32 %v2480_v62, %v5219_v58  ;;  %v2492_v43 = vmul.f32 %v2472_v3, %v5212_v56 }
 0x576   : > { %v6786_v45 = vpop.permute.xlu0 %2523  ;;  %v2458_v48 = vpop.permute.xlu1 %2457 }
 0x577   : > { %v2471_v36 = vsel %vm868_vm0, %v2442_v31, %v2458_v48  ;;  %v2479_v18 = vsel %vm868_vm0, %v2458_v48, %v2442_v31 }
 0x578   : > { %v2489_v25 = vmul.f32 %v2479_v18, %v5219_v58  ;;  %v2490_v60 = vmul.f32 %v2471_v36, %v5212_v56  ;;  %2787 = vrot.lane.b32.xlu0 %v6632_v44, %s8362_s11  ;;  %2781 = vrot.lane.b32.xlu1 %v6576_v30, %s8362_s11 }
 0x57a   : > { %v4032_v21 = vpack.c.bf16 %v2491_v26, %v2489_v25  ;;  %v6800_v54 = vpop.permute.xlu0 %2587  ;;  %v6802_v1 = vpop.permute.xlu1 %2521  ;;  %v4030_v48 = vpack.c.bf16 %v2492_v43, %v2490_v60 }
 0x57c   : > { %2839 = vrot.lane.b32.xlu0 %v6405_v23, %s8363_s12  ;;  %2797 = vrot.lane.b32.xlu1 %v6608_v59, %s8362_s11 }
 0x57d   : > { %4031 = vmatprep.subr.bf16.mxu1 %v4030_v48 }
 0x57e   : > { %4033 = vmatpush1.bf16.msra.mxu1 %v4032_v21  ;;  %v6808_v36 = vpop.permute.xlu0 %2651  ;;  %v6810_v18 = vpop.permute.xlu1 %2585 }
 0x57f   : > { %8417 = vst [vmem:[#allocation80_spill] sm:$0xff] %v6808_v36 }
 0x580   : > { %2855 = vrot.lane.b32.xlu0 %v6441_v20, %s8363_s12  ;;  %2785 = vrot.lane.b32.xlu1 %v6638_v9, %s8362_s11 }
 0x582   : > { %v2448_v26 = vpop.permute.xlu0 %2447  ;;  %v6816_v43 = vpop.permute.xlu1 %2649 }
 0x584   : > { %2843 = vrot.lane.b32.xlu0 %v6487_v4, %s8363_s12  ;;  %2801 = vrot.lane.b32.xlu1 %v6674_v29, %s8362_s11 }
 0x586   : > { %v6822_v3 = vpop.permute.xlu0 %2511  ;;  %v2446_v62 = vpop.permute.xlu1 %2445 }
 0x588   : > { %2859 = vrot.lane.b32.xlu0 %v6527_v52, %s8363_s12  ;;  %2837 = vrot.lane.b32.xlu1 %v6410_v41, %s8363_s12 }
 0x58a   : > { %v6828_v25 = vpop.permute.xlu0 %2575  ;;  %v6830_v31 = vpop.permute.xlu1 %2509 }
 0x58c   : > { %2847 = vrot.lane.b32.xlu0 %v6567_v51, %s8363_s12  ;;  %2853 = vrot.lane.b32.xlu1 %v6448_v46, %s8363_s12 }
 0x58e   : > { %v6836_v60 = vpop.permute.xlu0 %2639  ;;  %v6838_v21 = vpop.permute.xlu1 %2573 }
 0x58f   : > { %8418 = vst [vmem:[#allocation81_spill] sm:$0xff] %v6836_v60 }
 0x590   : > { %2739 = vrot.lane.b32.xlu0 %v6664_v8, %s8361_s22  ;;  %2841 = vrot.lane.b32.xlu1 %v6494_v7, %s8363_s12 }
 0x592   : > { %v2464_v48 = vpop.permute.xlu0 %2463  ;;  %v6844_v33 = vpop.permute.xlu1 %2637 }
 0x593   : > { %8419 = vst [vmem:[#allocation82_spill] sm:$0xff] %v6844_v33  ;;  %v2474_v37 = vsel %vm868_vm0, %v2448_v26, %v2464_v48  ;;  %v2482_v28 = vsel %vm868_vm0, %v2464_v48, %v2448_v26 }
 0x594   : > { %2863 = vrot.lane.b32.xlu0 %v6601_v22, %s8363_s12  ;;  %2857 = vrot.lane.b32.xlu1 %v6540_v47, %s8363_s12  ;;  %v2495_v60 = vmul.f32 %v2482_v28, %v5219_v58  ;;  %v2496_v33 = vmul.f32 %v2474_v37, %v5212_v56 }
 0x596   : > { %v6854_v11 = vpop.permute.xlu0 %2527  ;;  %v2462_v0 = vpop.permute.xlu1 %2461 }
 0x597   : > { %v2473_v24 = vsel %vm868_vm0, %v2446_v62, %v2462_v0  ;;  %v2481_v15 = vsel %vm868_vm0, %v2462_v0, %v2446_v62 }
 0x598   : > { %v2493_v53 = vmul.f32 %v2481_v15, %v5219_v58  ;;  %v2494_v26 = vmul.f32 %v2473_v24, %v5212_v56  ;;  %2851 = vrot.lane.b32.xlu0 %v6632_v44, %s8363_s12  ;;  %2845 = vrot.lane.b32.xlu1 %v6576_v30, %s8363_s12 }
 0x59a   : > { %v4036_v48 = vpack.c.bf16 %v2495_v60, %v2493_v53  ;;  %v6868_v36 = vpop.permute.xlu0 %2591  ;;  %v6870_v5 = vpop.permute.xlu1 %2525  ;;  %v4034_v0 = vpack.c.bf16 %v2496_v33, %v2494_v26 }
 0x59c   : > { %2903 = vrot.lane.b32.xlu0 %v6405_v23, %s8364_s26  ;;  %2861 = vrot.lane.b32.xlu1 %v6608_v59, %s8363_s12 }
 0x59d   : > { %4035 = vmatprep.subr.bf16.mxu1 %v4034_v0 }
 0x59e   : > { %4037 = vmatpush1.bf16.msra.mxu1 %v4036_v48  ;;  %v6876_v15 = vpop.permute.xlu0 %2655  ;;  %v6878_v24 = vpop.permute.xlu1 %2589 }
 0x59f   : > { %8420 = vst [vmem:[#allocation83_spill] sm:$0xff] %v6876_v15 }
 0x5a0   : > { %2803 = vrot.lane.b32.xlu0 %v6664_v8, %s8362_s11  ;;  %2849 = vrot.lane.b32.xlu1 %v6638_v9, %s8363_s12 }
 0x5a2   : > { %v2452_v28 = vpop.permute.xlu0 %2451  ;;  %v6884_v33 = vpop.permute.xlu1 %2653 }
 0x5a4   : > { %2919 = vrot.lane.b32.xlu0 %v6441_v20, %s8364_s26  ;;  %2865 = vrot.lane.b32.xlu1 %v6674_v29, %s8363_s12 }
 0x5a6   : > { %v6890_v37 = vpop.permute.xlu0 %2515  ;;  %v2450_v53 = vpop.permute.xlu1 %2449 }
 0x5a8   : > { %2907 = vrot.lane.b32.xlu0 %v6487_v4, %s8364_s26  ;;  %2901 = vrot.lane.b32.xlu1 %v6410_v41, %s8364_s26 }
 0x5aa   : > { %v6896_v62 = vpop.permute.xlu0 %2579  ;;  %v6898_v60 = vpop.permute.xlu1 %2513 }
 0x5ac   : > { %2923 = vrot.lane.b32.xlu0 %v6527_v52, %s8364_s26  ;;  %2917 = vrot.lane.b32.xlu1 %v6448_v46, %s8364_s26  ;;  %v2533_v52 = vsel %vm944_vm1, %v6668_v55, %v6718_v17 }
 0x5ae   : > { %v6904_v26 = vpop.permute.xlu0 %2643  ;;  %v6906_v48 = vpop.permute.xlu1 %2577 }
 0x5af   : > { %8421 = vst [vmem:[#allocation84_spill] sm:$0xff] %v6904_v26  ;;  %v2550_v26 = vmul.f32 %v2533_v52, %v5305_v14 }
 0x5b0   : > { %2867 = vrot.lane.b32.xlu0 %v6664_v8, %s8363_s12  ;;  %2905 = vrot.lane.b32.xlu1 %v6494_v7, %s8364_s26  ;;  %v2534_v7 = vsel %vm944_vm1, %v6657_v12, %v6702_v34 }
 0x5b2   : > { %v2468_v0 = vpop.permute.xlu0 %2467  ;;  %v6912_v4 = vpop.permute.xlu1 %2641 }
 0x5b3   : > { %8422 = vst [vmem:[#allocation85_spill] sm:$0xff] %v6912_v4  ;;  %v2476_v23 = vsel %vm868_vm0, %v2452_v28, %v2468_v0  ;;  %v2484_v41 = vsel %vm868_vm0, %v2468_v0, %v2452_v28 }
 0x5b4   : > { %2911 = vrot.lane.b32.xlu0 %v6567_v51, %s8364_s26  ;;  %2921 = vrot.lane.b32.xlu1 %v6540_v47, %s8364_s26  ;;  %v2541_v51 = vsel %vm944_vm1, %v6718_v17, %v6668_v55  ;;  %v2499_v47 = vmul.f32 %v2484_v41, %v5219_v58  ;;  %v2500_v4 = vmul.f32 %v2476_v23, %v5212_v56 }
 0x5b5   : > { %v2535_v17 = vsel %vm944_vm1, %v6754_v16, %v6802_v1  ;;  %v2542_v23 = vsel %vm944_vm1, %v6702_v34, %v6657_v12  ;;  %v2552_v41 = vmul.f32 %v2534_v7, %v5305_v14  ;;  %v2543_v34 = vsel %vm944_vm1, %v6802_v1, %v6754_v16 }
 0x5b6   : > { %v6930_v20 = vpop.permute.xlu0 %2731  ;;  %v2466_v46 = vpop.permute.xlu1 %2465  ;;  %v2554_v7 = vmul.f32 %v2535_v17, %v5305_v14  ;;  %v2544_v1 = vsel %vm944_vm1, %v6786_v45, %v6746_v63  ;;  %v2538_v17 = vsel %vm944_vm1, %v6822_v3, %v6854_v11 }
 0x5b7   : > { %8423 = vst [vmem:[#allocation86_spill] sm:$0xff] %v6930_v20  ;;  %v2475_v28 = vsel %vm868_vm0, %v2450_v53, %v2466_v46  ;;  %v2483_v0 = vsel %vm868_vm0, %v2466_v46, %v2450_v53 }
 0x5b8   : > { %v2497_v20 = vmul.f32 %v2483_v0, %v5219_v58  ;;  %v2498_v15 = vmul.f32 %v2475_v28, %v5212_v56  ;;  %2927 = vrot.lane.b32.xlu0 %v6601_v22, %s8364_s26  ;;  %2909 = vrot.lane.b32.xlu1 %v6576_v30, %s8364_s26  ;;  %v2549_v28 = vmul.f32 %v2541_v51, %v5302_v13  ;;  %v8448_v56 = vld [vmem:[#allocation79_spill] sm:$0xff] }
 0x5b9   : > { %v2536_v0 = vsel %vm944_vm1, %v6746_v63, %v6786_v45 }
 0x5ba   : > { %v4040_v46 = vpack.c.bf16 %v2499_v47, %v2497_v20  ;;  %v6958_v52 = vpop.permute.xlu0 %2719  ;;  %v6960_v55 = vpop.permute.xlu1 %2729  ;;  %v4038_v53 = vpack.c.bf16 %v2500_v4, %v2498_v15  ;;  %v4042_v20 = vpack.c.bf16 %v2552_v41, %v2550_v26  ;;  %v2551_v4 = vmul.f32 %v2542_v23, %v5302_v13 }
 0x5bb   : > { %v2537_v47 = vsel %vm944_vm1, %v6830_v31, %v6870_v5  ;;  %v2556_v51 = vmul.f32 %v2536_v0, %v5305_v14  ;;  %v2553_v26 = vmul.f32 %v2543_v34, %v5302_v13  ;;  %v2545_v23 = vsel %vm944_vm1, %v6870_v5, %v6830_v31 }
 0x5bc   : > { %2915 = vrot.lane.b32.xlu0 %v6632_v44, %s8364_s26  ;;  %4039 = vmatprep.subr.bf16.mxu1 %v4038_v53  ;;  %v4044_v15 = vpack.c.bf16 %v2551_v4, %v2549_v28  ;;  %v2558_v45 = vmul.f32 %v2537_v47, %v5305_v14  ;;  %v2555_v41 = vmul.f32 %v2544_v1, %v5302_v13 }
 0x5bd   : > { %2925 = vrot.lane.b32.xlu1 %v6608_v59, %s8364_s26  ;;  %4041 = vmatpush1.bf16.msra.mxu1 %v4040_v46  ;;  %v4046_v63 = vpack.c.bf16 %v2556_v51, %v2554_v7  ;;  %v2546_v46 = vsel %vm944_vm1, %v6854_v11, %v6822_v3  ;;  %v2560_v53 = vmul.f32 %v2538_v17, %v5305_v14 }
 0x5be   : > { %v6986_v12 = vpop.permute.xlu0 %2735  ;;  %4043 = vmatprep.subr.bf16.mxu1 %v4042_v20  ;;  %v2530_v16 = vpop.permute.xlu1 %2529  ;;  %v4048_v31 = vpack.c.bf16 %v2555_v41, %v2553_v26  ;;  %v2557_v28 = vmul.f32 %v2545_v23, %v5302_v13  ;;  %v2597_v4 = vsel %vm1020_vm2, %v6678_v38, %v6726_v40  ;;  %v2559_v47 = vmul.f32 %v2546_v46, %v5302_v13  ;;  %v8451_v58 = vld [vmem:[#allocation86_spill] sm:$0xff] }
 0x5bf   : > { %v2539_v0 = vsel %vm944_vm1, %v6898_v60, %v2530_v16  ;;  %v4050_v20 = vpack.c.bf16 %v2560_v53, %v2558_v45  ;;  %v2547_v1 = vsel %vm944_vm1, %v2530_v16, %v6898_v60  ;;  %v2605_v60 = vsel %vm1020_vm2, %v6726_v40, %v6678_v38 }
 0x5c0   : > { %2931 = vrot.lane.b32.xlu0 %v6664_v8, %s8364_s26  ;;  %v4052_v26 = vpack.c.bf16 %v2559_v47, %v2557_v28  ;;  %v2614_v16 = vmul.f32 %v2597_v4, %v5392_v42  ;;  %v2561_v41 = vmul.f32 %v2547_v1, %v5302_v13  ;;  %v2606_v46 = vsel %vm1020_vm2, %v6716_v10, %v6666_v57 }
 0x5c1   : > { %2913 = vrot.lane.b32.xlu1 %v6638_v9, %s8364_s26  ;;  %4045 = vmatpush1.bf16.msra.mxu1 %v4044_v15  ;;  %v2598_v15 = vsel %vm1020_vm2, %v6666_v57, %v6716_v10  ;;  %v2613_v38 = vmul.f32 %v2605_v60, %v5389_v39  ;;  %v2600_v40 = vsel %vm1020_vm2, %v6752_v19, %v6800_v54 }
 0x5c2   : > { %v2532_v5 = vpop.permute.xlu0 %2531  ;;  %4047 = vmatprep.subr.bf16.mxu1 %v4046_v63  ;;  %v7015_v7 = vpop.permute.xlu1 %2593  ;;  %v2599_v63 = vsel %vm1020_vm2, %v6762_v2, %v6810_v18  ;;  %v2616_v53 = vmul.f32 %v2598_v15, %v5392_v42  ;;  %v2607_v57 = vsel %vm1020_vm2, %v6810_v18, %v6762_v2  ;;  %v2602_v47 = vsel %vm1020_vm2, %v6828_v25, %v6868_v36 }
 0x5c3   : > { %v2540_v34 = vsel %vm944_vm1, %v6890_v37, %v2532_v5  ;;  %v2548_v11 = vsel %vm944_vm1, %v2532_v5, %v6890_v37  ;;  %v2562_v37 = vmul.f32 %v2539_v0, %v5305_v14  ;;  %v2618_v10 = vmul.f32 %v2599_v63, %v5392_v42 }
 0x5c4   : > { %v2564_v3 = vmul.f32 %v2540_v34, %v5305_v14  ;;  %v2563_v17 = vmul.f32 %v2548_v11, %v5302_v13  ;;  %v4058_v0 = vpack.c.bf16 %v2616_v53, %v2614_v16  ;;  %v2615_v34 = vmul.f32 %v2606_v46, %v5389_v39  ;;  %v4505_v13 = vld [vmem:[%s8167_s7 + $0x50] sm:$0xff] }
 0x5c5   : > { %2929 = vrot.lane.b32.xlu1 %v6674_v29, %s8364_s26  ;;  %4049 = vmatpush1.bf16.msra.mxu1 %v4048_v31  ;;  %v2601_v11 = vsel %vm1020_vm2, %v6838_v21, %v6878_v24  ;;  %v2617_v18 = vmul.f32 %v2607_v57, %v5389_v39  ;;  %v2661_v46 = vsel %vm1096_vm3, %v6686_v61, %v6734_v35 }
 0x5c6   : > { %v7032_v51 = vpop.permute.xlu0 %2723  ;;  %4051 = vmatprep.subr.bf16.mxu1 %v4050_v20  ;;  %v7039_v23 = vpop.permute.xlu1 %2657  ;;  %v4054_v45 = vpack.c.bf16 %v2564_v3, %v2562_v37  ;;  %v4056_v31 = vpack.c.bf16 %v2563_v17, %v2561_v41  ;;  %v2608_v3 = vsel %vm1020_vm2, %v6800_v54, %v6752_v19  ;;  %v2620_v20 = vmul.f32 %v2600_v40, %v5392_v42 }
 0x5c7   : > { %v4060_v2 = vpack.c.bf16 %v2615_v34, %v2613_v38  ;;  %v2609_v54 = vsel %vm1020_vm2, %v6878_v24, %v6838_v21  ;;  %v2622_v19 = vmul.f32 %v2601_v11, %v5392_v42  ;;  %v2619_v15 = vmul.f32 %v2608_v3, %v5389_v39 }
 0x5c8   : > { %v4062_v37 = vpack.c.bf16 %v2620_v20, %v2618_v10  ;;  %v2624_v17 = vmul.f32 %v2602_v47, %v5392_v42  ;;  %v2603_v21 = vsel %vm1020_vm2, %v6906_v48, %v7015_v7  ;;  %v2611_v38 = vsel %vm1020_vm2, %v7015_v7, %v6906_v48  ;;  %v8425_v47 = vld [vmem:[#allocation80_spill] sm:$0xff] }
 0x5c9   : > { %4053 = vmatpush1.bf16.msra.mxu1 %v4052_v26  ;;  %v2610_v26 = vsel %vm1020_vm2, %v6868_v36, %v6828_v25  ;;  %v4064_v16 = vpack.c.bf16 %v2619_v15, %v2617_v18  ;;  %v2626_v40 = vmul.f32 %v2603_v21, %v5392_v42  ;;  %v2669_v48 = vsel %vm1096_vm3, %v6734_v35, %v6686_v61  ;;  %v8424_v61 = vld [vmem:[#allocation20_spill] sm:$0xff] }
 0x5ca   : > { %v7056_v5 = vpop.permute.xlu0 %2775  ;;  %4055 = vmatprep.subr.bf16.mxu1 %v4054_v45  ;;  %v7063_v28 = vpop.permute.xlu1 %2717  ;;  %v2621_v45 = vmul.f32 %v2609_v54, %v5389_v39  ;;  %v4066_v41 = vpack.c.bf16 %v2624_v17, %v2622_v19  ;;  %v2623_v53 = vmul.f32 %v2610_v26, %v5389_v39  ;;  %v2678_v7 = vmul.f32 %v2661_v46, %v5479_v6  ;;  %v8426_v54 = vld [vmem:[#allocation77_spill] sm:$0xff] }
 0x5cb   : > { %v2663_v11 = vsel %vm1096_vm3, %v6770_v32, %v6816_v43  ;;  %v2625_v3 = vmul.f32 %v2611_v38, %v5389_v39  ;;  %v2670_v20 = vsel %vm1096_vm3, %v6724_v27, %v6676_v49  ;;  %v2677_v35 = vmul.f32 %v2669_v48, %v8424_v61 }
 0x5cc   : > { %v4068_v57 = vpack.c.bf16 %v2623_v53, %v2621_v45  ;;  %v2664_v19 = vsel %vm1096_vm3, %v8426_v54, %v8425_v47  ;;  %v2679_v17 = vmul.f32 %v2670_v20, %v8424_v61  ;;  %v2672_v45 = vsel %vm1096_vm3, %v8425_v47, %v8426_v54 }
 0x5cd   : > { %4057 = vmatpush1.bf16.msra.mxu1 %v4056_v31  ;;  %v2684_v21 = vmul.f32 %v2664_v19, %v5479_v6 }
 0x5ce   : > { %v7080_v4 = vpop.permute.xlu0 %2791  ;;  %4059 = vmatprep.subr.bf16.mxu1 %v4058_v0  ;;  %v7087_v1 = vpop.permute.xlu1 %2733 }
 0x5d1   : > { %4061 = vmatpush1.bf16.msra.mxu1 %v4060_v2 }
 0x5d2   : > { %v2596_v60 = vpop.permute.xlu0 %2595  ;;  %4063 = vmatprep.subr.bf16.mxu1 %v4062_v37  ;;  %v7108_v63 = vpop.permute.xlu1 %2721 }
 0x5d3   : > { %v2604_v24 = vsel %vm1020_vm2, %v6896_v62, %v2596_v60  ;;  %v2612_v36 = vsel %vm1020_vm2, %v2596_v60, %v6896_v62  ;;  %v2662_v62 = vsel %vm1096_vm3, %v6676_v49, %v6724_v27  ;;  %v2671_v49 = vsel %vm1096_vm3, %v6816_v43, %v6770_v32  ;;  %v8427_v60 = vld [vmem:[#allocation82_spill] sm:$0xff] }
 0x5d4   : > { %v2628_v25 = vmul.f32 %v2604_v24, %v5392_v42  ;;  %v2627_v10 = vmul.f32 %v2612_v36, %v5389_v39  ;;  %v2680_v2 = vmul.f32 %v2662_v62, %v5479_v6  ;;  %v2682_v27 = vmul.f32 %v2663_v11, %v5479_v6  ;;  %v8428_v36 = vld [vmem:[#allocation83_spill] sm:$0xff] }
 0x5d5   : > { %4065 = vmatpush1.bf16.msra.mxu1 %v4064_v16  ;;  %v2665_v16 = vsel %vm1096_vm3, %v8427_v60, %v6884_v33  ;;  %v4076_v32 = vpack.c.bf16 %v2679_v17, %v2677_v35  ;;  %v2681_v43 = vmul.f32 %v2671_v49, %v8424_v61  ;;  %v2673_v53 = vsel %vm1096_vm3, %v6884_v33, %v8427_v60  ;;  %v8430_v33 = vld [vmem:[#allocation85_spill] sm:$0xff] }
 0x5d6   : > { %v7124_v31 = vpop.permute.xlu0 %2779  ;;  %4067 = vmatprep.subr.bf16.mxu1 %v4066_v41  ;;  %v7131_v0 = vpop.permute.xlu1 %2737  ;;  %v4070_v34 = vpack.c.bf16 %v2628_v25, %v2626_v40  ;;  %v4072_v37 = vpack.c.bf16 %v2627_v10, %v2625_v3  ;;  %v4074_v26 = vpack.c.bf16 %v2680_v2, %v2678_v7  ;;  %v8429_v25 = vld [vmem:[#allocation81_spill] sm:$0xff]  ;;  %v2686_v38 = vmul.f32 %v2665_v16, %v5479_v6  ;;  %v8431_v3 = vld [vmem:[#allocation84_spill] sm:$0xff] }
 0x5d7   : > { %v2666_v41 = vsel %vm1096_vm3, %v8429_v25, %v8428_v36  ;;  %v4078_v40 = vpack.c.bf16 %v2684_v21, %v2682_v27  ;;  %v2683_v62 = vmul.f32 %v2672_v45, %v8424_v61  ;;  %v2667_v11 = vsel %vm1096_vm3, %v8430_v33, %v7039_v23  ;;  %v8432_v45 = vld [vmem:[#allocation22_spill] sm:$0xff]  ;;  %v8433_v21 = vld [vmem:[#allocation49_spill] sm:$0xff] }
 0x5d8   : > { %v2688_v10 = vmul.f32 %v2666_v41, %v5479_v6  ;;  %v2690_v49 = vmul.f32 %v2667_v11, %v5479_v6  ;;  %v8439_v11 = vld [vmem:[#allocation59_spill] sm:$0xff] }
 0x5d9   : > { %4069 = vmatpush1.bf16.msra.mxu1 %v4068_v57  ;;  %v2674_v57 = vsel %vm1096_vm3, %v8428_v36, %v8429_v25  ;;  %v4080_v7 = vpack.c.bf16 %v2683_v62, %v2681_v43 }
 0x5da   : > { %v7148_v18 = vpop.permute.xlu0 %2795  ;;  %4071 = vmatprep.subr.bf16.mxu1 %v4070_v34  ;;  %v7155_v15 = vpop.permute.xlu1 %2773  ;;  %v2685_v34 = vmul.f32 %v2673_v53, %v8424_v61  ;;  %v4082_v54 = vpack.c.bf16 %v2688_v10, %v2686_v38  ;;  %v2687_v19 = vmul.f32 %v2674_v57, %v8424_v61  ;;  %v8435_v38 = vld [vmem:[#allocation23_spill] sm:$0xff]  ;;  %v8437_v10 = vld [vmem:[#allocation61_spill] sm:$0xff] }
 0x5db   : > { %v2707_v42 = vmul.f32 %v6632_v44, %v8435_v38 }
 0x5dd   : > { %4073 = vmatpush1.bf16.msra.mxu1 %v4072_v37  ;;  %v2675_v37 = vsel %vm1096_vm3, %v7039_v23, %v8430_v33  ;;  %v8434_v23 = vld [vmem:[#allocation48_spill] sm:$0xff] }
 0x5de   : > { %v7172_v24 = vpop.permute.xlu0 %2783  ;;  %4075 = vmatprep.subr.bf16.mxu1 %v4074_v26  ;;  %v7179_v46 = vpop.permute.xlu1 %2789  ;;  %v4084_v26 = vpack.c.bf16 %v2687_v19, %v2685_v34  ;;  %v2689_v43 = vmul.f32 %v2675_v37, %v8424_v61  ;;  %v2696_v25 = vmul.f32 %v8434_v23, %v8432_v45  ;;  %v4501_v19 = vld [vmem:[%s8167_s7] sm:$0xff] }
 0x5e1   : > { %4077 = vmatpush1.bf16.msra.mxu1 %v4076_v32  ;;  %v2694_v32 = vmul.f32 %v8433_v21, %v8432_v45 }
 0x5e2   : > { %v2660_v48 = vpop.permute.xlu0 %2659  ;;  %4079 = vmatprep.subr.bf16.mxu1 %v4078_v40  ;;  %v7200_v2 = vpop.permute.xlu1 %2777  ;;  %v8436_v40 = vld [vmem:[#allocation45_spill] sm:$0xff] }
 0x5e3   : > { %v2668_v20 = vsel %vm1096_vm3, %v8431_v3, %v2660_v48  ;;  %v2676_v35 = vsel %vm1096_vm3, %v2660_v48, %v8431_v3  ;;  %v2693_v62 = vmul.f32 %v8436_v40, %v8435_v38  ;;  %v4090_v57 = vpack.c.bf16 %v2696_v25, %v2694_v32 }
 0x5e4   : > { %v2692_v47 = vmul.f32 %v2668_v20, %v5479_v6  ;;  %v2691_v17 = vmul.f32 %v2676_v35, %v8424_v61  ;;  %v2698_v48 = vmul.f32 %v8437_v10, %v8432_v45  ;;  %v2700_v3 = vmul.f32 %v8439_v11, %v8432_v45 }
 0x5e5   : > { %4081 = vmatpush1.bf16.msra.mxu1 %v4080_v7  ;;  %v8438_v7 = vld [vmem:[#allocation44_spill] sm:$0xff] }
 0x5e6   : > { %v7212_v27 = vpop.permute.xlu0 %2799  ;;  %4083 = vmatprep.subr.bf16.mxu1 %v4082_v54  ;;  %v7215_v60 = vpop.permute.xlu1 %2793  ;;  %v4086_v16 = vpack.c.bf16 %v2692_v47, %v2690_v49  ;;  %v4088_v41 = vpack.c.bf16 %v2691_v17, %v2689_v43  ;;  %v2695_v34 = vmul.f32 %v8438_v7, %v8435_v38  ;;  %v8440_v47 = vld [vmem:[#allocation55_spill] sm:$0xff]  ;;  %v4094_v37 = vpack.c.bf16 %v2700_v3, %v2698_v48  ;;  %v8442_v3 = vld [vmem:[#allocation74_spill] sm:$0xff] }
 0x5e7   : > { %v2697_v54 = vmul.f32 %v8440_v47, %v8435_v38  ;;  %v2702_v49 = vmul.f32 %v6608_v59, %v8432_v45  ;;  %v2704_v43 = vmul.f32 %v6601_v22, %v8432_v45  ;;  %v2708_v48 = vmul.f32 %v6664_v8, %v8432_v45 }
 0x5e8   : > { %v4092_v35 = vpack.c.bf16 %v2695_v34, %v2693_v62  ;;  %v2701_v62 = vmul.f32 %v6576_v30, %v8435_v38  ;;  %v4503_v34 = vld [vmem:[%s8167_s7 + $0x28] sm:$0xff] }
 0x5e9   : > { %4085 = vmatpush1.bf16.msra.mxu1 %v4084_v26  ;;  %v8441_v26 = vld [vmem:[#allocation54_spill] sm:$0xff] }
 0x5ea   : > { %v7220_v36 = vpop.permute.xlu0 %2787  ;;  %4087 = vmatprep.subr.bf16.mxu1 %v4086_v16  ;;  %v7224_v53 = vpop.permute.xlu1 %2781  ;;  %v2699_v17 = vmul.f32 %v8441_v26, %v8435_v38  ;;  %v4502_v16 = vld [vmem:[%s8167_s7 + $0x30] sm:$0xff] }
 0x5ed   : > { %4089 = vmatpush1.bf16.msra.mxu1 %v4088_v41  ;;  %v4096_v41 = vpack.c.bf16 %v2699_v17, %v2697_v54  ;;  %v8444_v54 = vld [vmem:[#allocation64_spill] sm:$0xff] }
 0x5ee   : > { %v7232_v33 = vpop.permute.xlu0 %2839  ;;  %4091 = vmatprep.subr.bf16.mxu1 %v4090_v57  ;;  %v7236_v20 = vpop.permute.xlu1 %2797  ;;  %v4098_v57 = vpack.c.bf16 %v2704_v43, %v2702_v49  ;;  %v4504_v49 = vld [vmem:[%s8167_s7 + $0x58] sm:$0xff] }
 0x5ef   : > { %v8445_v43 = vld [vmem:[#allocation73_spill] sm:$0xff] }
 0x5f0   : > { %3030 = vmatmul.mubr.f32.vlgmr.msra.gmra.mrb[16].mxu1 %v4501_v19 }
 0x5f1   : > { %4093 = vmatpush1.bf16.msra.mxu1 %v4092_v35  ;;  %3035 = vmatprep.mubr.f32.mxu1 %v4502_v16  ;;  %v8443_v35 = vld [vmem:[#allocation76_spill] sm:$0xff]  ;;  %v2706_v16 = vmul.f32 %v6674_v29, %v8432_v45 }
 0x5f2   : > { %v7250_v32 = vpop.permute.xlu0 %2855  ;;  %4095 = vmatprep.subr.bf16.mxu1 %v4094_v37  ;;  %v7254_v25 = vpop.permute.xlu1 %2785  ;;  %v2749_v19 = vsel %vm1199_vm4, %v8443_v35, %v8442_v3  ;;  %v2703_v37 = vmul.f32 %v8444_v54, %v8435_v38 }
 0x5f3   : > { %v4102_v14 = vpack.c.bf16 %v2708_v48, %v2706_v16  ;;  %v8450_v16 = vld [vmem:[#allocation78_spill] sm:$0xff] }
 0x5f4   : > { %3036 = vmatmul.mubr.f32.gmra.mrb[18].mxu1 %v4503_v34  ;;  %v8446_v34 = vld [vmem:[#allocation75_spill] sm:$0xff]  ;;  %v4100_v61 = vpack.c.bf16 %v2703_v37, %v2701_v62  ;;  %v2751_v62 = vsel %vm1199_vm4, %v6960_v55, %v8448_v56  ;;  %v2705_v37 = vmul.f32 %v6638_v9, %v8435_v38  ;;  %v2752_v8 = vsel %vm1199_vm4, %v8451_v58, %v8450_v16 }
 0x5f5   : > { %4097 = vmatpush1.bf16.msra.mxu1 %v4096_v41  ;;  %3041 = vmatprep.mubr.f32.mxu1 %v4504_v49  ;;  %v2750_v6 = vsel %vm1199_vm4, %v8446_v34, %v8445_v43  ;;  %v2741_v49 = vsel %vm1199_vm4, %v8442_v3, %v8443_v35  ;;  %v4506_v3 = vld [vmem:[%s8167_s7 + $0x80] sm:$0xff]  ;;  %v2742_v48 = vsel %vm1199_vm4, %v8445_v43, %v8446_v34 }
 0x5f6   : > { %v7272_v17 = vpop.permute.xlu0 %2843  ;;  %4099 = vmatprep.subr.bf16.mxu1 %v4098_v57  ;;  %v7280_v41 = vpop.permute.xlu1 %2801  ;;  %v8447_v57 = vld [vmem:[#allocation24_spill] sm:$0xff]  ;;  %v2743_v43 = vsel %vm1199_vm4, %v8448_v56, %v6960_v55  ;;  %v4508_v56 = vld [vmem:[%s8167_s7 + $0x18] sm:$0xff] }
 0x5f7   : > { %v2758_v39 = vmul.f32 %v2749_v19, %v8447_v57  ;;  %v8449_v19 = vld [vmem:[#allocation25_spill] sm:$0xff]  ;;  %v2764_v55 = vmul.f32 %v2752_v8, %v8447_v57 }
 0x5f8   : > { %3042 = vmatmul.mubr.f32.gmra.mrb[20].mxu1 %v4505_v13  ;;  %v2760_v13 = vmul.f32 %v2750_v6, %v8447_v57  ;;  %v2762_v6 = vmul.f32 %v2751_v62, %v8447_v57 }
 0x5f9   : > { %4101 = vmatpush1.bf16.msra.mxu1 %v4100_v61  ;;  %3047 = vmatprep.mubr.f32.mxu1 %v4506_v3  ;;  %v2757_v61 = vmul.f32 %v2741_v49, %v8449_v19  ;;  %v4104_v3 = vpack.c.bf16 %v2707_v42, %v2705_v37  ;;  %v2759_v49 = vmul.f32 %v2742_v48, %v8449_v19 }
 0x5fa   : > { %v7306_v35 = vpop.permute.xlu0 %2859  ;;  %4103 = vmatprep.subr.bf16.mxu1 %v4102_v14  ;;  %v7313_v44 = vpop.permute.xlu1 %2837  ;;  %v4106_v34 = vpack.c.bf16 %v2760_v13, %v2758_v39  ;;  %v4507_v14 = vld [vmem:[%s8167_s7 + $0x78] sm:$0xff]  ;;  %v2753_v42 = vsel %vm1199_vm4, %v7087_v1, %v7063_v28  ;;  %v2744_v39 = vsel %vm1199_vm4, %v8450_v16, %v8451_v58  ;;  %v2761_v48 = vmul.f32 %v2743_v43, %v8449_v19 }
 0x5fb   : > { %v4108_v37 = vpack.c.bf16 %v2759_v49, %v2757_v61  ;;  %v2754_v13 = vsel %vm1199_vm4, %v6986_v12, %v6958_v52  ;;  %v2745_v58 = vsel %vm1199_vm4, %v7063_v28, %v7087_v1  ;;  %v2766_v8 = vmul.f32 %v2753_v42, %v8447_v57 }
 0x5fc   : > { %3048 = vmatmul.mubr.f32.gmra.mrb[22].mxu1 %v4507_v14  ;;  %v4110_v16 = vpack.c.bf16 %v2764_v55, %v2762_v6  ;;  %v2746_v61 = vsel %vm1199_vm4, %v6958_v52, %v6986_v12  ;;  %v2768_v43 = vmul.f32 %v2754_v13, %v8447_v57  ;;  %v2755_v28 = vsel %vm1199_vm4, %v7131_v0, %v7108_v63 }
 0x5fd   : > { %4105 = vmatpush1.bf16.msra.mxu1 %v4104_v3  ;;  %3118 = vmatprep.mubr.f32.mxu1 %v4508_v56  ;;  %v2765_v56 = vmul.f32 %v2745_v58, %v8449_v19  ;;  %v2813_v55 = vsel %vm1275_vm5, %v7179_v46, %v7155_v15 }
 0x5fe   : > { %v7336_v62 = vpop.permute.xlu0 %2847  ;;  %4107 = vmatprep.subr.bf16.mxu1 %v4106_v34  ;;  %v7343_v3 = vpop.permute.xlu1 %2853  ;;  %v2763_v34 = vmul.f32 %v2744_v39, %v8449_v19  ;;  %v4114_v42 = vpack.c.bf16 %v2768_v43, %v2766_v8  ;;  %v2767_v39 = vmul.f32 %v2746_v61, %v8449_v19 }
 0x600   : > { %v4112_v49 = vpack.c.bf16 %v2763_v34, %v2761_v48  ;;  %v2770_v48 = vmul.f32 %v2755_v28, %v8447_v57  ;;  %v4116_v58 = vpack.c.bf16 %v2767_v39, %v2765_v56 }
 0x601   : > { %4109 = vmatpush1.bf16.msra.mxu1 %v4108_v37  ;;  %v2747_v37 = vsel %vm1199_vm4, %v7108_v63, %v7131_v0  ;;  %v2805_v63 = vsel %vm1275_vm5, %v7155_v15, %v7179_v46  ;;  %v8452_v0 = vld [vmem:[#allocation27_spill] sm:$0xff]  ;;  %v2816_v15 = vsel %vm1275_vm5, %v7148_v18, %v7124_v31  ;;  %v8453_v46 = vld [vmem:[#allocation26_spill] sm:$0xff] }
 0x602   : > { %v2740_v14 = vpop.permute.xlu0 %2739  ;;  %4111 = vmatprep.subr.bf16.mxu1 %v4110_v16  ;;  %v7364_v6 = vpop.permute.xlu1 %2841  ;;  %v2822_v34 = vmul.f32 %v2813_v55, %v8452_v0  ;;  %v2769_v43 = vmul.f32 %v2747_v37, %v8449_v19  ;;  %v2817_v55 = vsel %vm1275_vm5, %v7236_v20, %v7224_v53  ;;  %v2808_v37 = vsel %vm1275_vm5, %v7124_v31, %v7148_v18 }
 0x603   : > { %v2756_v1 = vsel %vm1199_vm4, %v2740_v14, %v7032_v51  ;;  %v2748_v52 = vsel %vm1199_vm4, %v7032_v51, %v2740_v14  ;;  %v2814_v51 = vsel %vm1275_vm5, %v7080_v4, %v7056_v5  ;;  %v2815_v14 = vsel %vm1275_vm5, %v7215_v60, %v7200_v2 }
 0x604   : > { %v2772_v12 = vmul.f32 %v2756_v1, %v8447_v57  ;;  %v2771_v8 = vmul.f32 %v2748_v52, %v8449_v19  ;;  %v2824_v56 = vmul.f32 %v2814_v51, %v8452_v0  ;;  %v2821_v1 = vmul.f32 %v2805_v63, %v8453_v46 }
 0x605   : > { %4113 = vmatpush1.bf16.msra.mxu1 %v4112_v49  ;;  %v2806_v49 = vsel %vm1275_vm5, %v7056_v5, %v7080_v4  ;;  %v2807_v5 = vsel %vm1275_vm5, %v7200_v2, %v7215_v60  ;;  %v2826_v4 = vmul.f32 %v2815_v14, %v8452_v0  ;;  %v2818_v60 = vsel %vm1275_vm5, %v7212_v27, %v7172_v24 }
 0x606   : > { %v7380_v13 = vpop.permute.xlu0 %2863  ;;  %4115 = vmatprep.subr.bf16.mxu1 %v4114_v42  ;;  %v7387_v16 = vpop.permute.xlu1 %2857  ;;  %v4118_v61 = vpack.c.bf16 %v2772_v12, %v2770_v48  ;;  %v4120_v52 = vpack.c.bf16 %v2771_v8, %v2769_v43  ;;  %v4122_v42 = vpack.c.bf16 %v2824_v56, %v2822_v34  ;;  %v2823_v39 = vmul.f32 %v2806_v49, %v8453_v46 }
 0x607   : > { %v2828_v48 = vmul.f32 %v2816_v15, %v8452_v0  ;;  %v2809_v63 = vsel %vm1275_vm5, %v7224_v53, %v7236_v20  ;;  %v2830_v31 = vmul.f32 %v2817_v55, %v8452_v0  ;;  %v2827_v34 = vmul.f32 %v2808_v37, %v8453_v46 }
 0x608   : > { %v4124_v2 = vpack.c.bf16 %v2823_v39, %v2821_v1  ;;  %v2832_v43 = vmul.f32 %v2818_v60, %v8452_v0  ;;  %v2829_v56 = vmul.f32 %v2809_v63, %v8453_v46  ;;  %v2819_v53 = vsel %vm1275_vm5, %v7280_v41, %v7254_v25 }
 0x609   : > { %4117 = vmatpush1.bf16.msra.mxu1 %v4116_v58  ;;  %v2825_v58 = vmul.f32 %v2807_v5, %v8453_v46  ;;  %v4126_v18 = vpack.c.bf16 %v2828_v48, %v2826_v4  ;;  %v2877_v5 = vsel %vm1351_vm6, %v7343_v3, %v7313_v44  ;;  %v2811_v4 = vsel %vm1275_vm5, %v7254_v25, %v7280_v41  ;;  %v8454_v25 = vld [vmem:[#allocation29_spill] sm:$0xff] }
 0x60a   : > { %v7404_v28 = vpop.permute.xlu0 %2851  ;;  %4119 = vmatprep.subr.bf16.mxu1 %v4118_v61  ;;  %v7411_v12 = vpop.permute.xlu1 %2845  ;;  %v2810_v61 = vsel %vm1275_vm5, %v7172_v24, %v7212_v27  ;;  %v4130_v1 = vpack.c.bf16 %v2832_v43, %v2830_v31  ;;  %v2878_v55 = vsel %vm1351_vm6, %v7250_v32, %v7232_v33  ;;  %v2886_v41 = vmul.f32 %v2877_v5, %v8454_v25 }
 0x60b   : > { %v4128_v49 = vpack.c.bf16 %v2827_v34, %v2825_v58  ;;  %v2833_v58 = vmul.f32 %v2811_v4, %v8453_v46  ;;  %v2879_v63 = vsel %vm1351_vm6, %v7387_v16, %v7364_v6  ;;  %v2870_v31 = vsel %vm1351_vm6, %v7232_v33, %v7250_v32 }
 0x60c   : > { %v2890_v33 = vmul.f32 %v2879_v63, %v8454_v25 }
 0x60d   : > { %4121 = vmatpush1.bf16.msra.mxu1 %v4120_v52  ;;  %v2831_v52 = vmul.f32 %v2810_v61, %v8453_v46 }
 0x60e   : > { %v7428_v51 = vpop.permute.xlu0 %2903  ;;  %4123 = vmatprep.subr.bf16.mxu1 %v4122_v42  ;;  %v2862_v8 = vpop.permute.xlu1 %2861  ;;  %v2834_v42 = vmul.f32 %v2819_v53, %v8452_v0 }
 0x60f   : > { %v2881_v53 = vsel %vm1351_vm6, %v2862_v8, %v7411_v12  ;;  %v2873_v5 = vsel %vm1351_vm6, %v7411_v12, %v2862_v8 }
 0x610   : > { %v2894_v4 = vmul.f32 %v2881_v53, %v8454_v25 }
 0x611   : > { %4125 = vmatpush1.bf16.msra.mxu1 %v4124_v2  ;;  %v2869_v2 = vsel %vm1351_vm6, %v7313_v44, %v7343_v3  ;;  %v2880_v44 = vsel %vm1351_vm6, %v7306_v35, %v7272_v17  ;;  %v8455_v3 = vld [vmem:[#allocation28_spill] sm:$0xff] }
 0x612   : > { %v2804_v14 = vpop.permute.xlu0 %2803  ;;  %4127 = vmatprep.subr.bf16.mxu1 %v4126_v18  ;;  %v7454_v15 = vpop.permute.xlu1 %2849  ;;  %v2888_v18 = vmul.f32 %v2878_v55, %v8454_v25  ;;  %v2885_v61 = vmul.f32 %v2869_v2, %v8455_v3  ;;  %v2893_v2 = vmul.f32 %v2873_v5, %v8455_v3 }
 0x613   : > { %v2820_v20 = vsel %vm1275_vm5, %v2804_v14, %v7220_v36  ;;  %v2812_v24 = vsel %vm1275_vm5, %v7220_v36, %v2804_v14  ;;  %v4132_v36 = vpack.c.bf16 %v2831_v52, %v2829_v56  ;;  %v2887_v56 = vmul.f32 %v2870_v31, %v8455_v3 }
 0x614   : > { %v2836_v27 = vmul.f32 %v2820_v20, %v8452_v0  ;;  %v2835_v37 = vmul.f32 %v2812_v24, %v8453_v46  ;;  %v4138_v32 = vpack.c.bf16 %v2888_v18, %v2886_v41  ;;  %v2872_v20 = vsel %vm1351_vm6, %v7272_v17, %v7306_v35 }
 0x615   : > { %4129 = vmatpush1.bf16.msra.mxu1 %v4128_v49  ;;  %v2871_v49 = vsel %vm1351_vm6, %v7364_v6, %v7387_v16  ;;  %v2892_v24 = vmul.f32 %v2880_v44, %v8454_v25  ;;  %v4140_v6 = vpack.c.bf16 %v2887_v56, %v2885_v61  ;;  %v2882_v16 = vsel %vm1351_vm6, %v7380_v13, %v7336_v62 }
 0x616   : > { %v7470_v39 = vpop.permute.xlu0 %2919  ;;  %4131 = vmatprep.subr.bf16.mxu1 %v4130_v1  ;;  %v2866_v48 = vpop.permute.xlu1 %2865  ;;  %v4134_v60 = vpack.c.bf16 %v2836_v27, %v2834_v42  ;;  %v4136_v43 = vpack.c.bf16 %v2835_v37, %v2833_v58  ;;  %v2889_v1 = vmul.f32 %v2871_v49, %v8455_v3  ;;  %v2891_v35 = vmul.f32 %v2872_v20, %v8455_v3 }
 0x617   : > { %v4142_v17 = vpack.c.bf16 %v2892_v24, %v2890_v33  ;;  %v2874_v42 = vsel %vm1351_vm6, %v7336_v62, %v7380_v13  ;;  %v2883_v12 = vsel %vm1351_vm6, %v2866_v48, %v7454_v15  ;;  %v2875_v31 = vsel %vm1351_vm6, %v7454_v15, %v2866_v48 }
 0x618   : > { %v4144_v37 = vpack.c.bf16 %v2891_v35, %v2889_v1  ;;  %v2895_v58 = vmul.f32 %v2874_v42, %v8455_v3  ;;  %v2898_v18 = vmul.f32 %v2883_v12, %v8454_v25  ;;  %v2897_v15 = vmul.f32 %v2875_v31, %v8455_v3 }
 0x619   : > { %4133 = vmatpush1.bf16.msra.mxu1 %v4132_v36  ;;  %v2896_v36 = vmul.f32 %v2882_v16, %v8454_v25  ;;  %v2934_v20 = vsel %vm1427_vm7, %v7428_v51, %v7470_v39  ;;  %v8457_v16 = vld [vmem:[#allocation30_spill] sm:$0xff] }
 0x61a   : > { %v7492_v34 = vpop.permute.xlu0 %2907  ;;  %4135 = vmatprep.subr.bf16.mxu1 %v4134_v60  ;;  %v2902_v14 = vpop.permute.xlu1 %2901  ;;  %v4148_v61 = vpack.c.bf16 %v2895_v58, %v2893_v2 }
 0x61b   : > { %v4146_v60 = vpack.c.bf16 %v2896_v36, %v2894_v4 }
 0x61d   : > { %4137 = vmatpush1.bf16.msra.mxu1 %v4136_v43 }
 0x61e   : > { %v2924_v27 = vpop.permute.xlu0 %2923  ;;  %4139 = vmatprep.subr.bf16.mxu1 %v4138_v32  ;;  %v2918_v52 = vpop.permute.xlu1 %2917  ;;  %v8456_v32 = vld [vmem:[#allocation31_spill] sm:$0xff] }
 0x61f   : > { %v2941_v63 = vsel %vm1427_vm7, %v2918_v52, %v2902_v14  ;;  %v2933_v33 = vsel %vm1427_vm7, %v2902_v14, %v2918_v52  ;;  %v2944_v14 = vsel %vm1427_vm7, %v2924_v27, %v7492_v34 }
 0x620   : > { %v2950_v56 = vmul.f32 %v2941_v63, %v8456_v32  ;;  %v2949_v1 = vmul.f32 %v2933_v33, %v8457_v16  ;;  %v2956_v42 = vmul.f32 %v2944_v14, %v8456_v32  ;;  %v4513_v14 = vld [vmem:[%s8167_s7 + $0x60] sm:$0xff] }
 0x621   : > { %4141 = vmatpush1.bf16.msra.mxu1 %v4140_v6 }
 0x622   : > { %v2868_v55 = vpop.permute.xlu0 %2867  ;;  %4143 = vmatprep.subr.bf16.mxu1 %v4142_v17  ;;  %v2906_v41 = vpop.permute.xlu1 %2905 }
 0x623   : > { %v2884_v8 = vsel %vm1351_vm6, %v2868_v55, %v7404_v28  ;;  %v2876_v62 = vsel %vm1351_vm6, %v7404_v28, %v2868_v55  ;;  %v2942_v28 = vsel %vm1427_vm7, %v7470_v39, %v7428_v51  ;;  %v2951_v51 = vmul.f32 %v2934_v20, %v8457_v16 }
 0x624   : > { %v2900_v13 = vmul.f32 %v2884_v8, %v8454_v25  ;;  %v2899_v43 = vmul.f32 %v2876_v62, %v8455_v3  ;;  %v2952_v24 = vmul.f32 %v2942_v28, %v8456_v32  ;;  %v2936_v39 = vsel %vm1427_vm7, %v7492_v34, %v2924_v27  ;;  %v4509_v34 = vld [vmem:[%s8167_s7 + $0x10] sm:$0xff] }
 0x625   : > { %4145 = vmatpush1.bf16.msra.mxu1 %v4144_v37  ;;  %v4156_v55 = vpack.c.bf16 %v2951_v51, %v2949_v1  ;;  %v2955_v62 = vmul.f32 %v2936_v39, %v8457_v16  ;;  %v4515_v51 = vld [vmem:[%s8167_s7 + $0x88] sm:$0xff]  ;;  %v8458_v39 = vmov 0.0  }
 0x626   : > { %v2912_v44 = vpop.permute.xlu0 %2911  ;;  %4147 = vmatprep.subr.bf16.mxu1 %v4146_v60  ;;  %v2922_v49 = vpop.permute.xlu1 %2921  ;;  %v4150_v53 = vpack.c.bf16 %v2900_v13, %v2898_v18  ;;  %v4152_v52 = vpack.c.bf16 %v2899_v43, %v2897_v15  ;;  %v4154_v35 = vpack.c.bf16 %v2952_v24, %v2950_v56  ;;  %v4510_v60 = vld [vmem:[%s8167_s7 + $0x40] sm:$0xff]  ;;  %v4511_v43 = vld [vmem:[%s8167_s7 + $0x38] sm:$0xff] }
 0x627   : > { %v2943_v48 = vsel %vm1427_vm7, %v2922_v49, %v2906_v41  ;;  %v2935_v4 = vsel %vm1427_vm7, %v2906_v41, %v2922_v49 }
 0x628   : > { %v2954_v17 = vmul.f32 %v2943_v48, %v8456_v32  ;;  %v2953_v37 = vmul.f32 %v2935_v4, %v8457_v16  ;;  %v4514_v4 = vld [vmem:[%s8167_s7 + $0x90] sm:$0xff] }
 0x629   : > { %4149 = vmatpush1.bf16.msra.mxu1 %v4148_v61 }
 0x62a   : > { %v2928_v6 = vpop.permute.xlu0 %2927  ;;  %4151 = vmatprep.subr.bf16.mxu1 %v4150_v53  ;;  %v2910_v5 = vpop.permute.xlu1 %2909  ;;  %v4158_v27 = vpack.c.bf16 %v2956_v42, %v2954_v17  ;;  %v4160_v18 = vpack.c.bf16 %v2955_v62, %v2953_v37  ;;  %v4516_v42 = vld [vmem:[%s8167_s7 + $0x20] sm:$0xff]  ;;  %v4519_v37 = vld [vmem:[%s8167_s7 + $0x98] sm:$0xff] }
 0x62b   : > { %v2946_v2 = vsel %vm1427_vm7, %v2928_v6, %v2912_v44  ;;  %v2938_v58 = vsel %vm1427_vm7, %v2912_v44, %v2928_v6  ;;  %v4512_v44 = vld [vmem:[%s8167_s7 + $0x68] sm:$0xff] }
 0x62c   : > { %v2960_v63 = vmul.f32 %v2946_v2, %v8456_v32  ;;  %v2959_v33 = vmul.f32 %v2938_v58, %v8457_v16 }
 0x62d   : > { %4153 = vmatpush1.bf16.msra.mxu1 %v4152_v52 }
 0x62e   : > { %v2916_v36 = vpop.permute.xlu0 %2915  ;;  %4155 = vmatprep.subr.bf16.mxu1 %v4154_v35 }
 0x62f   : > { %v2926_v12 = vpop.permute.xlu1 %2925 }
 0x630   : > { %v2937_v8 = vsel %vm1427_vm7, %v2910_v5, %v2926_v12  ;;  %v2945_v41 = vsel %vm1427_vm7, %v2926_v12, %v2910_v5  ;;  %3119 = vmatmul.mubr.f32.vlgmr.msra.gmra.mrb[16].mxu1 %v4509_v34  ;;  %v8459_v12 = vld [vmem:[#allocation32_spill] sm:$0xff] }
 0x631   : > { %v2958_v13 = vmul.f32 %v2945_v41, %v8456_v32  ;;  %4157 = vmatpush1.bf16.msra.mxu1 %v4156_v55  ;;  %3124 = vmatprep.mubr.f32.mxu1 %v4510_v60  ;;  %v2957_v61 = vmul.f32 %v2937_v8, %v8457_v16  ;;  %v4518_v55 = vld [vmem:[%s8167_s7 + $0x70] sm:$0xff] }
 0x632   : > { %v2932_v31 = vpop.permute.xlu0 %2931  ;;  %4159 = vmatprep.subr.bf16.mxu1 %v4158_v27 }
 0x633   : > { %v2914_v28 = vpop.permute.xlu1 %2913  ;;  %v4162_v49 = vpack.c.bf16 %v2960_v63, %v2958_v13  ;;  %v2940_v56 = vsel %vm1427_vm7, %v2916_v36, %v2932_v31  ;;  %v2948_v53 = vsel %vm1427_vm7, %v2932_v31, %v2916_v36  ;;  %v4164_v15 = vpack.c.bf16 %v2959_v33, %v2957_v61  ;;  %v4517_v36 = vld [vmem:[%s8167_s7 + $0x48] sm:$0xff]  ;;  %v8460_v13 = vld [vmem:[#allocation33_spill] sm:$0xff] }
 0x634   : > { %3125 = vmatmul.mubr.f32.gmra.mrb[18].mxu1 %v4511_v43  ;;  %v2963_v20 = vmul.f32 %v2940_v56, %v8457_v16  ;;  %v2964_v1 = vmul.f32 %v2948_v53, %v8456_v32  ;;  %v8461_v53 = vld [vmem:[#allocation34_spill] sm:$0xff] }
 0x635   : > { %4161 = vmatpush1.bf16.msra.mxu1 %v4160_v18  ;;  %3130 = vmatprep.mubr.f32.mxu1 %v4512_v44 }
 0x636   : > { %4163 = vmatprep.subr.bf16.mxu1 %v4162_v49 }
 0x637   : > { %v2930_v48 = vpop.permute.xlu1 %2929 }
 0x638   : > { %v2939_v24 = vsel %vm1427_vm7, %v2914_v28, %v2930_v48  ;;  %v2947_v6 = vsel %vm1427_vm7, %v2930_v48, %v2914_v28  ;;  %3131 = vmatmul.mubr.f32.gmra.mrb[20].mxu1 %v4513_v14  ;;  %v8462_v14 = vld [vmem:[#allocation35_spill] sm:$0xff] }
 0x639   : > { %v2961_v52 = vmul.f32 %v2939_v24, %v8457_v16  ;;  %v2962_v5 = vmul.f32 %v2947_v6, %v8456_v32  ;;  %4165 = vmatpush1.bf16.msra.mxu1 %v4164_v15  ;;  %3136 = vmatprep.mubr.f32.mxu1 %v4514_v4 }
 0x63b   : > { %v4168_v17 = vpack.c.bf16 %v2963_v20, %v2961_v52  ;;  %v4166_v35 = vpack.c.bf16 %v2964_v1, %v2962_v5 }
 0x63c   : > { %3137 = vmatmul.mubr.f32.gmra.mrb[22].mxu1 %v4515_v51 }
 0x63d   : > { %4167 = vmatprep.subr.bf16.mxu1 %v4166_v35  ;;  %3207 = vmatprep.mubr.f32.mxu1 %v8458_v39 }
 0x63e   : > { %4169 = vmatpush1.bf16.msra.mxu1 %v4168_v17 }
 0x641   : > { %3806 = vmatmul.mubr.msk.f32.vlgmr.msra.gmra.mrb[16].mxu1 %vm1491_vm8, %v4516_v42  ;;  %v2233_v42 = vadd.f32 %v8433_v21, %v8436_v40 }
 0x642   : > { %3213 = vmatprep.mubr.f32.mxu1 %v8458_v39 }
 0x645   : > { %3807 = vmatmul.mubr.msk.f32.gmra.mrb[18].mxu1 %vm1491_vm8, %v4517_v36 }
 0x646   : > { %3219 = vmatprep.mubr.f32.mxu1 %v8458_v39 }
 0x649   : > { %3808 = vmatmul.mubr.msk.f32.gmra.mrb[20].mxu1 %vm1491_vm8, %v4518_v55  ;;  %v2265_v55 = vsel %vm5981_vm11, %v8436_v40, -3.4028235e+38 }
 0x64a   : > { %3225 = vmatprep.mubr.f32.mxu1 %v8458_v39  ;;  %v2236_v39 = vadd.f32 %v8434_v23, %v8438_v7 }
 0x64d   : > { %3809 = vmatmul.mubr.msk.f32.gmra.mrb[22].mxu1 %vm1491_vm8, %v4519_v37 }
 0x714   : > { %v3209_v2 = vpop.f32.mrb[16].mxu1 }
 0x715   : > { %v4218_v8 = vadd.f32 %v3209_v2, %v8459_v12  ;;  %v3211_v41 = vpop.f32.mrb[17].mxu1  ;;  %v2266_v2 = vsel %vm5985_vm12, %v8433_v21, -3.4028235e+38  ;;  %v2269_v21 = vsel %vm5981_vm11, %v8440_v47, -3.4028235e+38 }
 0x716   : > { %v4219_v34 = vadd.f32 %v3211_v41, %v8459_v12  ;;  %v2239_v12 = vadd.f32 %v8437_v10, %v8440_v47  ;;  %v2267_v41 = vsel %vm5981_vm11, %v8438_v7, -3.4028235e+38 }
 0x717   : > { %v3232_v27 = vmax.f32 %v4218_v8, 0.0  ;;  %v2281_v8 = vmax.f32 %v2265_v55, %v2266_v2 }
 0x718   : > { %v3215_v62 = vpop.f32.mrb[18].mxu1  ;;  %v3233_v63 = vmax.f32 %v4219_v34, 0.0  ;;  %v2268_v34 = vsel %vm5985_vm12, %v8434_v23, -3.4028235e+38  ;;  %v2245_v23 = vadd.f32 %v6608_v59, %v6576_v30 }
 0x719   : > { %v4220_v60 = vadd.f32 %v3215_v62, %v8460_v13  ;;  %v3217_v58 = vpop.f32.mrb[19].mxu1  ;;  %3240 = vrot.lane.b32.xlu1 %v3232_v27, %s8378_s2  ;;  %v7649_v49 = vmul.f32 %v3232_v27, %v8435_v38  ;;  %v2284_v40 = vmax.f32 %v2267_v41, %v2268_v34  ;;  %v2270_v62 = vsel %vm5985_vm12, %v8437_v10, -3.4028235e+38 }
 0x71a   : > { %v4221_v31 = vadd.f32 %v3217_v58, %v8460_v13  ;;  %v7655_v56 = vmul.f32 %v3233_v63, %v8432_v45  ;;  %v2287_v7 = vmax.f32 %v2269_v21, %v2270_v62  ;;  %v2271_v13 = vsel %vm5981_vm11, %v8441_v26, -3.4028235e+38  ;;  %v8468_v21 = vld [vmem:[#allocation14_spill] sm:$0xff] }
 0x71b   : > { %v3234_v18 = vmax.f32 %v4220_v60, 0.0  ;;  %v2272_v60 = vsel %vm5985_vm12, %v8439_v11, -3.4028235e+38  ;;  %v2248_v10 = vadd.f32 %v6601_v22, %v8444_v54  ;;  %v2273_v58 = vsel %vm5981_vm11, %v6576_v30, -3.4028235e+38 }
 0x71c   : > { %v3235_v61 = vmax.f32 %v4221_v31, 0.0  ;;  %v3221_v28 = vpop.f32.mrb[20].mxu1  ;;  %v2290_v47 = vmax.f32 %v2271_v13, %v2272_v60 }
 0x71d   : > { %v3223_v43 = vpop.f32.mrb[21].mxu1  ;;  %3242 = vrot.lane.b32.xlu0 %v3234_v18, %s8378_s2  ;;  %3256 = vrot.lane.b32.xlu1 %v3232_v27, %s8380_s8  ;;  %v7652_v33 = vmul.f32 %v3234_v18, %v8435_v38  ;;  %v4222_v15 = vadd.f32 %v3221_v28, %v8461_v53 }
 0x71e   : > { %v7658_v44 = vmul.f32 %v3235_v61, %v8432_v45  ;;  %v4223_v20 = vadd.f32 %v3223_v43, %v8461_v53  ;;  %v8465_v43 = vld [vmem:[#allocation69_spill] sm:$0xff]  ;;  %v8466_v53 = vld [vmem:[#allocation72_spill] sm:$0xff] }
 0x71f   : > { %v4188_v48 = vpack.c.bf16 %v7652_v33, %v7649_v49  ;;  %v3236_v52 = vmax.f32 %v4222_v15, 0.0  ;;  %v2254_v15 = vadd.f32 %v8466_v53, %v8465_v43 }
 0x720   : > { %v3227_v24 = vpop.f32.mrb[22].mxu1  ;;  %v4186_v6 = vpack.c.bf16 %v7658_v44, %v7655_v56  ;;  %v3237_v4 = vmax.f32 %v4223_v20, 0.0  ;;  %v2277_v20 = vsel %vm5981_vm11, %v6638_v9, -3.4028235e+38 }
 0x721   : > { %v4224_v38 = vadd.f32 %v3227_v24, %v8462_v14  ;;  %v3229_v1 = vpop.f32.mrb[23].mxu1  ;;  %3258 = vrot.lane.b32.xlu0 %v3234_v18, %s8380_s8  ;;  %3272 = vrot.lane.b32.xlu1 %v3232_v27, %s8381_s0  ;;  %v2280_v24 = vsel %vm5985_vm12, %v8466_v53, -3.4028235e+38 }
 0x722   : > { %v4225_v45 = vadd.f32 %v3229_v1, %v8462_v14 }
 0x723   : > { %v3238_v5 = vmax.f32 %v4224_v38, 0.0 }
 0x724   : > { %v3239_v17 = vmax.f32 %v4225_v45, 0.0 }
 0x725   : > { %v7670_v35 = vpack.c.bf16 %v3238_v5, %v3236_v52  ;;  %3274 = vrot.lane.b32.xlu0 %v3234_v18, %s8381_s0  ;;  %3288 = vrot.lane.b32.xlu1 %v3232_v27, %s8383_s1 }
 0x726   : > { %v7674_v51 = vpack.c.bf16 %v3239_v17, %v3237_v4 }
 0x729   : > { %3290 = vrot.lane.b32.xlu0 %v3234_v18, %s8383_s1  ;;  %3308 = vrot.lane.b32.xlu1 %v3232_v27, %s8361_s22 }
 0x72d   : > { %3310 = vrot.lane.b32.xlu0 %v3234_v18, %s8361_s22  ;;  %3324 = vrot.lane.b32.xlu1 %v3232_v27, %s8362_s11 }
 0x731   : > { %3326 = vrot.lane.b32.xlu0 %v3234_v18, %s8362_s11  ;;  %3340 = vrot.lane.b32.xlu1 %v3232_v27, %s8363_s12 }
 0x735   : > { %3342 = vrot.lane.b32.xlu0 %v3234_v18, %s8363_s12  ;;  %3244 = vrot.lane.b32.xlu1 %v3233_v63, %s8378_s2 }
 0x739   : > { %3246 = vrot.lane.b32.xlu0 %v3235_v61, %s8378_s2  ;;  %3260 = vrot.lane.b32.xlu1 %v3233_v63, %s8380_s8 }
 0x73d   : > { %3262 = vrot.lane.b32.xlu0 %v3235_v61, %s8380_s8  ;;  %3276 = vrot.lane.b32.xlu1 %v3233_v63, %s8381_s0 }
 0x741   : > { %3278 = vrot.lane.b32.xlu0 %v3235_v61, %s8381_s0  ;;  %3292 = vrot.lane.b32.xlu1 %v3233_v63, %s8383_s1 }
 0x745   : > { %3294 = vrot.lane.b32.xlu0 %v3235_v61, %s8383_s1  ;;  %3356 = vrot.lane.b32.xlu1 %v3232_v27, %s8364_s26  ;;  %v2242_v27 = vadd.f32 %v8439_v11, %v8441_v26  ;;  %v2251_v11 = vadd.f32 %v6674_v29, %v6638_v9 }
 0x749   : > { %3358 = vrot.lane.b32.xlu0 %v3234_v18, %s8364_s26  ;;  %3312 = vrot.lane.b32.xlu1 %v3233_v63, %s8361_s22  ;;  %v2275_v18 = vsel %vm5981_vm11, %v8444_v54, -3.4028235e+38  ;;  %v2278_v54 = vsel %vm5985_vm12, %v6674_v29, -3.4028235e+38 }
 0x74a   : > { %v2299_v14 = vmax.f32 %v2277_v20, %v2278_v54 }
 0x74d   : > { %3314 = vrot.lane.b32.xlu0 %v3235_v61, %s8361_s22  ;;  %3328 = vrot.lane.b32.xlu1 %v3233_v63, %s8362_s11  ;;  %s8500_s22 = sld [smem:[#allocation91_spill]] }
 0x751   : > { %3330 = vrot.lane.b32.xlu0 %v3235_v61, %s8362_s11  ;;  %3344 = vrot.lane.b32.xlu1 %v3233_v63, %s8363_s12 }
 0x753   : > { %s8110_s11 = scalar_lea.hbm %s8500_s22, %s3841_s25 }
 0x755   : > { %3346 = vrot.lane.b32.xlu0 %v3235_v61, %s8363_s12  ;;  %3360 = vrot.lane.b32.xlu1 %v3233_v63, %s8364_s26  ;;  %v2274_v63 = vsel %vm5985_vm12, %v6608_v59, -3.4028235e+38  ;;  %s4669_s12 = scalar_lea.vmem %s8113_s23, 2048 }
 0x756   : > { %v2293_v26 = vmax.f32 %v2273_v58, %v2274_v63  ;;  %p4670_p0 = scmp.ne.s32.totalorder %s8113_s23, %s4669_s12 }
 0x758   : > { %p4671_p3 = pnand %p4670_p0, %p8501_p2 }
 0x759   : > { %3362 = vrot.lane.b32.xlu0 %v3235_v61, %s8364_s26  ;;  %v2276_v61 = vsel %vm5985_vm12, %v6601_v22, -3.4028235e+38  ;;  %v2279_v22 = vsel %vm5981_vm11, %v8465_v43, -3.4028235e+38  ;;  %s4756_s26 = smov [#allocation8]  }
 0x75a   : > { %v2296_v30 = vmax.f32 %v2275_v18, %v2276_v61  ;;  %v2302_v45 = vmax.f32 %v2279_v22, %v2280_v24  ;;  %v8470_v61 = vld [vmem:[#allocation17_spill] sm:$0xff]  ;;  %p4672_p7 = pneg %p4671_p3  ;;  %s4673_s2 = sshll.u32 %s4756_s26, 4  ;;  %s4674_s2 = int_to_ptr.vmem [resolvable:$false] %s4673_s2 }
 0x75b   : > { %s4675_s0 = scalar_lea.vmem %s4674_s2, 4096  ;;  %p4676_p9 = scmp.lt.s32.totalorder %s8113_s23, %s4674_s2 }
 0x75c   : > { %p4677_p12 = scmp.lt.s32.totalorder %s4675_s0, %s4669_s12 }
 0x75e   : > { %p4678_p1 = por %p4677_p12, %p4676_p9 }
 0x760   : > { %p4679_p13 = pnand %p4678_p1, %p4672_p7 }
 0x778   : > { %2237 = vadd.xlane.f32.xlu0 %v2236_v39 }
 0x779   : > { %2234 = vadd.xlane.f32.xlu1 %v2233_v42 }
 0x77c   : > { %2240 = vadd.xlane.f32.xlu0 %v2239_v12 }
 0x77d   : > { %2282 = vmax.xlane.f32.xlu1 %v2281_v8 }
 0x780   : > { %2285 = vmax.xlane.f32.xlu0 %v2284_v40  ;;  %v8467_v40 = vld [vmem:[#allocation15_spill] sm:$0xff] }
 0x781   : > { %2243 = vadd.xlane.f32.xlu1 %v2242_v27 }
 0x784   : > { %2288 = vmax.xlane.f32.xlu0 %v2287_v7 }
 0x785   : > { %2246 = vadd.xlane.f32.xlu1 %v2245_v23 }
 0x788   : > { %2291 = vmax.xlane.f32.xlu0 %v2290_v47 }
 0x789   : > { %2249 = vadd.xlane.f32.xlu1 %v2248_v10 }
 0x78b   : > { %v3241_v31 = vpop.permute.xlu1 %3240 }
 0x78c   : > { %2294 = vmax.xlane.f32.xlu0 %v2293_v26 }
 0x78d   : > { %2252 = vadd.xlane.f32.xlu1 %v2251_v11  ;;  %v8469_v11 = vld [vmem:[#allocation16_spill] sm:$0xff] }
 0x78f   : > { %v3243_v28 = vpop.permute.xlu0 %3242  ;;  %v3257_v59 = vpop.permute.xlu1 %3256 }
 0x790   : > { %2297 = vmax.xlane.f32.xlu0 %v2296_v30 }
 0x791   : > { %2255 = vadd.xlane.f32.xlu1 %v2254_v15 }
 0x793   : > { %v3259_v38 = vpop.permute.xlu0 %3258  ;;  %v3273_v1 = vpop.permute.xlu1 %3272 }
 0x794   : > { %2300 = vmax.xlane.f32.xlu0 %v2299_v14 }
 0x795   : > { %2303 = vmax.xlane.f32.xlu1 %v2302_v45 }
 0x797   : > { %v3275_v9 = vpop.permute.xlu0 %3274  ;;  %v3289_v52 = vpop.permute.xlu1 %3288 }
 0x79b   : > { %v3291_v5 = vpop.permute.xlu0 %3290  ;;  %v7765_v29 = vpop.permute.xlu1 %3308 }
 0x79f   : > { %v7767_v4 = vpop.permute.xlu0 %3310  ;;  %v7769_v17 = vpop.permute.xlu1 %3324 }
 0x7a3   : > { %v7771_v39 = vpop.permute.xlu0 %3326  ;;  %v7773_v42 = vpop.permute.xlu1 %3340 }
 0x7a7   : > { %v7775_v36 = vpop.permute.xlu0 %3342  ;;  %v3245_v55 = vpop.permute.xlu1 %3244 }
 0x7a8   : > { %v3248_v37 = vsel %vm868_vm0, %v3241_v31, %v3245_v55  ;;  %v3250_v2 = vsel %vm868_vm0, %v3245_v55, %v3241_v31  ;;  %v8472_v55 = vld [vmem:[#allocation19_spill] sm:$0xff] }
 0x7a9   : > { %v3252_v27 = vmul.f32 %v3250_v2, %v8467_v40  ;;  %v3253_v62 = vmul.f32 %v3248_v37, %v8468_v21 }
 0x7ab   : > { %v3247_v12 = vpop.permute.xlu0 %3246  ;;  %v3261_v8 = vpop.permute.xlu1 %3260 }
 0x7ac   : > { %v3249_v41 = vsel %vm868_vm0, %v3243_v28, %v3247_v12  ;;  %v3251_v34 = vsel %vm868_vm0, %v3247_v12, %v3243_v28  ;;  %v3264_v13 = vsel %vm944_vm1, %v3257_v59, %v3261_v8  ;;  %v3266_v60 = vsel %vm944_vm1, %v3261_v8, %v3257_v59 }
 0x7ad   : > { %v3254_v7 = vmul.f32 %v3251_v34, %v8467_v40  ;;  %v3255_v23 = vmul.f32 %v3249_v41, %v8468_v21  ;;  %v3268_v18 = vmul.f32 %v3266_v60, %v8469_v11  ;;  %v3269_v30 = vmul.f32 %v3264_v13, %v8470_v61 }
 0x7af   : > { %v4172_v47 = vpack.c.bf16 %v3254_v7, %v3252_v27  ;;  %v3263_v10 = vpop.permute.xlu0 %3262  ;;  %v3277_v58 = vpop.permute.xlu1 %3276  ;;  %v4170_v63 = vpack.c.bf16 %v3255_v23, %v3253_v62  ;;  %v8473_v62 = vld [vmem:[#allocation20_spill] sm:$0xff]  ;;  %v8474_v23 = vld [vmem:[#allocation21_spill] sm:$0xff] }
 0x7b0   : > { %v3265_v26 = vsel %vm944_vm1, %v3259_v38, %v3263_v10  ;;  %v3267_v31 = vsel %vm944_vm1, %v3263_v10, %v3259_v38  ;;  %v3280_v59 = vsel %vm1020_vm2, %v3273_v1, %v3277_v58  ;;  %v3282_v53 = vsel %vm1020_vm2, %v3277_v58, %v3273_v1  ;;  %v8471_v38 = vld [vmem:[#allocation18_spill] sm:$0xff] }
 0x7b1   : > { %v3270_v28 = vmul.f32 %v3267_v31, %v8469_v11  ;;  %v3271_v43 = vmul.f32 %v3265_v26, %v8470_v61  ;;  %4171 = vmatprep.subr.bf16.mxu0 %v4170_v63  ;;  %v3284_v45 = vmul.f32 %v3282_v53, %v8471_v38  ;;  %v3285_v37 = vmul.f32 %v3280_v59, %v8472_v55 }
 0x7b2   : > { %4173 = vmatpush1.bf16.msra.mxu0 %v4172_v47 }
 0x7b3   : > { %v4176_v15 = vpack.c.bf16 %v3270_v28, %v3268_v18  ;;  %v3279_v20 = vpop.permute.xlu0 %3278  ;;  %v3293_v54 = vpop.permute.xlu1 %3292  ;;  %v4174_v22 = vpack.c.bf16 %v3271_v43, %v3269_v30 }
 0x7b4   : > { %v3281_v24 = vsel %vm1020_vm2, %v3275_v9, %v3279_v20  ;;  %v3283_v14 = vsel %vm1020_vm2, %v3279_v20, %v3275_v9  ;;  %v3296_v1 = vsel %vm1096_vm3, %v3289_v52, %v3293_v54  ;;  %v3298_v8 = vsel %vm1096_vm3, %v3293_v54, %v3289_v52 }
 0x7b5   : > { %v3286_v2 = vmul.f32 %v3283_v14, %v8471_v38  ;;  %v3287_v12 = vmul.f32 %v3281_v24, %v8472_v55  ;;  %4175 = vmatprep.subr.bf16.mxu0 %v4174_v22  ;;  %v3300_v7 = vmul.f32 %v3298_v8, %v8473_v62  ;;  %v3301_v13 = vmul.f32 %v3296_v1, %v8474_v23 }
 0x7b6   : > { %4177 = vmatpush1.bf16.msra.mxu0 %v4176_v15 }
 0x7b7   : > { %v4180_v41 = vpack.c.bf16 %v3286_v2, %v3284_v45  ;;  %v3295_v34 = vpop.permute.xlu0 %3294  ;;  %v3357_v40 = vpop.permute.xlu1 %3356  ;;  %v4178_v9 = vpack.c.bf16 %v3287_v12, %v3285_v37 }
 0x7b8   : > { %v3297_v27 = vsel %vm1096_vm3, %v3291_v5, %v3295_v34  ;;  %v3299_v21 = vsel %vm1096_vm3, %v3295_v34, %v3291_v5 }
 0x7b9   : > { %v3302_v60 = vmul.f32 %v3299_v21, %v8473_v62  ;;  %v3303_v47 = vmul.f32 %v3297_v27, %v8474_v23  ;;  %4179 = vmatprep.subr.bf16.mxu0 %v4178_v9  ;;  %v4521_v27 = vld [vmem:[#allocation7 + $0x18] sm:$0xff]  ;;  %v4522_v21 = vld [vmem:[#allocation7 + $0x10] sm:$0xff] }
 0x7ba   : > { %4181 = vmatpush1.bf16.msra.mxu0 %v4180_v41  ;;  %v4525_v62 = vld [vmem:[#allocation7 + $0x38] sm:$0xff] }
 0x7bb   : > { %v4184_v52 = vpack.c.bf16 %v3302_v60, %v3300_v7  ;;  %v3359_v10 = vpop.permute.xlu0 %3358  ;;  %v3313_v58 = vpop.permute.xlu1 %3312  ;;  %v4182_v63 = vpack.c.bf16 %v3303_v47, %v3301_v13  ;;  %v4526_v7 = vld [vmem:[#allocation7 + $0x30] sm:$0xff]  ;;  %v4529_v23 = vld [vmem:[#allocation7 + $0x58] sm:$0xff]  ;;  %v4531_v60 = vld [vmem:[#allocation7 + $0x68] sm:$0xff] }
 0x7bc   : > { %v3316_v26 = vsel %vm1199_vm4, %v7765_v29, %v3313_v58  ;;  %v3318_v5 = vsel %vm1199_vm4, %v3313_v58, %v7765_v29  ;;  %v4530_v13 = vld [vmem:[#allocation7 + $0x50] sm:$0xff]  ;;  %v4532_v47 = vld [vmem:[#allocation7 + $0x60] sm:$0xff] }
 0x7bd   : > { %4183 = vmatprep.subr.bf16.mxu0 %v4182_v63  ;;  %v3320_v30 = vmul.f32 %v3316_v26, %v8449_v19  ;;  %v3321_v28 = vmul.f32 %v3318_v5, %v8447_v57 }
 0x7be   : > { %4185 = vmatpush1.bf16.msra.mxu0 %v4184_v52  ;;  %v4533_v52 = vld [vmem:[#allocation7 + $0x78] sm:$0xff] }
 0x7bf   : > { %v3315_v31 = vpop.permute.xlu0 %3314  ;;  %4187 = vmatprep.subr.bf16.mxu0 %v4186_v6  ;;  %v3329_v11 = vpop.permute.xlu1 %3328 }
 0x7c0   : > { %v3317_v18 = vsel %vm1199_vm4, %v7767_v4, %v3315_v31  ;;  %v3319_v61 = vsel %vm1199_vm4, %v3315_v31, %v7767_v4  ;;  %v3332_v56 = vsel %vm1275_vm5, %v7769_v17, %v3329_v11  ;;  %v3334_v44 = vsel %vm1275_vm5, %v3329_v11, %v7769_v17 }
 0x7c1   : > { %v3322_v29 = vmul.f32 %v3317_v18, %v8449_v19  ;;  %v3323_v43 = vmul.f32 %v3319_v61, %v8447_v57  ;;  %v3336_v15 = vmul.f32 %v3332_v56, %v8453_v46  ;;  %v3337_v17 = vmul.f32 %v3334_v44, %v8452_v0 }
 0x7c2   : > { %4189 = vmatpush1.bf16.msra.mxu0 %v4188_v48 }
 0x7c3   : > { %v4192_v6 = vpack.c.bf16 %v3322_v29, %v3320_v30  ;;  %v3331_v4 = vpop.permute.xlu0 %3330  ;;  %v3345_v59 = vpop.permute.xlu1 %3344  ;;  %v4190_v53 = vpack.c.bf16 %v3323_v43, %v3321_v28  ;;  %v4535_v30 = vld [vmem:[%s8163_s3 + $0x8] sm:$0xff]  ;;  %v4536_v29 = vld [vmem:[%s8163_s3] sm:$0xff] }
 0x7c4   : > { %v3333_v57 = vsel %vm1275_vm5, %v7771_v39, %v3331_v4  ;;  %v3335_v19 = vsel %vm1275_vm5, %v3331_v4, %v7771_v39  ;;  %v3348_v33 = vsel %vm1351_vm6, %v7773_v42, %v3345_v59  ;;  %v3350_v48 = vsel %vm1351_vm6, %v3345_v59, %v7773_v42 }
 0x7c5   : > { %v3338_v20 = vmul.f32 %v3333_v57, %v8453_v46  ;;  %v3339_v49 = vmul.f32 %v3335_v19, %v8452_v0  ;;  %4191 = vmatprep.subr.bf16.mxu0 %v4190_v53  ;;  %v3352_v14 = vmul.f32 %v3348_v33, %v8455_v3  ;;  %v3353_v38 = vmul.f32 %v3350_v48, %v8454_v25  ;;  %v4537_v57 = vld [vmem:[%s8163_s3 + $0x10] sm:$0xff] }
 0x7c6   : > { %4193 = vmatpush1.bf16.msra.mxu0 %v4192_v6 }
 0x7c7   : > { %v4196_v54 = vpack.c.bf16 %v3338_v20, %v3336_v15  ;;  %v3347_v39 = vpop.permute.xlu0 %3346  ;;  %v3361_v22 = vpop.permute.xlu1 %3360  ;;  %v4194_v24 = vpack.c.bf16 %v3339_v49, %v3337_v17  ;;  %v4538_v17 = vld [vmem:[%s8165_s5 + $0x8] sm:$0xff]  ;;  %v4539_v49 = vld [vmem:[%s8163_s3 + $0x18] sm:$0xff] }
 0x7c8   : > { %v3349_v46 = vsel %vm1351_vm6, %v7775_v36, %v3347_v39  ;;  %v3351_v0 = vsel %vm1351_vm6, %v3347_v39, %v7775_v36  ;;  %v3364_v55 = vsel %vm1427_vm7, %v3357_v40, %v3361_v22  ;;  %v3366_v37 = vsel %vm1427_vm7, %v3361_v22, %v3357_v40  ;;  %v4540_v39 = vld [vmem:[%s8165_s5] sm:$0xff] }
 0x7c9   : > { %v3354_v45 = vmul.f32 %v3349_v46, %v8455_v3  ;;  %v3355_v42 = vmul.f32 %v3351_v0, %v8454_v25  ;;  %4195 = vmatprep.subr.bf16.mxu0 %v4194_v24  ;;  %v3368_v3 = vmul.f32 %v3364_v55, %v8457_v16  ;;  %v3369_v25 = vmul.f32 %v3366_v37, %v8456_v32  ;;  %v4541_v24 = vld [vmem:[%s8165_s5 + $0x10] sm:$0xff]  ;;  %v4543_v37 = vld [vmem:[%s8165_s5 + $0x18] sm:$0xff] }
 0x7ca   : > { %4197 = vmatpush1.bf16.msra.mxu0 %v4196_v54 }
 0x7cb   : > { %v4200_v2 = vpack.c.bf16 %v3354_v45, %v3352_v14  ;;  %v3363_v12 = vpop.permute.xlu0 %3362  ;;  %v4198_v1 = vpack.c.bf16 %v3355_v42, %v3353_v38  ;;  %v4542_v38 = vld [vmem:[%s8163_s3 + $0x20] sm:$0xff] }
 0x7cc   : > { %v3365_v36 = vsel %vm1427_vm7, %v3359_v10, %v3363_v12  ;;  %v3367_v8 = vsel %vm1427_vm7, %v3363_v12, %v3359_v10  ;;  %v4534_v10 = vld [vmem:[#allocation7 + $0x70] sm:$0xff] }
 0x7cd   : > { %v3370_v41 = vmul.f32 %v3365_v36, %v8457_v16  ;;  %v3371_v34 = vmul.f32 %v3367_v8, %v8456_v32  ;;  %4199 = vmatprep.subr.bf16.mxu0 %v4198_v1  ;;  %v4523_v16 = vld [vmem:[#allocation7 + $0x28] sm:$0xff]  ;;  %v4524_v32 = vld [vmem:[#allocation7 + $0x20] sm:$0xff] }
 0x7ce   : > { %4201 = vmatpush1.bf16.msra.mxu0 %v4200_v2  ;;  %v4544_v1 = vld [vmem:[%s8163_s3 + $0x28] sm:$0xff] }
 0x7cf   : > { %v4204_v40 = vpack.c.bf16 %v3370_v41, %v3368_v3  ;;  %v4202_v9 = vpack.c.bf16 %v3371_v34, %v3369_v25  ;;  %v4545_v34 = vld [vmem:[%s8165_s5 + $0x20] sm:$0xff] }
 0x7d1   : > { %4203 = vmatprep.subr.bf16.mxu0 %v4202_v9 }
 0x7d2   : > { %4205 = vmatpush1.bf16.msra.mxu0 %v4204_v40 }
 0x7d3   : > { %4207 = vmatprep.subr.bf16.mxu0 %v7674_v51  ;;  %v4527_v51 = vld [vmem:[#allocation7 + $0x48] sm:$0xff] }
 0x7d6   : > { %4209 = vmatpush1.bf16.msra.mxu0 %v7670_v35  ;;  %v4528_v35 = vld [vmem:[#allocation7 + $0x40] sm:$0xff] }
 0x7d9   : > { %3437 = vmatmul.mubr.f32.vlgmr.msra.gmra.mrb[8].mxu0 %v4520_v50 }
 0x7da   : > { %3811 = vmatprep.mubr.msk.f32.mxu0 %vm1951_vm9, %v4521_v27 }
 0x7dd   : > { %3443 = vmatmul.mubr.f32.gmra.mrb[10].mxu0 %v4522_v21 }
 0x7de   : > { %3812 = vmatprep.mubr.msk.f32.mxu0 %vm1951_vm9, %v4523_v16 }
 0x7e1   : > { %3449 = vmatmul.mubr.f32.gmra.mrb[12].mxu0 %v4524_v32 }
 0x7e2   : > { %3813 = vmatprep.mubr.msk.f32.mxu0 %vm1951_vm9, %v4525_v62 }
 0x7e5   : > { %3455 = vmatmul.mubr.f32.gmra.mrb[14].mxu0 %v4526_v7 }
 0x7e6   : > { %3814 = vmatprep.mubr.msk.f32.mxu0 %vm1951_vm9, %v4527_v51  ;;  %v4546_v51 = vld [vmem:[%s8163_s3 + $0x30] sm:$0xff] }
 0x7e9   : > { %3461 = vmatmul.mubr.f32.gmra.mrb[16].mxu0 %v4528_v35 }
 0x7ea   : > { %3815 = vmatprep.mubr.msk.f32.mxu0 %vm1951_vm9, %v4529_v23 }
 0x7ed   : > { %3467 = vmatmul.mubr.f32.gmra.mrb[18].mxu0 %v4530_v13 }
 0x7ee   : > { %3816 = vmatprep.mubr.msk.f32.mxu0 %vm1951_vm9, %v4531_v60 }
 0x7f1   : > { %3473 = vmatmul.mubr.f32.gmra.mrb[20].mxu0 %v4532_v47  ;;  %v4547_v47 = vld [vmem:[%s8165_s5 + $0x28] sm:$0xff] }
 0x7f2   : > { %3817 = vmatprep.mubr.msk.f32.mxu0 %vm1951_vm9, %v4533_v52 }
 0x7f5   : > { %3479 = vmatmul.mubr.f32.gmra.mrb[22].mxu0 %v4534_v10 }
 0x805   : > { %v2238_v58 = vpop.xlane.xlu0 %2237 }
 0x806   : > { %v2235_v63 = vpop.xlane.xlu1 %2234  ;;  %v2258_v31 = vmul.f32 0.00390625, %v2238_v58 }
 0x807   : > { %v2257_v11 = vmul.f32 0.00390625, %v2235_v63 }
 0x808   : > { %v2306_v28 = vmul.f32 %v4535_v30, %v2258_v31 }
 0x809   : > { %v2241_v26 = vpop.xlane.xlu0 %2240  ;;  %v2305_v43 = vmul.f32 %v4536_v29, %v2257_v11  ;;  %v4549_v29 = vld [vmem:[%s8165_s5 + $0x30] sm:$0xff] }
 0x80a   : > { %v2283_v5 = vpop.xlane.xlu1 %2282  ;;  %v2259_v56 = vmul.f32 0.00390625, %v2241_v26  ;;  %v2314_v59 = vsel %vm709_vm13, %v2306_v28, 0.0 }
 0x80b   : > { %v2313_v53 = vsel %vm709_vm13, %v2305_v43, 0.0  ;;  %v2367_v22 = vmul.f32 %v4540_v39, %v2283_v5 }
 0x80c   : > { %v2307_v19 = vmul.f32 %v4537_v57, %v2259_v56  ;;  %v2315_v54 = vadd.f32 %v2314_v59, %v2313_v53 }
 0x80d   : > { %v2286_v18 = vpop.xlane.xlu0 %2285  ;;  %v2375_v25 = vsel %vm709_vm13, %v2367_v22, 0.0 }
 0x80e   : > { %v2244_v61 = vpop.xlane.xlu1 %2243  ;;  %v2368_v20 = vmul.f32 %v4538_v17, %v2286_v18  ;;  %v2316_v14 = vsel %vm709_vm13, %v2307_v19, 0.0  ;;  %v4548_v18 = vld [vmem:[%s8163_s3 + $0x38] sm:$0xff] }
 0x80f   : > { %v2260_v44 = vmul.f32 0.00390625, %v2244_v61  ;;  %v2317_v3 = vadd.f32 %v2316_v14, %v2315_v54 }
 0x810   : > { %v2376_v55 = vsel %vm709_vm13, %v2368_v20, 0.0 }
 0x811   : > { %v2289_v6 = vpop.xlane.xlu0 %2288  ;;  %v2308_v33 = vmul.f32 %v4539_v49, %v2260_v44  ;;  %v2377_v50 = vadd.f32 %v2376_v55, %v2375_v25 }
 0x812   : > { %v2247_v4 = vpop.xlane.xlu1 %2246  ;;  %v2369_v46 = vmul.f32 %v4541_v24, %v2289_v6 }
 0x813   : > { %v2261_v15 = vmul.f32 0.00390625, %v2247_v4  ;;  %v2318_v12 = vsel %vm709_vm13, %v2308_v33, 0.0  ;;  %v4550_v4 = vld [vmem:[%s8165_s5 + $0x38] sm:$0xff] }
 0x814   : > { %v2378_v41 = vsel %vm709_vm13, %v2369_v46, 0.0  ;;  %v2319_v16 = vadd.f32 %v2318_v12, %v2317_v3 }
 0x815   : > { %v2292_v48 = vpop.xlane.xlu0 %2291  ;;  %v2309_v45 = vmul.f32 %v4542_v38, %v2261_v15  ;;  %v2379_v62 = vadd.f32 %v2378_v41, %v2377_v50  ;;  %v4551_v38 = vld [vmem:[%s8164_s4 + $0x8] sm:$0xff]  ;;  %v4556_v50 = vld [vmem:[%s8164_s4 + $0x20] sm:$0xff] }
 0x816   : > { %v2250_v0 = vpop.xlane.xlu1 %2249  ;;  %v2370_v2 = vmul.f32 %v4543_v37, %v2292_v48 }
 0x817   : > { %v2262_v42 = vmul.f32 0.00390625, %v2250_v0  ;;  %v2320_v27 = vsel %vm709_vm13, %v2309_v45, 0.0 }
 0x818   : > { %v2380_v32 = vsel %vm709_vm13, %v2370_v2, 0.0  ;;  %v2321_v13 = vadd.f32 %v2320_v27, %v2319_v16 }
 0x819   : > { %v2310_v36 = vmul.f32 %v4544_v1, %v2262_v42  ;;  %v2295_v8 = vpop.xlane.xlu0 %2294  ;;  %v2381_v58 = vadd.f32 %v2380_v32, %v2379_v62  ;;  %v4552_v42 = vld [vmem:[%s8164_s4] sm:$0xff]  ;;  %v4553_v1 = vld [vmem:[%s8164_s4 + $0x18] sm:$0xff] }
 0x81a   : > { %v2371_v40 = vmul.f32 %v4545_v34, %v2295_v8  ;;  %v2253_v9 = vpop.xlane.xlu1 %2252  ;;  %v4554_v8 = vld [vmem:[%s8164_s4 + $0x10] sm:$0xff]  ;;  %v4557_v62 = vld [vmem:[%s8164_s4 + $0x38] sm:$0xff] }
 0x81b   : > { %v2263_v21 = vmul.f32 0.00390625, %v2253_v9  ;;  %v2322_v7 = vsel %vm709_vm13, %v2310_v36, 0.0 }
 0x81c   : > { %v2382_v60 = vsel %vm709_vm13, %v2371_v40, 0.0  ;;  %v2323_v5 = vadd.f32 %v2322_v7, %v2321_v13  ;;  %v4555_v40 = vld [vmem:[%s8164_s4 + $0x28] sm:$0xff] }
 0x81d   : > { %v2311_v35 = vmul.f32 %v4546_v51, %v2263_v21  ;;  %v2298_v23 = vpop.xlane.xlu0 %2297  ;;  %v2383_v11 = vadd.f32 %v2382_v60, %v2381_v58  ;;  %v4558_v51 = vld [vmem:[%s8164_s4 + $0x30] sm:$0xff]  ;;  %v4559_v60 = vld [vmem:[%s8166_s6 + $0x8] sm:$0xff] }
 0x81e   : > { %v2372_v52 = vmul.f32 %v4547_v47, %v2298_v23  ;;  %v2256_v10 = vpop.xlane.xlu1 %2255 }
 0x81f   : > { %v2324_v63 = vsel %vm709_vm13, %v2311_v35, 0.0  ;;  %v2264_v26 = vmul.f32 0.00390625, %v2256_v10 }
 0x820   : > { %v2384_v31 = vsel %vm709_vm13, %v2372_v52, 0.0  ;;  %v2325_v28 = vadd.f32 %v2324_v63, %v2323_v5  ;;  %v4560_v52 = vld [vmem:[%s8166_s6] sm:$0xff] }
 0x821   : > { %v2312_v61 = vmul.f32 %v4548_v18, %v2264_v26  ;;  %v2301_v30 = vpop.xlane.xlu0 %2300  ;;  %v2385_v44 = vadd.f32 %v2384_v31, %v2383_v11  ;;  %v4561_v26 = vld [vmem:[%s8166_s6 + $0x18] sm:$0xff]  ;;  %v4562_v31 = vld [vmem:[%s8166_s6 + $0x10] sm:$0xff] }
 0x822   : > { %v2373_v43 = vmul.f32 %v4549_v29, %v2301_v30  ;;  %v2304_v56 = vpop.xlane.xlu1 %2303  ;;  %v4563_v30 = vld [vmem:[%s8166_s6 + $0x28] sm:$0xff]  ;;  %v4564_v29 = vld [vmem:[%s8166_s6 + $0x20] sm:$0xff] }
 0x823   : > { %v2326_v6 = vsel %vm709_vm13, %v2312_v61, 0.0  ;;  %v2374_v59 = vmul.f32 %v4550_v4, %v2304_v56 }
 0x824   : > { %v2327_v53 = vadd.f32 %v2326_v6, %v2325_v28  ;;  %v2386_v57 = vsel %vm709_vm13, %v2373_v43, 0.0  ;;  %v4565_v6 = vld [vmem:[%s8166_s6 + $0x38] sm:$0xff] }
 0x825   : > { %v2387_v19 = vadd.f32 %v2386_v57, %v2385_v44  ;;  %v2388_v15 = vsel %vm709_vm13, %v2374_v59, 0.0  ;;  %v4566_v59 = vld [vmem:[%s8166_s6 + $0x30] sm:$0xff] }
 0x826   : > { %v2328_v17 = vrot.slane %v2327_v53, 4 }
 0x827   : > { %v2389_v20 = vadd.f32 %v2388_v15, %v2387_v19 }
 0x828   : > { %v2329_v49 = vadd.f32 %v2328_v17, %v2327_v53 }
 0x829   : > { %v2390_v33 = vrot.slane %v2389_v20, 4 }
 0x82a   : > { %v2330_v48 = vrot.slane %v2329_v49, 2 }
 0x82b   : > { %v2391_v54 = vadd.f32 %v2390_v33, %v2389_v20 }
 0x82c   : > { %v2331_v39 = vadd.f32 %v2330_v48, %v2329_v49 }
 0x82d   : > { %v2392_v22 = vrot.slane %v2391_v54, 2 }
 0x82e   : > { %v2332_v24 = vrot.slane %v2331_v39, 1 }
 0x82f   : > { %v2393_v0 = vadd.f32 %v2392_v22, %v2391_v54 }
 0x830   : > { %v2333_v46 = vadd.f32 %v2332_v24, %v2331_v39 }
 0x831   : > { %v2394_v37 = vrot.slane %v2393_v0, 1 }
 0x832   : > { %v2334_v14 = vmax.f32 %v2333_v46, 0.0 }
 0x833   : > { %v2395_v25 = vadd.f32 %v2394_v37, %v2393_v0 }
 0x834   : > { %v2336_v45 = vmul.f32 %v4551_v38, %v2334_v14  ;;  %v2335_v55 = vmul.f32 %v4552_v42, %v2334_v14  ;;  %v2338_v36 = vmul.f32 %v4553_v1, %v2334_v14  ;;  %v2337_v3 = vmul.f32 %v4554_v8, %v2334_v14 }
 0x835   : > { %v2340_v9 = vmul.f32 %v4555_v40, %v2334_v14  ;;  %v2339_v27 = vmul.f32 %v4556_v50, %v2334_v14  ;;  %v2396_v21 = vmax.f32 %v2395_v25, 0.0  ;;  %v2342_v7 = vmul.f32 %v4557_v62, %v2334_v14  ;;  %v8477_v62 = vld [vmem:[#allocation42_spill] sm:$0xff] }
 0x836   : > { %v2346_v2 = vsel %vm709_vm13, %v2336_v45, 0.0  ;;  %v2343_v12 = vsel %vm709_vm13, %v2335_v55, 0.0  ;;  %v2352_v41 = vsel %vm709_vm13, %v2338_v36, 0.0  ;;  %v2349_v34 = vsel %vm709_vm13, %v2337_v3, 0.0 }
 0x837   : > { %2347 = vadd.xlane.f32.xlu1 %v2346_v2  ;;  %2344 = vadd.xlane.f32.xlu0 %v2343_v12  ;;  %v2358_v16 = vsel %vm709_vm13, %v2340_v9, 0.0  ;;  %v2355_v32 = vsel %vm709_vm13, %v2339_v27, 0.0  ;;  %v2341_v35 = vmul.f32 %v4558_v51, %v2334_v14  ;;  %v2364_v23 = vsel %vm709_vm13, %v2342_v7, 0.0  ;;  %v8476_v27 = vld [vmem:[#allocation38_spill] sm:$0xff] }
 0x838   : > { %v2398_v47 = vmul.f32 %v4559_v60, %v2396_v21  ;;  %v2397_v10 = vmul.f32 %v4560_v52, %v2396_v21  ;;  %v2400_v5 = vmul.f32 %v4561_v26, %v2396_v21  ;;  %v2399_v11 = vmul.f32 %v4562_v31, %v2396_v21 }
 0x839   : > { %v2361_v13 = vsel %vm709_vm13, %v2341_v35, 0.0  ;;  %v2402_v28 = vmul.f32 %v4563_v30, %v2396_v21  ;;  %v2401_v43 = vmul.f32 %v4564_v29, %v2396_v21  ;;  %v2404_v4 = vmul.f32 %v4565_v6, %v2396_v21 }
 0x83a   : > { %v2408_v58 = vsel %vm709_vm13, %v2398_v47, 0.0  ;;  %v2405_v63 = vsel %vm709_vm13, %v2397_v10, 0.0  ;;  %v2414_v18 = vsel %vm709_vm13, %v2400_v5, 0.0  ;;  %v2411_v61 = vsel %vm709_vm13, %v2399_v11, 0.0 }
 0x83b   : > { %2353 = vadd.xlane.f32.xlu1 %v2352_v41  ;;  %2350 = vadd.xlane.f32.xlu0 %v2349_v34  ;;  %v2420_v56 = vsel %vm709_vm13, %v2402_v28, 0.0  ;;  %v2417_v44 = vsel %vm709_vm13, %v2401_v43, 0.0  ;;  %v2403_v53 = vmul.f32 %v4566_v59, %v2396_v21  ;;  %v2426_v57 = vsel %vm709_vm13, %v2404_v4, 0.0  ;;  %v8475_v41 = vld [vmem:[#allocation39_spill] sm:$0xff]  ;;  %v8480_v43 = vld [vmem:[#allocation50_spill] sm:$0xff] }
 0x83d   : > { %v2423_v19 = vsel %vm709_vm13, %v2403_v53, 0.0 }
 0x83f   : > { %2359 = vadd.xlane.f32.xlu1 %v2358_v16  ;;  %2356 = vadd.xlane.f32.xlu0 %v2355_v32 }
 0x843   : > { %2365 = vadd.xlane.f32.xlu1 %v2364_v23  ;;  %2362 = vadd.xlane.f32.xlu0 %v2361_v13  ;;  %v8478_v13 = vld [vmem:[#allocation40_spill] sm:$0xff] }
 0x847   : > { %2409 = vadd.xlane.f32.xlu1 %v2408_v58  ;;  %2406 = vadd.xlane.f32.xlu0 %v2405_v63  ;;  %v8479_v63 = vld [vmem:[#allocation51_spill] sm:$0xff] }
 0x84b   : > { %2415 = vadd.xlane.f32.xlu1 %v2414_v18  ;;  %2412 = vadd.xlane.f32.xlu0 %v2411_v61 }
 0x84f   : > { %2421 = vadd.xlane.f32.xlu1 %v2420_v56  ;;  %2418 = vadd.xlane.f32.xlu0 %v2417_v44 }
 0x853   : > { %2427 = vadd.xlane.f32.xlu1 %v2426_v57  ;;  %2424 = vadd.xlane.f32.xlu0 %v2423_v19 }
 0x8ac   : > { %v3438_v15 = vpop.f32.mrb[8].mxu0 }
 0x8ad   : > { %v3440_v17 = vpop.f32.mrb[9].mxu0  ;;  %v3439_v34 = vadd.f32 %v3438_v15, %v8475_v41 }
 0x8ae   : > { %v3441_v40 = vadd.f32 %v3440_v17, %v8475_v41 }
 0x8b0   : > { %v3444_v20 = vpop.f32.mrb[10].mxu0 }
 0x8b1   : > { %v3446_v49 = vpop.f32.mrb[11].mxu0  ;;  %v3445_v21 = vadd.f32 %v3444_v20, %v8476_v27 }
 0x8b2   : > { %v3447_v16 = vadd.f32 %v3446_v49, %v8476_v27 }
 0x8b4   : > { %v3450_v33 = vpop.f32.mrb[12].mxu0 }
 0x8b5   : > { %v3452_v48 = vpop.f32.mrb[13].mxu0  ;;  %v3451_v7 = vadd.f32 %v3450_v33, %v8477_v62 }
 0x8b6   : > { %v3453_v51 = vadd.f32 %v3452_v48, %v8477_v62 }
 0x8b8   : > { %v3456_v54 = vpop.f32.mrb[14].mxu0 }
 0x8b9   : > { %v3458_v39 = vpop.f32.mrb[15].mxu0  ;;  %v3457_v60 = vadd.f32 %v3456_v54, %v8478_v13 }
 0x8ba   : > { %v3459_v47 = vadd.f32 %v3458_v39, %v8478_v13 }
 0x8bc   : > { %v3462_v22 = vpop.f32.mrb[16].mxu0 }
 0x8bd   : > { %v3464_v24 = vpop.f32.mrb[17].mxu0  ;;  %v3463_v26 = vadd.f32 %v3462_v22, %v8479_v63  ;;  %v8481_v22 = vld [vmem:[#allocation60_spill] sm:$0xff] }
 0x8be   : > { %v3465_v61 = vadd.f32 %v3464_v24, %v8479_v63 }
 0x8c0   : > { %v3468_v46 = vpop.f32.mrb[18].mxu0 }
 0x8c1   : > { %v3470_v0 = vpop.f32.mrb[19].mxu0  ;;  %v3469_v56 = vadd.f32 %v3468_v46, %v8480_v43 }
 0x8c2   : > { %v3471_v4 = vadd.f32 %v3470_v0, %v8480_v43 }
 0x8c4   : > { %v3474_v14 = vpop.f32.mrb[20].mxu0  ;;  %v2345_v38 = vpop.xlane.xlu0 %2344 }
 0x8c5   : > { %v2348_v45 = vpop.xlane.xlu1 %2347  ;;  %v8028_v42 = vpop.f32.mrb[21].mxu0  ;;  %v3475_v24 = vadd.f32 %v3474_v14, %v8481_v22 }
 0x8c8   : > { %v8030_v55 = vpop.f32.mrb[22].mxu0  ;;  %v2351_v37 = vpop.xlane.xlu0 %2350 }
 0x8c9   : > { %v2354_v2 = vpop.xlane.xlu1 %2353  ;;  %v8032_v12 = vpop.f32.mrb[23].mxu0 }
 0x8cc   : > { %v2357_v1 = vpop.xlane.xlu0 %2356 }
 0x8cd   : > { %v2360_v36 = vpop.xlane.xlu1 %2359 }
 0x8d0   : > { %v2363_v8 = vpop.xlane.xlu0 %2362 }
 0x8d1   : > { %v8034_v3 = vpop.xlane.xlu1 %2365 }
 0x8d4   : > { %v2407_v25 = vpop.xlane.xlu0 %2406 }
 0x8d5   : > { %v2429_v9 = vadd.f32 %v2407_v25, %v2345_v38  ;;  %v2410_v50 = vpop.xlane.xlu1 %2409 }
 0x8d6   : > { %v2430_v32 = vadd.f32 %v2410_v50, %v2348_v45 }
 0x8d7   : > { %v3485_v35 = vadd.f32 %v3439_v34, %v2429_v9  ;;  %v3486_v23 = vadd.f32 %v3441_v40, %v2429_v9 }
 0x8d8   : > { %v3487_v52 = vadd.f32 %v3445_v21, %v2430_v32  ;;  %v3488_v10 = vadd.f32 %v3447_v16, %v2430_v32  ;;  %v2413_v58 = vpop.xlane.xlu0 %2412 }
 0x8d9   : > { %v3818_v5 = vmul.f32 -1.442695, %v3485_v35  ;;  %v3819_v31 = vmul.f32 -1.442695, %v3486_v23  ;;  %v2431_v11 = vadd.f32 %v2413_v58, %v2351_v37  ;;  %v2416_v18 = vpop.xlane.xlu1 %2415 }
 0x8da   : > { %v3820_v30 = vmul.f32 -1.442695, %v3487_v52  ;;  %v3821_v28 = vmul.f32 -1.442695, %v3488_v10  ;;  %v2432_v29 = vadd.f32 %v2416_v18, %v2354_v2 }
 0x8db   : > { %4404 = vpow2.f32 %v3818_v5  ;;  %v3489_v44 = vadd.f32 %v3451_v7, %v2431_v11  ;;  %v3490_v6 = vadd.f32 %v3453_v51, %v2431_v11  ;;  %v3477_v7 = vadd.f32 %v8028_v42, %v8481_v22 }
 0x8dc   : > { %4406 = vpow2.f32 %v3819_v31  ;;  %v3491_v59 = vadd.f32 %v3457_v60, %v2432_v29  ;;  %v3492_v53 = vadd.f32 %v3459_v47, %v2432_v29  ;;  %v2419_v57 = vpop.xlane.xlu0 %2418  ;;  %v8482_v47 = vld [vmem:[#allocation58_spill] sm:$0xff] }
 0x8dd   : > { %4408 = vpow2.f32 %v3820_v30  ;;  %v3822_v19 = vmul.f32 -1.442695, %v3489_v44  ;;  %v3823_v15 = vmul.f32 -1.442695, %v3490_v6  ;;  %v2433_v17 = vadd.f32 %v2419_v57, %v2357_v1  ;;  %v2422_v20 = vpop.xlane.xlu1 %2421 }
 0x8de   : > { %4410 = vpow2.f32 %v3821_v28  ;;  %v3824_v49 = vmul.f32 -1.442695, %v3491_v59  ;;  %v3825_v33 = vmul.f32 -1.442695, %v3492_v53  ;;  %v2434_v48 = vadd.f32 %v2422_v20, %v2360_v36  ;;  %v4567_v20 = vld [vmem:[%s5005_s28] sm:$0xff] }
 0x8df   : > { %4412 = vpow2.f32 %v3822_v19  ;;  %v3493_v54 = vadd.f32 %v3463_v26, %v2433_v17  ;;  %v3494_v39 = vadd.f32 %v3465_v61, %v2433_v17  ;;  %v3481_v52 = vadd.f32 %v8030_v55, %v8482_v47  ;;  %v8484_v19 = vld [vmem:[#allocation47_spill] sm:$0xff] }
 0x8e0   : > { %4414 = vpow2.f32 %v3823_v15  ;;  %v3495_v46 = vadd.f32 %v3469_v56, %v2434_v48  ;;  %v3496_v0 = vadd.f32 %v3471_v4, %v2434_v48  ;;  %v2425_v38 = vpop.xlane.xlu0 %2424  ;;  %v3483_v26 = vadd.f32 %v8032_v12, %v8482_v47  ;;  %v8483_v4 = vld [vmem:[#allocation43_spill] sm:$0xff]  ;;  %v4574_v47 = vld [vmem:[%s5005_s28 + $0x38] sm:$0xff] }
 0x8e1   : > { %4416 = vpow2.f32 %v3824_v49  ;;  %v3826_v45 = vmul.f32 -1.442695, %v3493_v54  ;;  %v3827_v37 = vmul.f32 -1.442695, %v3494_v39  ;;  %v2435_v2 = vadd.f32 %v2425_v38, %v2363_v8  ;;  %v2428_v27 = vpop.xlane.xlu1 %2427  ;;  %v4568_v39 = vld [vmem:[%s5005_s28 + $0x8] sm:$0xff]  ;;  %v4569_v38 = vld [vmem:[%s5005_s28 + $0x10] sm:$0xff] }
 0x8e2   : > { %4418 = vpow2.f32 %v3825_v33  ;;  %v3828_v1 = vmul.f32 -1.442695, %v3495_v46  ;;  %v3829_v25 = vmul.f32 -1.442695, %v3496_v0  ;;  %v2436_v35 = vadd.f32 %v2428_v27, %v8034_v3  ;;  %v8485_v33 = vld [vmem:[#allocation41_spill] sm:$0xff] }
 0x8e3   : > { %4420 = vpow2.f32 %v3826_v45  ;;  %v3497_v41 = vadd.f32 %v3475_v24, %v2435_v2  ;;  %v3498_v58 = vadd.f32 %v3477_v7, %v2435_v2  ;;  %v8486_v24 = vld [vmem:[#allocation46_spill] sm:$0xff] }
 0x8e4   : > { %4422 = vpow2.f32 %v3827_v37  ;;  %v3499_v3 = vadd.f32 %v3481_v52, %v2436_v35  ;;  %v3500_v61 = vadd.f32 %v3483_v26, %v2436_v35  ;;  %v8488_v37 = vld [vmem:[#allocation53_spill] sm:$0xff]  ;;  %v4575_v26 = vld [vmem:[%s5005_s28 + $0x40] sm:$0xff] }
 0x8e5   : > { %v4405_v36 = vpop.eup %4404  ;;  %4424 = vpow2.f32 %v3828_v1  ;;  %v3830_v34 = vmul.f32 -1.442695, %v3497_v41  ;;  %v3831_v28 = vmul.f32 -1.442695, %v3498_v58 }
 0x8e6   : > { %v4407_v40 = vpop.eup %4406  ;;  %v3549_v9 = vadd.f32 1.0, %v4405_v36  ;;  %4426 = vpow2.f32 %v3829_v25  ;;  %v3832_v44 = vmul.f32 -1.442695, %v3499_v3  ;;  %v3833_v53 = vmul.f32 -1.442695, %v3500_v61  ;;  %v4570_v25 = vld [vmem:[%s5005_s28 + $0x18] sm:$0xff] }
 0x8e7   : > { %v4409_v14 = vpop.eup %4408  ;;  %v3550_v50 = vadd.f32 1.0, %v4407_v40  ;;  %4428 = vpow2.f32 %v3830_v34  ;;  %v8489_v36 = vld [vmem:[#allocation57_spill] sm:$0xff] }
 0x8e8   : > { %v4411_v21 = vpop.eup %4410  ;;  %4430 = vrcp.f32 %v3549_v9  ;;  %v3551_v16 = vadd.f32 1.0, %v4409_v14  ;;  %v4571_v9 = vld [vmem:[%s5005_s28 + $0x20] sm:$0xff]  ;;  %v8495_v61 = vld [vmem:[#allocation65_spill] sm:$0xff] }
 0x8e9   : > { %v4413_v8 = vpop.eup %4412  ;;  %4432 = vrcp.f32 %v3550_v50  ;;  %v3552_v32 = vadd.f32 1.0, %v4411_v21  ;;  %v8490_v50 = vld [vmem:[#allocation52_spill] sm:$0xff] }
 0x8ea   : > { %v4415_v62 = vpop.eup %4414  ;;  %4434 = vrcp.f32 %v3551_v16  ;;  %v3553_v51 = vadd.f32 1.0, %v4413_v8  ;;  %v4572_v16 = vld [vmem:[%s5005_s28 + $0x28] sm:$0xff] }
 0x8eb   : > { %v4417_v23 = vpop.eup %4416  ;;  %4436 = vrcp.f32 %v3552_v32  ;;  %v3554_v13 = vadd.f32 1.0, %v4415_v62  ;;  %v8491_v32 = vld [vmem:[#allocation56_spill] sm:$0xff] }
 0x8ec   : > { %v4419_v60 = vpop.eup %4418  ;;  %4438 = vrcp.f32 %v3553_v51  ;;  %v3555_v10 = vadd.f32 1.0, %v4417_v23  ;;  %v4573_v51 = vld [vmem:[%s5005_s28 + $0x30] sm:$0xff]  ;;  %v8492_v23 = vld [vmem:[#allocation63_spill] sm:$0xff] }
 0x8ed   : > { %v4421_v63 = vpop.eup %4420  ;;  %4440 = vrcp.f32 %v3554_v13  ;;  %v3556_v42 = vadd.f32 1.0, %v4419_v60 }
 0x8ee   : > { %v4423_v5 = vpop.eup %4422  ;;  %4442 = vrcp.f32 %v3555_v10  ;;  %v3557_v31 = vadd.f32 1.0, %v4421_v63  ;;  %v8493_v10 = vld [vmem:[#allocation66_spill] sm:$0xff] }
 0x8ef   : > { %v4425_v11 = vpop.eup %4424  ;;  %4444 = vrcp.f32 %v3556_v42  ;;  %v3558_v18 = vadd.f32 1.0, %v4423_v5  ;;  %v8494_v5 = vld [vmem:[#allocation62_spill] sm:$0xff] }
 0x8f0   : > { %v4427_v30 = vpop.eup %4426  ;;  %4446 = vrcp.f32 %v3557_v31  ;;  %v3559_v55 = vadd.f32 1.0, %v4425_v11  ;;  %v4576_v11 = vld [vmem:[%s5005_s28 + $0x48] sm:$0xff] }
 0x8f1   : > { %v4429_v29 = vpop.eup %4428  ;;  %4448 = vrcp.f32 %v3558_v18  ;;  %v3560_v43 = vadd.f32 1.0, %v4427_v30 }
 0x8f2   : > { %v4431_v56 = vpop.eup %4430  ;;  %4450 = vrcp.f32 %v3559_v55  ;;  %v3561_v12 = vadd.f32 1.0, %v4429_v29 }
 0x8f3   : > { %v4433_v6 = vpop.eup %4432  ;;  %v3597_v59 = vmul.f32 %v4431_v56, %v8483_v4  ;;  %4452 = vrcp.f32 %v3560_v43 }
 0x8f4   : > { %v4435_v57 = vpop.eup %4434  ;;  %v3598_v15 = vmul.f32 %v4433_v6, %v8484_v19  ;;  %4454 = vpow2.f32 %v3831_v28  ;;  %v4577_v28 = vld [vmem:[%s5005_s28 + $0x50] sm:$0xff] }
 0x8f5   : > { %v4437_v17 = vpop.eup %4436  ;;  %v3613_v49 = vadd.f32 %v4567_v20, %v3597_v59  ;;  %v3599_v48 = vmul.f32 %v4435_v57, %v8485_v33  ;;  %4456 = vrcp.f32 %v3561_v12  ;;  %v4578_v12 = vld [vmem:[%s5005_s28 + $0x58] sm:$0xff]  ;;  %v8496_v6 = vld [vmem:[#allocation68_spill] sm:$0xff]  ;;  %v4579_v57 = vld [vmem:[%s5005_s28 + $0x60] sm:$0xff] }
 0x8f6   : > { %v4439_v54 = vpop.eup %4438  ;;  %v3614_v22 = vadd.f32 %v4568_v39, %v3598_v15  ;;  %v3600_v46 = vmul.f32 %v4437_v17, %v8486_v24  ;;  %4458 = vpow2.f32 %v3832_v44  ;;  %v8497_v20 = vld [vmem:[#allocation71_spill] sm:$0xff] }
 0x8f7   : > { %v4441_v0 = vpop.eup %4440  ;;  %3629 = vst [vmem:[%s8064_s14] sm:$0xff] %v3613_v49  ;;  %v3615_v45 = vadd.f32 %v4569_v38, %v3599_v48  ;;  %v3601_v2 = vmul.f32 %v4439_v54, %v8488_v37  ;;  %4460 = vpow2.f32 %v3833_v53  ;;  %v4580_v54 = vld [vmem:[%s5005_s28 + $0x68] sm:$0xff]  ;;  %v4581_v38 = vld [vmem:[%s5005_s28 + $0x70] sm:$0xff]  ;;  %v4582_v37 = vld [vmem:[%s5005_s28 + $0x78] sm:$0xff] }
 0x8f8   : > { %v4443_v1 = vpop.eup %4442  ;;  %3630 = vst [vmem:[%s8064_s14 + $0x8] sm:$0xff] %v3614_v22  ;;  %v3616_v41 = vadd.f32 %v4570_v25, %v3600_v46  ;;  %v3602_v34 = vmul.f32 %v4441_v0, %v8489_v36  ;;  %v8498_v22 = vld [vmem:[#allocation67_spill] sm:$0xff]  ;;  %v8499_v46 = vld [vmem:[#allocation70_spill] sm:$0xff] }
 0x8f9   : > { %v4445_v40 = vpop.eup %4444  ;;  %3631 = vst [vmem:[%s8064_s14 + $0x10] sm:$0xff] %v3615_v45  ;;  %v3617_v14 = vadd.f32 %v4571_v9, %v3601_v2  ;;  %v3603_v27 = vmul.f32 %v4443_v1, %v8490_v50 }
 0x8fa   : > { %v4447_v21 = vpop.eup %4446  ;;  %3632 = vst [vmem:[%s8064_s14 + $0x18] sm:$0xff] %v3616_v41  ;;  %v3618_v8 = vadd.f32 %v4572_v16, %v3602_v34  ;;  %v3604_v62 = vmul.f32 %v4445_v40, %v8491_v32 }
 0x8fb   : > { %v4449_v7 = vpop.eup %4448  ;;  %3633 = vst [vmem:[%s8064_s14 + $0x20] sm:$0xff] %v3617_v14  ;;  %v3619_v35 = vadd.f32 %v4573_v51, %v3603_v27  ;;  %v3605_v13 = vmul.f32 %v4447_v21, %v8492_v23 }
 0x8fc   : > { %v4451_v60 = vpop.eup %4450  ;;  %3634 = vst [vmem:[%s8064_s14 + $0x28] sm:$0xff] %v3618_v8  ;;  %v3620_v52 = vadd.f32 %v4574_v47, %v3604_v62  ;;  %v3606_v58 = vmul.f32 %v4449_v7, %v8493_v10 }
 0x8fd   : > { %v4453_v63 = vpop.eup %4452  ;;  %3635 = vst [vmem:[%s8064_s14 + $0x30] sm:$0xff] %v3619_v35  ;;  %v3621_v42 = vadd.f32 %v4575_v26, %v3605_v13  ;;  %v3607_v31 = vmul.f32 %v4451_v60, %v8494_v5 }
 0x8fe   : > { %v4455_v3 = vpop.eup %4454  ;;  %3636 = vst [vmem:[%s8064_s14 + $0x38] sm:$0xff] %v3620_v52  ;;  %v3622_v18 = vadd.f32 %v4576_v11, %v3606_v58  ;;  %v3608_v30 = vmul.f32 %v4453_v63, %v8495_v61 }
 0x8ff   : > { %v4457_v55 = vpop.eup %4456  ;;  %3637 = vst [vmem:[%s8064_s14 + $0x40] sm:$0xff] %v3621_v42  ;;  %v3623_v29 = vadd.f32 %v4577_v28, %v3607_v31  ;;  %v3562_v43 = vadd.f32 1.0, %v4455_v3 }
 0x900   : > { %v4459_v56 = vpop.eup %4458  ;;  %3638 = vst [vmem:[%s8064_s14 + $0x48] sm:$0xff] %v3622_v18  ;;  %v3624_v44 = vadd.f32 %v4578_v12, %v3608_v30  ;;  %v3609_v4 = vmul.f32 %v4457_v55, %v8496_v6 }
 0x901   : > { %v4461_v59 = vpop.eup %4460  ;;  %3639 = vst [vmem:[%s8064_s14 + $0x50] sm:$0xff] %v3623_v29  ;;  %4462 = vrcp.f32 %v3562_v43  ;;  %v3563_v53 = vadd.f32 1.0, %v4459_v56 }
 0x902   : > { %3640 = vst [vmem:[%s8064_s14 + $0x58] sm:$0xff] %v3624_v44  ;;  %v3625_v19 = vadd.f32 %v4579_v57, %v3609_v4  ;;  %v3564_v15 = vadd.f32 1.0, %v4461_v59 }
 0x903   : > { %4464 = vrcp.f32 %v3563_v53 }
 0x904   : > { %3641 = vst [vmem:[%s8064_s14 + $0x60] sm:$0xff] %v3625_v19  ;;  %4466 = vrcp.f32 %v3564_v15 }
 0x90b   : > { %v4463_v17 = vpop.eup %4462 }
 0x90c   : > { %v3610_v49 = vmul.f32 %v4463_v17, %v8497_v20 }
 0x90d   : > { %v4465_v33 = vpop.eup %4464 }
 0x90e   : > { %v4467_v48 = vpop.eup %4466  ;;  %v3626_v39 = vadd.f32 %v4580_v54, %v3610_v49  ;;  %v3611_v24 = vmul.f32 %v4465_v33, %v8498_v22 }
 0x90f   : > { %v3612_v0 = vmul.f32 %v4467_v48, %v8499_v46 }
 0x910   : > { %3642 = vst [vmem:[%s8064_s14 + $0x68] sm:$0xff] %v3626_v39  ;;  %v3627_v45 = vadd.f32 %v4581_v38, %v3611_v24 }
 0x911   : > { %v3628_v2 = vadd.f32 %v4582_v37, %v3612_v0 }
 0x912   : > { %3643 = vst [vmem:[%s8064_s14 + $0x70] sm:$0xff] %v3627_v45 }
 0x913   : > { %3644 = vst [vmem:[%s8064_s14 + $0x78] sm:$0xff] %v3628_v2 }
 0x914   : > { %4682 = shalt.err (!%p4679_p13)
}
 0x915   : > { %s4683_s28 = scalar_lea.hbm %s8110_s11, 2048  ;;  %s4687_s27 = scalar_lea.hbm %s8500_s22, 4096 }
 0x916   : > { %p4684_p6 = scmp.ne.s32.totalorder %s8110_s11, %s4683_s28  ;;  %p4688_p5 = scmp.lt.u32.totalorder %s8110_s11, %s8500_s22 }
 0x917   : > { %p4689_p8 = scmp.lt.u32.totalorder %s4687_s27, %s4683_s28  ;;  %p4691_p0 = scmp.lt.u32.totalorder %s4683_s28, %s8110_s11 }
 0x918   : > { %p4685_p10 = pnand %p4684_p6, %p8501_p2 }
 0x919   : > { %p4690_p11 = por %p4689_p8, %p4688_p5 }
 0x91a   : > { %p4686_p4 = pneg %p4685_p10 }
 0x91b   : > { %p4692_p3 = por %p4691_p0, %p4690_p11 }
 0x91d   : > { %p4693_p7 = pnand %p4692_p3, %p4686_p4 }
 0x91f   : > { %4696 = shalt.err (!%p4693_p7)
}
 0x920   : > { %s4757_s13 = smov 256  }
 0x921   : > { %4268 = dma.vmem_to_hbm [thread:$0]  (%p8501_p2), %s8113_s23, 2048, %s8110_s11, %s3646_s21, %s4757_s13, %s4757_s13, %s8380_s8  }
 0x922 PF: > { %s8502_s29 = sld [smem:[#allocation12_spill]]  ;;  %s8503_s12 = sld [smem:[#allocation13_spill]] }
 0x923   : > { %p8505_p12 = scmp.ge.s32.totalorder %s4739_s20, 2 }
 0x928   : > { %s3674_s26 = sand.u32 1, %s8502_s29   ;;  %p8504_p9 = scmp.ne.s32.totalorder %s8503_s12, 0 }
 0x929   : > { %s3675_s2 = scalar_lea.sflag [#allocation4], %s3674_s26 }
 0x92a   : > { %p4282_p1 = pnand %p8505_p12, %p8504_p9 }
 0x92c   : > { %4722 = dma.done.wait (!%p4282_p1), %s3675_s2, 2048  }
 0x92d   : > { %4724 = vsyncadd (!%p4282_p1), %s3675_s2, 4294965248  ;;  %p25_p13 = scmp.ge.s32.totalorder %s4934_s24, 4   ;;  %s8506_s17 = smov %s4731_s18 }
 0x92e   : > { %s8507_s18 = smov %s4735_s19  ;;  %s8508_s19 = smov %s4950_s16 }
 0x92f   : > { %s8509_s20 = smov %s4934_s24  ;;  %27 = sbr.rel (!%p25_p13) target bundleno = 12 (0xc), region = 129 }
 0x936   :  { %3680 = vsyncpa [#allocation3], 1 }
 0x937   :  { %3682 = vsyncpa [#allocation3 + $0x1], 1 }
 0x938   :  { %3683 = vsyncpa [#allocation6], 1 }
 0x939   :  { %3684 = vsyncpa [#allocation4], 1 }
 0x93a   :  { %3686 = vsyncpa [#allocation4 + $0x1], 1 }

</bundles_post_ra>
